<compile_context>
chip_gen: v7x
topology: tpu7x:2x2x1
jax: 0.10.0
libtpu: 0.0.40
codegen_flags: <defaults>
</compile_context>

<pallas_src>
import functools
import inspect

import jax
import jax.numpy as jnp
from jax import lax
from jax.experimental import pallas as pl
from jax.experimental.pallas import tpu as pltpu

_MIB = 1024 * 1024

try:
    _HAS_PIPELINE_MODE = ("pipeline_mode"
                          in inspect.signature(pl.BlockSpec).parameters)
except (TypeError, ValueError):
    _HAS_PIPELINE_MODE = False
# Flipped to False on the first failure so later blocks do not retry.
_SINGLE_BUFFER_CONSTS = _HAS_PIPELINE_MODE and hasattr(pl, "Buffered")


def _vmem_limit_bytes():
    """Generation-aware VMEM limit (v7x: 64 MiB/core, v5e/v6e: 128 MiB) minus
    headroom for compiler-internal scratch."""
    try:
        cap = int(pltpu.get_tpu_info().vmem_capacity_bytes)
    except Exception:
        cap = 64 * _MIB            # conservative default (v7x-sized)
    return max(32 * _MIB, cap - 16 * _MIB)


# ---------------------------------------------------------------------------
# Fused kernel: 1x1 conv -> dilated KxK conv [-> 1x1 conv -> +residual]
# (every conv followed by folded eval-mode BatchNorm and optional ReLU).
# ---------------------------------------------------------------------------
def _fused_block_kernel(x_ref, w1_ref, s1_ref, w2_ref, s2_ref, *rest,
                        K, dil, pad, TH, H, W, relu, residual, has_c):
    if has_c:
        w3_ref, s3_ref, o_ref, y1_ref = rest
    else:
        o_ref, y1_ref = rest

    cin = x_ref.shape[-1]
    cm = w1_ref.shape[-1]
    t = pl.program_id(1)

    # Phase 1 (first H-tile of each image): 1x1 conv over the whole image.
    # Its output -- including the zero-padding ring the dilated KxK conv
    # needs -- lives only in the VMEM scratch y1_ref; it never touches HBM.
    @pl.when(t == 0)
    def _():
        y1_ref[...] = jnp.zeros_like(y1_ref)            # zero padding ring
        a = jnp.dot(x_ref[...].reshape(H * W, cin), w1_ref[...],
                    preferred_element_type=jnp.float32)
        a = a + s1_ref[...]
        if relu:
            a = jnp.maximum(a, 0.0)
        y1_ref[pad:pad + H, pad:pad + W, :] = (
            a.reshape(H, W, cm).astype(y1_ref.dtype))

    # Phase 2 (every H-tile): dilated KxK conv over the resident intermediate.
    # One aligned row-block load per kernel row ky; the K taps along kx are
    # grouped on the contraction axis (K*cm deep) so the 256-deep MXU on
    # v6e/v7x is filled and the accumulator is touched K times, not K*K.
    # TODO(synk): the kx window extraction is a sublane shift; pltpu.roll on
    # the row block would move that copy onto the XLU slot.
    r0 = t * TH
    acc = None
    for ky in range(K):
        rows = y1_ref[pl.ds(r0 + ky * dil, TH)]                 # (TH, Wp, cm)
        lhs = jnp.concatenate(
            [rows[:, kx * dil:kx * dil + W, :] for kx in range(K)], axis=-1)
        part = jnp.dot(lhs.reshape(TH * W, K * cm), w2_ref[ky],
                       preferred_element_type=jnp.float32)
        acc = part if acc is None else acc + part
    y2 = acc + s2_ref[...]
    if relu:
        y2 = jnp.maximum(y2, 0.0)

    # Phase 3: optional 1x1 expand, f32 epilogue, residual, store.
    if has_c:
        y3 = jnp.dot(y2.astype(x_ref.dtype), w3_ref[...],
                     preferred_element_type=jnp.float32) + s3_ref[...]
        if relu:
            y3 = jnp.maximum(y3, 0.0)
        y3 = y3.reshape(TH, W, o_ref.shape[-1])
        if residual:
            y3 = y3 + x_ref[pl.ds(r0, TH)].astype(jnp.float32)
        o_ref[...] = y3.astype(o_ref.dtype)
    else:
        o_ref[...] = y2.reshape(TH, W, o_ref.shape[-1]).astype(o_ref.dtype)


# ---------------------------------------------------------------------------
# VMEM accounting / tile selection
# ---------------------------------------------------------------------------
def _estimate_vmem_bytes(H, W, TH, cin, cm, cb, cout, K, pad):
    Hp, Wp = H + 2 * pad, W + 2 * pad
    bf = 2                                                   # bf16 bytes
    est = 2 * H * W * cin * bf                               # resident x plane (x2 bufs)
    est += Hp * Wp * cm * bf                                 # padded intermediate scratch
    est += 2 * (cin * cm + K * K * cm * cb + cb * cout) * bf  # weights (<=2 bufs)
    est += 2 * TH * W * cout * bf                            # output tile (x2 bufs)
    est += TH * W * K * cm * bf                              # grouped-tap LHS
    est += TH * W * cb * 4                                   # f32 conv_b accumulator
    est += TH * W * cout * 4                                 # f32 epilogue
    est += H * W * cm * 4                                    # f32 whole-image 1x1 result
    return est


def _pick_tile_h(H, W, cin, cm, cb, cout, K, pad, budget):
    for th in (d for d in range(H, 0, -1) if H % d == 0):
        if _estimate_vmem_bytes(H, W, th, cin, cm, cb, cout, K, pad) <= budget:
            return th
    # TODO(synk): feature maps so large that even TH=1 does not fit would need
    # a halo'd per-tile BlockSpec for x / y1 instead of per-image residency.
    return 1


# ---------------------------------------------------------------------------
# Wrapper for one fused block
# ---------------------------------------------------------------------------
def fused_conv_block(x_nhwc, p, *, compute_dtype=jnp.bfloat16, tile_h=None):
    global _SINGLE_BUFFER_CONSTS
    B, H, W, Cin = x_nhwc.shape
    K, dil, pad = p["k"], p["d"], p["p"]
    has_c, relu, residual = p["has_c"], p["relu"], p["residual"]
    Cm = p["w1"].shape[-1]
    Cb = p["w2g"].shape[-1]
    Cout = p["w3"].shape[-1] if has_c else Cb
    assert 2 * pad == (K - 1) * dil, (K, dil, pad)
    if residual:
        assert Cin == Cout

    vmem_limit = _vmem_limit_bytes()
    if tile_h is None:
        tile_h = _pick_tile_h(H, W, Cin, Cm, Cb, Cout, K, pad,
                              budget=int(0.6 * vmem_limit))
    assert H % tile_h == 0, (H, tile_h)
    nH = H // tile_h

    args = [x_nhwc.astype(compute_dtype),
            p["w1"].astype(compute_dtype),
            p["s1"].reshape(1, Cm).astype(jnp.float32),
            p["w2g"].astype(compute_dtype),
            p["s2"].reshape(1, Cb).astype(jnp.float32)]
    const_shapes = [((Cin, Cm), lambda b, t: (0, 0)),
                    ((1, Cm), lambda b, t: (0, 0)),
                    ((K, K * Cm, Cb), lambda b, t: (0, 0, 0)),
                    ((1, Cb), lambda b, t: (0, 0))]
    if has_c:
        args += [p["w3"].astype(compute_dtype),
                 p["s3"].reshape(1, Cout).astype(jnp.float32)]
        const_shapes += [((Cb, Cout), lambda b, t: (0, 0)),
                         ((1, Cout), lambda b, t: (0, 0))]

    kernel = functools.partial(
        _fused_block_kernel, K=K, dil=dil, pad=pad, TH=tile_h, H=H, W=W,
        relu=relu, residual=residual, has_c=has_c)

    def run(single_buffer_consts):
        def const_spec(shape, idx):
            # Constant-index inputs (weights / scales): single-buffer them so
            # VMEM is not wasted on a duplicate copy that never changes.
            if single_buffer_consts:
                return pl.BlockSpec(shape, idx, pipeline_mode=pl.Buffered(1))
            return pl.BlockSpec(shape, idx)

        in_specs = [
            # Whole image resident across the H-tile axis: it is DMA'd only
            # when the image index changes (the next image is prefetched).
            pl.BlockSpec((pl.Squeezed(), H, W, Cin), lambda b, t: (b, 0, 0, 0))
        ] + [const_spec(s, idx) for s, idx in const_shapes]

        return pl.pallas_call(
            kernel,
            out_shape=jax.ShapeDtypeStruct((B, H, W, Cout), compute_dtype),
            grid=(B, nH),
            in_specs=in_specs,
            out_specs=pl.BlockSpec((pl.Squeezed(), tile_h, W, Cout),
                                   lambda b, t: (b, t, 0, 0)),
            scratch_shapes=[pltpu.VMEM((H + 2 * pad, W + 2 * pad, Cm),
                                       compute_dtype)],
            compiler_params=pltpu.CompilerParams(
                # The H-tile axis reuses the per-image VMEM intermediate, so
                # it must stay on one core; the batch axis is megacore-parallel.
                dimension_semantics=("parallel", "arbitrary"),
                vmem_limit_bytes=vmem_limit),
        )(*args)

    if _SINGLE_BUFFER_CONSTS:
        try:
            return run(True)
        except Exception:
            _SINGLE_BUFFER_CONSTS = False     # older API: fall back once
    return run(False)


# ---------------------------------------------------------------------------
# Deterministic parameter construction (mirrors DilatedEncoder._init_weight)
# ---------------------------------------------------------------------------
def _fold_bn(cout):
    """Eval-mode BatchNorm at its initialization (gamma=1, beta=0,
    running_mean=0, running_var=1, eps=1e-5) folded to per-channel scale/shift."""
    eps = 1e-5
    gamma = jnp.ones((cout,), jnp.float32)
    beta = jnp.zeros((cout,), jnp.float32)
    mean = jnp.zeros((cout,), jnp.float32)
    var = jnp.ones((cout,), jnp.float32)
    scale = gamma * lax.rsqrt(var + eps)
    return scale, beta - mean * scale


def _conv_weight(key, cin, cout, k, init):
    if init == "xavier":            # c2_xavier_fill == kaiming_uniform_(a=1)
        bound = (3.0 / (cin * k * k)) ** 0.5
        return jax.random.uniform(key, (cout, cin, k, k), jnp.float32,
                                  -bound, bound)
    return 0.01 * jax.random.normal(key, (cout, cin, k, k), jnp.float32)


def build_dilated_encoder(key, in_dim, out_dim, expand_ratio, dilations):
    """Parameters in PyTorch (Cout, Cin, kh, kw) layout, grouped per block."""
    inter = int(round(out_dim * expand_ratio))
    keys = jax.random.split(key, 2 + 3 * len(dilations))

    def conv(k_, cin, cout, k, d, pad, init):
        scale, shift = _fold_bn(cout)
        return dict(w=_conv_weight(k_, cin, cout, k, init),
                    scale=scale, shift=shift, k=k, d=d, p=pad)

    blocks = []
    # projector: Conv(in,out,k=1,act=None,BN) -> Conv(out,out,k=3,p=1,act=None,BN)
    blocks.append(dict(
        convs=[conv(keys[0], in_dim, out_dim, 1, 1, 0, "xavier"),
               conv(keys[1], out_dim, out_dim, 3, 1, 1, "xavier")],
        relu=False, residual=False))
    # encoders: Bottleneck(out_dim, d, expand_ratio), ReLU on every conv
    ki = 2
    for d in dilations:
        blocks.append(dict(
            convs=[conv(keys[ki], out_dim, inter, 1, 1, 0, "normal"),
                   conv(keys[ki + 1], inter, inter, 3, d, d, "normal"),
                   conv(keys[ki + 2], inter, out_dim, 1, 1, 0, "normal")],
            relu=True, residual=True))
        ki += 3
    return blocks


def _prep_block_params(block):
    """Kernel-ready parameters: BN scale folded into the weights, 1x1 weights
    as (Cin, Cout), KxK weights grouped per kernel row as (K, K*Cin, Cout)."""
    convs = block["convs"]
    has_c = len(convs) == 3

    def fold_1x1(c):
        return (c["w"][:, :, 0, 0] * c["scale"][:, None]).T        # (Cin, Cout)

    cb = convs[1]
    w2 = jnp.transpose(cb["w"], (2, 3, 1, 0)) * cb["scale"]        # (K,K,Cin,Cout)
    K, _, cm, cbo = w2.shape
    out = dict(w1=fold_1x1(convs[0]), s1=convs[0]["shift"],
               w2g=w2.reshape(K, K * cm, cbo), s2=cb["shift"],
               k=int(K), d=cb["d"], p=cb["p"],
               relu=block["relu"], residual=block["residual"], has_c=has_c)
    if has_c:
        out["w3"] = fold_1x1(convs[2])
        out["s3"] = convs[2]["shift"]
    return out


# ---------------------------------------------------------------------------
# Forward passes
# ---------------------------------------------------------------------------
def dilated_encoder_forward(x_nchw, blocks, *, tile_h=None,
                            compute_dtype=jnp.bfloat16):
    """Pallas forward.  Input / output are NCHW float32 like the PyTorch module."""
    x = jnp.transpose(x_nchw, (0, 2, 3, 1)).astype(compute_dtype)   # -> NHWC
    for blk in blocks:
        x = fused_conv_block(x, _prep_block_params(blk),
                             compute_dtype=compute_dtype, tile_h=tile_h)
    return jnp.transpose(x, (0, 3, 1, 2)).astype(jnp.float32)       # -> NCHW


def dilated_encoder_reference(x_nchw, blocks, compute_dtype=jnp.bfloat16):
    """Pure-JAX reference (lax.conv) with the same bf16-in / f32-acc recipe."""
    x = jnp.transpose(x_nchw, (0, 2, 3, 1)).astype(compute_dtype)
    for blk in blocks:
        y = x
        for c in blk["convs"]:
            w_hwio = jnp.transpose(c["w"], (2, 3, 1, 0)).astype(compute_dtype)
            y = lax.conv_general_dilated(
                y.astype(compute_dtype), w_hwio, (1, 1),
                ((c["p"], c["p"]), (c["p"], c["p"])),
                rhs_dilation=(c["d"], c["d"]),
                dimension_numbers=("NHWC", "HWIO", "NHWC"),
                preferred_element_type=jnp.float32)
            y = y * c["scale"] + c["shift"]
            if blk["relu"]:
                y = jnp.maximum(y, 0.0)
        if blk["residual"]:
            y = y + x.astype(jnp.float32)
        x = y.astype(compute_dtype)
    return jnp.transpose(x, (0, 3, 1, 2)).astype(jnp.float32)


if __name__ == "__main__":
    # NOTE: toy shapes (channels 8/16) are for correctness only; do not use
    # them for performance tuning (real YOLOF dims are 512 / 128).
    B, in_dim, out_dim, H, W = 2, 8, 16, 16, 16
    expand_ratio = 0.5
    dilations = [2, 4, 6, 8]

    key = jax.random.PRNGKey(0)
    k_x, k_p = jax.random.split(key)
    x = jax.random.normal(k_x, (B, in_dim, H, W), jnp.float32)

    blocks = build_dilated_encoder(k_p, in_dim, out_dim, expand_ratio, dilations)

    # Default path: whole-image tiles (one H-tile per image).
    out = jax.block_until_ready(dilated_encoder_forward(x, blocks))
    ref = dilated_encoder_reference(x, blocks)
    assert out.shape == (B, out_dim, H, W), out.shape
    max_err = float(jnp.max(jnp.abs(out - ref)))
    assert jnp.allclose(out, ref, atol=2e-2, rtol=2e-2), max_err

    # Also exercise the H-tiled path (2 tiles per image, shared VMEM
    # intermediate across tiles) to validate the cross-tile logic.
    out_t = jax.block_until_ready(dilated_encoder_forward(x, blocks, tile_h=8))
    max_err_t = float(jnp.max(jnp.abs(out_t - ref)))
    assert jnp.allclose(out_t, ref, atol=2e-2, rtol=2e-2), max_err_t

    print("KERNEL_OK")
</pallas_src>

<mosaic_0001>
module attributes {stable_mosaic.version = 11 : i64} {
  func.func @_fused_block_kernel(%arg0: i32, %arg1: i32, %arg2: memref<1x16x16x8xbf16, #tpu.memory_space<vmem>>, %arg3: memref<8x16xbf16, #tpu.memory_space<vmem>>, %arg4: memref<1x16xf32, #tpu.memory_space<vmem>>, %arg5: memref<3x48x16xbf16, #tpu.memory_space<vmem>>, %arg6: memref<1x16xf32, #tpu.memory_space<vmem>>, %arg7: memref<1x16x16x16xbf16, #tpu.memory_space<vmem>>, %arg8: memref<18x18x16xbf16, #tpu.memory_space<vmem>>) attributes {dimension_semantics = [#tpu.dimension_semantics<parallel>, #tpu.dimension_semantics<arbitrary>], iteration_bounds = array<i64: 2, 1>, scalar_prefetch = 0 : i64, scratch_operands = 1 : i64, tpu.core_type = #tpu.core_type<tc>, window_params = [{transform_indices = @transform_0, window_bounds = array<i64: 1, 16, 16, 8>}, {pipeline_mode = #tpu.pipeline_mode<synchronous>, transform_indices = @transform_1, window_bounds = array<i64: 8, 16>}, {pipeline_mode = #tpu.pipeline_mode<synchronous>, transform_indices = @transform_2, window_bounds = array<i64: 1, 16>}, {pipeline_mode = #tpu.pipeline_mode<synchronous>, transform_indices = @transform_3, window_bounds = array<i64: 3, 48, 16>}, {pipeline_mode = #tpu.pipeline_mode<synchronous>, transform_indices = @transform_4, window_bounds = array<i64: 1, 16>}, {transform_indices = @transform_5, window_bounds = array<i64: 1, 16, 16, 16>}]} {
    %c0_i32 = arith.constant 0 : i32
    %0 = arith.cmpi eq, %arg1, %c0_i32 : i32
    %1 = arith.extui %0 : i1 to i32
    %c0_i32_0 = arith.constant 0 : i32
    %2 = arith.cmpi ne, %1, %c0_i32_0 : i32
    scf.if %2 {
      %cst_22 = arith.constant 0.000000e+00 : bf16
      %47 = vector.broadcast %cst_22 : bf16 to vector<18x18x16xbf16>
      %c0_23 = arith.constant 0 : index
      %c0_24 = arith.constant 0 : index
      %c0_25 = arith.constant 0 : index
      %48 = vector.load %arg8[%c0_23, %c0_24, %c0_25] : memref<18x18x16xbf16, #tpu.memory_space<vmem>>, vector<18x18x16xbf16>
      tpu.vector_store %arg8[%c0_23, %c0_24, %c0_25], %47 {strides = array<i32>} : memref<18x18x16xbf16, #tpu.memory_space<vmem>>, vector<18x18x16xbf16>,
      %c0_26 = arith.constant 0 : index
      %c0_27 = arith.constant 0 : index
      %c0_28 = arith.constant 0 : index
      %c0_29 = arith.constant 0 : index
      %49 = vector.load %arg2[%c0_26, %c0_27, %c0_28, %c0_29] : memref<1x16x16x8xbf16, #tpu.memory_space<vmem>>, vector<1x16x16x8xbf16>
      %50 = vector.shape_cast %49 : vector<1x16x16x8xbf16> to vector<16x16x8xbf16>
      %51 = vector.shape_cast %50 : vector<16x16x8xbf16> to vector<256x8xbf16>
      %c0_30 = arith.constant 0 : index
      %c0_31 = arith.constant 0 : index
      %52 = vector.load %arg3[%c0_30, %c0_31] : memref<8x16xbf16, #tpu.memory_space<vmem>>, vector<8x16xbf16>
      %cst_32 = arith.constant dense<0.000000e+00> : vector<256x16xf32>
      %53 = tpu.matmul %51, %52, %cst_32 {dimension_numbers = #tpu.dot_dimension_numbers<[1], [0], [0], [1], [0, 0, 1, 1], [], []>} : vector<256x8xbf16>, vector<8x16xbf16>, vector<256x16xf32> -> vector<256x16xf32>
      %c0_33 = arith.constant 0 : index
      %c0_34 = arith.constant 0 : index
      %54 = vector.load %arg4[%c0_33, %c0_34] : memref<1x16xf32, #tpu.memory_space<vmem>>, vector<1x16xf32>
      %55 = vector.broadcast %54 : vector<1x16xf32> to vector<256x16xf32>
      %56 = arith.addf %53, %55 : vector<256x16xf32>
      %57 = vector.shape_cast %56 : vector<256x16xf32> to vector<16x16x16xf32>
      %58 = arith.truncf %57 : vector<16x16x16xf32> to vector<16x16x16xbf16>
      %c1_35 = arith.constant 1 : index
      %c1_36 = arith.constant 1 : index
      %c0_37 = arith.constant 0 : index
      %59 = vector.load %arg8[%c1_35, %c1_36, %c0_37] : memref<18x18x16xbf16, #tpu.memory_space<vmem>>, vector<16x16x16xbf16>
      tpu.vector_store %arg8[%c1_35, %c1_36, %c0_37], %58 {strides = array<i32>} : memref<18x18x16xbf16, #tpu.memory_space<vmem>>, vector<16x16x16xbf16>,
    } else {
    }
    %c16_i32 = arith.constant 16 : i32
    %3 = arith.muli %arg1, %c16_i32 : i32
    %c0_i32_1 = arith.constant 0 : i32
    %4 = arith.addi %3, %c0_i32_1 : i32
    %5 = arith.index_cast %4 : i32 to index
    %c0 = arith.constant 0 : index
    %c0_2 = arith.constant 0 : index
    %6 = vector.load %arg8[%5, %c0, %c0_2] : memref<18x18x16xbf16, #tpu.memory_space<vmem>>, vector<16x18x16xbf16>
    %7 = vector.extract_strided_slice %6 {offsets = [0, 0, 0], sizes = [16, 16, 16], strides = [1, 1, 1]} : vector<16x18x16xbf16> to vector<16x16x16xbf16>
    %8 = vector.extract_strided_slice %6 {offsets = [0, 1, 0], sizes = [16, 16, 16], strides = [1, 1, 1]} : vector<16x18x16xbf16> to vector<16x16x16xbf16>
    %9 = vector.extract_strided_slice %6 {offsets = [0, 2, 0], sizes = [16, 16, 16], strides = [1, 1, 1]} : vector<16x18x16xbf16> to vector<16x16x16xbf16>
    %10 = tpu.concatenate %7, %8, %9 in 2 : vector<16x16x16xbf16>, vector<16x16x16xbf16>, vector<16x16x16xbf16> -> vector<16x16x48xbf16>
    %11 = vector.shape_cast %10 : vector<16x16x48xbf16> to vector<256x48xbf16>
    %c0_3 = arith.constant 0 : index
    %c0_4 = arith.constant 0 : index
    %c0_5 = arith.constant 0 : index
    %12 = vector.load %arg5[%c0_3, %c0_4, %c0_5] : memref<3x48x16xbf16, #tpu.memory_space<vmem>>, vector<1x48x16xbf16>
    %13 = vector.shape_cast %12 : vector<1x48x16xbf16> to vector<48x16xbf16>
    %cst = arith.constant dense<0.000000e+00> : vector<256x16xf32>
    %14 = tpu.matmul %11, %13, %cst {dimension_numbers = #tpu.dot_dimension_numbers<[1], [0], [0], [1], [0, 0, 1, 1], [], []>} : vector<256x48xbf16>, vector<48x16xbf16>, vector<256x16xf32> -> vector<256x16xf32>
    %c1_i32 = arith.constant 1 : i32
    %15 = arith.addi %3, %c1_i32 : i32
    %16 = arith.index_cast %15 : i32 to index
    %c0_6 = arith.constant 0 : index
    %c0_7 = arith.constant 0 : index
    %17 = vector.load %arg8[%16, %c0_6, %c0_7] : memref<18x18x16xbf16, #tpu.memory_space<vmem>>, vector<16x18x16xbf16>
    %18 = vector.extract_strided_slice %17 {offsets = [0, 0, 0], sizes = [16, 16, 16], strides = [1, 1, 1]} : vector<16x18x16xbf16> to vector<16x16x16xbf16>
    %19 = vector.extract_strided_slice %17 {offsets = [0, 1, 0], sizes = [16, 16, 16], strides = [1, 1, 1]} : vector<16x18x16xbf16> to vector<16x16x16xbf16>
    %20 = vector.extract_strided_slice %17 {offsets = [0, 2, 0], sizes = [16, 16, 16], strides = [1, 1, 1]} : vector<16x18x16xbf16> to vector<16x16x16xbf16>
    %21 = tpu.concatenate %18, %19, %20 in 2 : vector<16x16x16xbf16>, vector<16x16x16xbf16>, vector<16x16x16xbf16> -> vector<16x16x48xbf16>
    %22 = vector.shape_cast %21 : vector<16x16x48xbf16> to vector<256x48xbf16>
    %c1 = arith.constant 1 : index
    %c0_8 = arith.constant 0 : index
    %c0_9 = arith.constant 0 : index
    %23 = vector.load %arg5[%c1, %c0_8, %c0_9] : memref<3x48x16xbf16, #tpu.memory_space<vmem>>, vector<1x48x16xbf16>
    %24 = vector.shape_cast %23 : vector<1x48x16xbf16> to vector<48x16xbf16>
    %cst_10 = arith.constant dense<0.000000e+00> : vector<256x16xf32>
    %25 = tpu.matmul %22, %24, %cst_10 {dimension_numbers = #tpu.dot_dimension_numbers<[1], [0], [0], [1], [0, 0, 1, 1], [], []>} : vector<256x48xbf16>, vector<48x16xbf16>, vector<256x16xf32> -> vector<256x16xf32>
    %26 = arith.addf %14, %25 : vector<256x16xf32>
    %c2_i32 = arith.constant 2 : i32
    %27 = arith.addi %3, %c2_i32 : i32
    %28 = arith.index_cast %27 : i32 to index
    %c0_11 = arith.constant 0 : index
    %c0_12 = arith.constant 0 : index
    %29 = vector.load %arg8[%28, %c0_11, %c0_12] : memref<18x18x16xbf16, #tpu.memory_space<vmem>>, vector<16x18x16xbf16>
    %30 = vector.extract_strided_slice %29 {offsets = [0, 0, 0], sizes = [16, 16, 16], strides = [1, 1, 1]} : vector<16x18x16xbf16> to vector<16x16x16xbf16>
    %31 = vector.extract_strided_slice %29 {offsets = [0, 1, 0], sizes = [16, 16, 16], strides = [1, 1, 1]} : vector<16x18x16xbf16> to vector<16x16x16xbf16>
    %32 = vector.extract_strided_slice %29 {offsets = [0, 2, 0], sizes = [16, 16, 16], strides = [1, 1, 1]} : vector<16x18x16xbf16> to vector<16x16x16xbf16>
    %33 = tpu.concatenate %30, %31, %32 in 2 : vector<16x16x16xbf16>, vector<16x16x16xbf16>, vector<16x16x16xbf16> -> vector<16x16x48xbf16>
    %34 = vector.shape_cast %33 : vector<16x16x48xbf16> to vector<256x48xbf16>
    %c2 = arith.constant 2 : index
    %c0_13 = arith.constant 0 : index
    %c0_14 = arith.constant 0 : index
    %35 = vector.load %arg5[%c2, %c0_13, %c0_14] : memref<3x48x16xbf16, #tpu.memory_space<vmem>>, vector<1x48x16xbf16>
    %36 = vector.shape_cast %35 : vector<1x48x16xbf16> to vector<48x16xbf16>
    %cst_15 = arith.constant dense<0.000000e+00> : vector<256x16xf32>
    %37 = tpu.matmul %34, %36, %cst_15 {dimension_numbers = #tpu.dot_dimension_numbers<[1], [0], [0], [1], [0, 0, 1, 1], [], []>} : vector<256x48xbf16>, vector<48x16xbf16>, vector<256x16xf32> -> vector<256x16xf32>
    %38 = arith.addf %26, %37 : vector<256x16xf32>
    %c0_16 = arith.constant 0 : index
    %c0_17 = arith.constant 0 : index
    %39 = vector.load %arg6[%c0_16, %c0_17] : memref<1x16xf32, #tpu.memory_space<vmem>>, vector<1x16xf32>
    %40 = vector.broadcast %39 : vector<1x16xf32> to vector<256x16xf32>
    %41 = arith.addf %38, %40 : vector<256x16xf32>
    %42 = vector.shape_cast %41 : vector<256x16xf32> to vector<16x16x16xf32>
    %43 = arith.truncf %42 : vector<16x16x16xf32> to vector<16x16x16xbf16>
    %c0_18 = arith.constant 0 : index
    %c0_19 = arith.constant 0 : index
    %c0_20 = arith.constant 0 : index
    %c0_21 = arith.constant 0 : index
    %44 = vector.load %arg7[%c0_18, %c0_19, %c0_20, %c0_21] : memref<1x16x16x16xbf16, #tpu.memory_space<vmem>>, vector<1x16x16x16xbf16>
    %45 = vector.shape_cast %44 : vector<1x16x16x16xbf16> to vector<16x16x16xbf16>
    %46 = vector.shape_cast %43 : vector<16x16x16xbf16> to vector<1x16x16x16xbf16>
    tpu.vector_store %arg7[%c0_18, %c0_19, %c0_20, %c0_21], %46 {strides = array<i32>} : memref<1x16x16x16xbf16, #tpu.memory_space<vmem>>, vector<1x16x16x16xbf16>,
    return
  }
  func.func @transform_0(%arg0: i32, %arg1: i32) -> (i32, i32, i32, i32) {
    %c0_i32 = arith.constant 0 : i32
    %c0_i32_0 = arith.constant 0 : i32
    %c0_i32_1 = arith.constant 0 : i32
    %c0_i32_2 = arith.constant 0 : i32
    return %arg0, %c0_i32, %c0_i32_0, %c0_i32_1 : i32, i32, i32, i32
  }
  func.func @transform_1(%arg0: i32, %arg1: i32) -> (i32, i32) {
    %c0_i32 = arith.constant 0 : i32
    %c0_i32_0 = arith.constant 0 : i32
    %c0_i32_1 = arith.constant 0 : i32
    return %c0_i32, %c0_i32_0 : i32, i32
  }
  func.func @transform_2(%arg0: i32, %arg1: i32) -> (i32, i32) {
    %c0_i32 = arith.constant 0 : i32
    %c0_i32_0 = arith.constant 0 : i32
    %c0_i32_1 = arith.constant 0 : i32
    return %c0_i32, %c0_i32_0 : i32, i32
  }
  func.func @transform_3(%arg0: i32, %arg1: i32) -> (i32, i32, i32) {
    %c0_i32 = arith.constant 0 : i32
    %c0_i32_0 = arith.constant 0 : i32
    %c0_i32_1 = arith.constant 0 : i32
    %c0_i32_2 = arith.constant 0 : i32
    return %c0_i32, %c0_i32_0, %c0_i32_1 : i32, i32, i32
  }
  func.func @transform_4(%arg0: i32, %arg1: i32) -> (i32, i32) {
    %c0_i32 = arith.constant 0 : i32
    %c0_i32_0 = arith.constant 0 : i32
    %c0_i32_1 = arith.constant 0 : i32
    return %c0_i32, %c0_i32_0 : i32, i32
  }
  func.func @transform_5(%arg0: i32, %arg1: i32) -> (i32, i32, i32, i32) {
    %c0_i32 = arith.constant 0 : i32
    %c0_i32_0 = arith.constant 0 : i32
    %c0_i32_1 = arith.constant 0 : i32
    return %arg0, %arg1, %c0_i32, %c0_i32_0 : i32, i32, i32, i32
  }
}

module attributes {stable_mosaic.version = 11 : i64} {
  func.func @_fused_block_kernel(%arg0: i32, %arg1: i32, %arg2: memref<1x16x16x8xbf16, #tpu.memory_space<vmem>>, %arg3: memref<8x16xbf16, #tpu.memory_space<vmem>>, %arg4: memref<1x16xf32, #tpu.memory_space<vmem>>, %arg5: memref<3x48x16xbf16, #tpu.memory_space<vmem>>, %arg6: memref<1x16xf32, #tpu.memory_space<vmem>>, %arg7: memref<1x16x16x16xbf16, #tpu.memory_space<vmem>>, %arg8: memref<18x18x16xbf16, #tpu.memory_space<vmem>>) attributes {dimension_semantics = [#tpu.dimension_semantics<parallel>, #tpu.dimension_semantics<arbitrary>], iteration_bounds = array<i64: 2, 1>, scalar_prefetch = 0 : i64, scratch_operands = 1 : i64, tpu.core_type = #tpu.core_type<tc>, window_params = [{transform_indices = @transform_0, window_bounds = array<i64: 1, 16, 16, 8>}, {pipeline_mode = #tpu.pipeline_mode<synchronous>, transform_indices = @transform_1, window_bounds = array<i64: 8, 16>}, {pipeline_mode = #tpu.pipeline_mode<synchronous>, transform_indices = @transform_2, window_bounds = array<i64: 1, 16>}, {pipeline_mode = #tpu.pipeline_mode<synchronous>, transform_indices = @transform_3, window_bounds = array<i64: 3, 48, 16>}, {pipeline_mode = #tpu.pipeline_mode<synchronous>, transform_indices = @transform_4, window_bounds = array<i64: 1, 16>}, {transform_indices = @transform_5, window_bounds = array<i64: 1, 16, 16, 16>}]} {
    %c0_i32 = arith.constant 0 : i32
    %0 = arith.cmpi eq, %arg1, %c0_i32 : i32
    %1 = arith.extui %0 : i1 to i32
    %c0_i32_0 = arith.constant 0 : i32
    %2 = arith.cmpi ne, %1, %c0_i32_0 : i32
    scf.if %2 {
      %cst_22 = arith.constant 0.000000e+00 : bf16
      %47 = vector.broadcast %cst_22 : bf16 to vector<18x18x16xbf16>
      %c0_23 = arith.constant 0 : index
      %c0_24 = arith.constant 0 : index
      %c0_25 = arith.constant 0 : index
      %48 = vector.load %arg8[%c0_23, %c0_24, %c0_25] : memref<18x18x16xbf16, #tpu.memory_space<vmem>>, vector<18x18x16xbf16>
      tpu.vector_store %arg8[%c0_23, %c0_24, %c0_25], %47 {strides = array<i32>} : memref<18x18x16xbf16, #tpu.memory_space<vmem>>, vector<18x18x16xbf16>,
      %c0_26 = arith.constant 0 : index
      %c0_27 = arith.constant 0 : index
      %c0_28 = arith.constant 0 : index
      %c0_29 = arith.constant 0 : index
      %49 = vector.load %arg2[%c0_26, %c0_27, %c0_28, %c0_29] : memref<1x16x16x8xbf16, #tpu.memory_space<vmem>>, vector<1x16x16x8xbf16>
      %50 = vector.shape_cast %49 : vector<1x16x16x8xbf16> to vector<16x16x8xbf16>
      %51 = vector.shape_cast %50 : vector<16x16x8xbf16> to vector<256x8xbf16>
      %c0_30 = arith.constant 0 : index
      %c0_31 = arith.constant 0 : index
      %52 = vector.load %arg3[%c0_30, %c0_31] : memref<8x16xbf16, #tpu.memory_space<vmem>>, vector<8x16xbf16>
      %cst_32 = arith.constant dense<0.000000e+00> : vector<256x16xf32>
      %53 = tpu.matmul %51, %52, %cst_32 {dimension_numbers = #tpu.dot_dimension_numbers<[1], [0], [0], [1], [0, 0, 1, 1], [], []>} : vector<256x8xbf16>, vector<8x16xbf16>, vector<256x16xf32> -> vector<256x16xf32>
      %c0_33 = arith.constant 0 : index
      %c0_34 = arith.constant 0 : index
      %54 = vector.load %arg4[%c0_33, %c0_34] : memref<1x16xf32, #tpu.memory_space<vmem>>, vector<1x16xf32>
      %55 = vector.broadcast %54 : vector<1x16xf32> to vector<256x16xf32>
      %56 = arith.addf %53, %55 : vector<256x16xf32>
      %57 = vector.shape_cast %56 : vector<256x16xf32> to vector<16x16x16xf32>
      %58 = arith.truncf %57 : vector<16x16x16xf32> to vector<16x16x16xbf16>
      %c1_35 = arith.constant 1 : index
      %c1_36 = arith.constant 1 : index
      %c0_37 = arith.constant 0 : index
      %59 = vector.load %arg8[%c1_35, %c1_36, %c0_37] : memref<18x18x16xbf16, #tpu.memory_space<vmem>>, vector<16x16x16xbf16>
      tpu.vector_store %arg8[%c1_35, %c1_36, %c0_37], %58 {strides = array<i32>} : memref<18x18x16xbf16, #tpu.memory_space<vmem>>, vector<16x16x16xbf16>,
    } else {
    }
    %c16_i32 = arith.constant 16 : i32
    %3 = arith.muli %arg1, %c16_i32 : i32
    %c0_i32_1 = arith.constant 0 : i32
    %4 = arith.addi %3, %c0_i32_1 : i32
    %5 = arith.index_cast %4 : i32 to index
    %c0 = arith.constant 0 : index
    %c0_2 = arith.constant 0 : index
    %6 = vector.load %arg8[%5, %c0, %c0_2] : memref<18x18x16xbf16, #tpu.memory_space<vmem>>, vector<16x18x16xbf16>
    %7 = vector.extract_strided_slice %6 {offsets = [0, 0, 0], sizes = [16, 16, 16], strides = [1, 1, 1]} : vector<16x18x16xbf16> to vector<16x16x16xbf16>
    %8 = vector.extract_strided_slice %6 {offsets = [0, 1, 0], sizes = [16, 16, 16], strides = [1, 1, 1]} : vector<16x18x16xbf16> to vector<16x16x16xbf16>
    %9 = vector.extract_strided_slice %6 {offsets = [0, 2, 0], sizes = [16, 16, 16], strides = [1, 1, 1]} : vector<16x18x16xbf16> to vector<16x16x16xbf16>
    %10 = tpu.concatenate %7, %8, %9 in 2 : vector<16x16x16xbf16>, vector<16x16x16xbf16>, vector<16x16x16xbf16> -> vector<16x16x48xbf16>
    %11 = vector.shape_cast %10 : vector<16x16x48xbf16> to vector<256x48xbf16>
    %c0_3 = arith.constant 0 : index
    %c0_4 = arith.constant 0 : index
    %c0_5 = arith.constant 0 : index
    %12 = vector.load %arg5[%c0_3, %c0_4, %c0_5] : memref<3x48x16xbf16, #tpu.memory_space<vmem>>, vector<1x48x16xbf16>
    %13 = vector.shape_cast %12 : vector<1x48x16xbf16> to vector<48x16xbf16>
    %cst = arith.constant dense<0.000000e+00> : vector<256x16xf32>
    %14 = tpu.matmul %11, %13, %cst {dimension_numbers = #tpu.dot_dimension_numbers<[1], [0], [0], [1], [0, 0, 1, 1], [], []>} : vector<256x48xbf16>, vector<48x16xbf16>, vector<256x16xf32> -> vector<256x16xf32>
    %c1_i32 = arith.constant 1 : i32
    %15 = arith.addi %3, %c1_i32 : i32
    %16 = arith.index_cast %15 : i32 to index
    %c0_6 = arith.constant 0 : index
    %c0_7 = arith.constant 0 : index
    %17 = vector.load %arg8[%16, %c0_6, %c0_7] : memref<18x18x16xbf16, #tpu.memory_space<vmem>>, vector<16x18x16xbf16>
    %18 = vector.extract_strided_slice %17 {offsets = [0, 0, 0], sizes = [16, 16, 16], strides = [1, 1, 1]} : vector<16x18x16xbf16> to vector<16x16x16xbf16>
    %19 = vector.extract_strided_slice %17 {offsets = [0, 1, 0], sizes = [16, 16, 16], strides = [1, 1, 1]} : vector<16x18x16xbf16> to vector<16x16x16xbf16>
    %20 = vector.extract_strided_slice %17 {offsets = [0, 2, 0], sizes = [16, 16, 16], strides = [1, 1, 1]} : vector<16x18x16xbf16> to vector<16x16x16xbf16>
    %21 = tpu.concatenate %18, %19, %20 in 2 : vector<16x16x16xbf16>, vector<16x16x16xbf16>, vector<16x16x16xbf16> -> vector<16x16x48xbf16>
    %22 = vector.shape_cast %21 : vector<16x16x48xbf16> to vector<256x48xbf16>
    %c1 = arith.constant 1 : index
    %c0_8 = arith.constant 0 : index
    %c0_9 = arith.constant 0 : index
    %23 = vector.load %arg5[%c1, %c0_8, %c0_9] : memref<3x48x16xbf16, #tpu.memory_space<vmem>>, vector<1x48x16xbf16>
    %24 = vector.shape_cast %23 : vector<1x48x16xbf16> to vector<48x16xbf16>
    %cst_10 = arith.constant dense<0.000000e+00> : vector<256x16xf32>
    %25 = tpu.matmul %22, %24, %cst_10 {dimension_numbers = #tpu.dot_dimension_numbers<[1], [0], [0], [1], [0, 0, 1, 1], [], []>} : vector<256x48xbf16>, vector<48x16xbf16>, vector<256x16xf32> -> vector<256x16xf32>
    %26 = arith.addf %14, %25 : vector<256x16xf32>
    %c2_i32 = arith.constant 2 : i32
    %27 = arith.addi %3, %c2_i32 : i32
    %28 = arith.index_cast %27 : i32 to index
    %c0_11 = arith.constant 0 : index
    %c0_12 = arith.constant 0 : index
    %29 = vector.load %arg8[%28, %c0_11, %c0_12] : memref<18x18x16xbf16, #tpu.memory_space<vmem>>, vector<16x18x16xbf16>
    %30 = vector.extract_strided_slice %29 {offsets = [0, 0, 0], sizes = [16, 16, 16], strides = [1, 1, 1]} : vector<16x18x16xbf16> to vector<16x16x16xbf16>
    %31 = vector.extract_strided_slice %29 {offsets = [0, 1, 0], sizes = [16, 16, 16], strides = [1, 1, 1]} : vector<16x18x16xbf16> to vector<16x16x16xbf16>
    %32 = vector.extract_strided_slice %29 {offsets = [0, 2, 0], sizes = [16, 16, 16], strides = [1, 1, 1]} : vector<16x18x16xbf16> to vector<16x16x16xbf16>
    %33 = tpu.concatenate %30, %31, %32 in 2 : vector<16x16x16xbf16>, vector<16x16x16xbf16>, vector<16x16x16xbf16> -> vector<16x16x48xbf16>
    %34 = vector.shape_cast %33 : vector<16x16x48xbf16> to vector<256x48xbf16>
    %c2 = arith.constant 2 : index
    %c0_13 = arith.constant 0 : index
    %c0_14 = arith.constant 0 : index
    %35 = vector.load %arg5[%c2, %c0_13, %c0_14] : memref<3x48x16xbf16, #tpu.memory_space<vmem>>, vector<1x48x16xbf16>
    %36 = vector.shape_cast %35 : vector<1x48x16xbf16> to vector<48x16xbf16>
    %cst_15 = arith.constant dense<0.000000e+00> : vector<256x16xf32>
    %37 = tpu.matmul %34, %36, %cst_15 {dimension_numbers = #tpu.dot_dimension_numbers<[1], [0], [0], [1], [0, 0, 1, 1], [], []>} : vector<256x48xbf16>, vector<48x16xbf16>, vector<256x16xf32> -> vector<256x16xf32>
    %38 = arith.addf %26, %37 : vector<256x16xf32>
    %c0_16 = arith.constant 0 : index
    %c0_17 = arith.constant 0 : index
    %39 = vector.load %arg6[%c0_16, %c0_17] : memref<1x16xf32, #tpu.memory_space<vmem>>, vector<1x16xf32>
    %40 = vector.broadcast %39 : vector<1x16xf32> to vector<256x16xf32>
    %41 = arith.addf %38, %40 : vector<256x16xf32>
    %42 = vector.shape_cast %41 : vector<256x16xf32> to vector<16x16x16xf32>
    %43 = arith.truncf %42 : vector<16x16x16xf32> to vector<16x16x16xbf16>
    %c0_18 = arith.constant 0 : index
    %c0_19 = arith.constant 0 : index
    %c0_20 = arith.constant 0 : index
    %c0_21 = arith.constant 0 : index
    %44 = vector.load %arg7[%c0_18, %c0_19, %c0_20, %c0_21] : memref<1x16x16x16xbf16, #tpu.memory_space<vmem>>, vector<1x16x16x16xbf16>
    %45 = vector.shape_cast %44 : vector<1x16x16x16xbf16> to vector<16x16x16xbf16>
    %46 = vector.shape_cast %43 : vector<16x16x16xbf16> to vector<1x16x16x16xbf16>
    tpu.vector_store %arg7[%c0_18, %c0_19, %c0_20, %c0_21], %46 {strides = array<i32>} : memref<1x16x16x16xbf16, #tpu.memory_space<vmem>>, vector<1x16x16x16xbf16>,
    return
  }
  func.func @transform_0(%arg0: i32, %arg1: i32) -> (i32, i32, i32, i32) {
    %c0_i32 = arith.constant 0 : i32
    %c0_i32_0 = arith.constant 0 : i32
    %c0_i32_1 = arith.constant 0 : i32
    %c0_i32_2 = arith.constant 0 : i32
    return %arg0, %c0_i32, %c0_i32_0, %c0_i32_1 : i32, i32, i32, i32
  }
  func.func @transform_1(%arg0: i32, %arg1: i32) -> (i32, i32) {
    %c0_i32 = arith.constant 0 : i32
    %c0_i32_0 = arith.constant 0 : i32
    %c0_i32_1 = arith.constant 0 : i32
    return %c0_i32, %c0_i32_0 : i32, i32
  }
  func.func @transform_2(%arg0: i32, %arg1: i32) -> (i32, i32) {
    %c0_i32 = arith.constant 0 : i32
    %c0_i32_0 = arith.constant 0 : i32
    %c0_i32_1 = arith.constant 0 : i32
    return %c0_i32, %c0_i32_0 : i32, i32
  }
  func.func @transform_3(%arg0: i32, %arg1: i32) -> (i32, i32, i32) {
    %c0_i32 = arith.constant 0 : i32
    %c0_i32_0 = arith.constant 0 : i32
    %c0_i32_1 = arith.constant 0 : i32
    %c0_i32_2 = arith.constant 0 : i32
    return %c0_i32, %c0_i32_0, %c0_i32_1 : i32, i32, i32
  }
  func.func @transform_4(%arg0: i32, %arg1: i32) -> (i32, i32) {
    %c0_i32 = arith.constant 0 : i32
    %c0_i32_0 = arith.constant 0 : i32
    %c0_i32_1 = arith.constant 0 : i32
    return %c0_i32, %c0_i32_0 : i32, i32
  }
  func.func @transform_5(%arg0: i32, %arg1: i32) -> (i32, i32, i32, i32) {
    %c0_i32 = arith.constant 0 : i32
    %c0_i32_0 = arith.constant 0 : i32
    %c0_i32_1 = arith.constant 0 : i32
    return %arg0, %arg1, %c0_i32, %c0_i32_0 : i32, i32, i32, i32
  }
}

</mosaic_0001>

<bundles_post_ra>
// kernel: tpu_custom_call.1
= control target key start
LH: loop header
LB: loop body
LE: loop exit
PB: predicated region body
PF: predicated region fallthrough
CT: control target
= control target key end

     0   :  { %10 = vsyncpa [#allocation4], 0  ;;  %s6315_s0 = inlined_call_operand.vmem [shape: bf16[2,16,16,8], index: 0, kind: input, shape index: {}]   ;;  %s6316_s1 = inlined_call_operand.vmem [shape: bf16[8,16], index: 1, kind: input, shape index: {}]   ;;  %s6317_s2 = inlined_call_operand.vmem [shape: f32[1,16], index: 2, kind: input, shape index: {}]   ;;  %s6318_s3 = inlined_call_operand.vmem [shape: bf16[3,48,16], index: 3, kind: input, shape index: {}]   ;;  %s6319_s4 = inlined_call_operand.vmem [shape: f32[1,16], index: 4, kind: input, shape index: {}]   ;;  %s6320_s5 = inlined_call_operand.hbm [shape: bf16[2,16,16,16], index: 5, kind: output, shape index: {}]  }
   0x1   :  { %12 = vsyncpa [#allocation4 + $0x1], 0  ;;  %s4852_s18 = smov 0   ;;  %s4854_s19 = smov 0  }
   0x2   :  { %s4856_s20 = smov 0   ;;  %s4858_s21 = smov 0  }
   0x3   :  { %s4860_s22 = smov 0   ;;  %s4862_s23 = smov 0  }
   0x4 LB: > { %s3804_s24 = sadd.s32 4294967295, %s4814_s23   ;;  %s3805_s25 = sadd.s32 4294967294, %s4814_s23   ;;  %s4814_s23 = sphi %s4862_s23, %s18_s23   ;;  %s4810_s22 = sphi %s4860_s22, %s6333_s22   ;;  %s4806_s21 = sphi %s4858_s21, %s6332_s21   ;;  %s4802_s20 = sphi %s4856_s20, %s6331_s20   ;;  %s4798_s19 = sphi %s4854_s19, %s6330_s19   ;;  %s4794_s18 = sphi %s4852_s18, %s6329_s18  }
   0x5   : > { %s30_s26 = sadd.s32 1, %s4810_s22  ;;  %s149_s27 = sadd.s32 1, %s4802_s20 }
   0x6   : > { %p32_p0 = scmp.ge.s32.totalorder %s30_s26, 2  ;;  %p159_p1 = scmp.ne.s32.totalorder %s4802_s20, %s4798_s19 }
   0x7   : > { %p160_p2 = scmp.eq.s32.totalorder %s3804_s24, 1  ;;  %p165_p3 = scmp.ne.s32.totalorder %s4798_s19, %s4794_s18 }
   0x8   : > { %s6335_s26 = smov (%p32_p0, %s30_s26), 0  ;;  %p166_p5 = scmp.eq.s32.totalorder %s3805_s25, 1 }
   0x9   : > { %p4892_p4 = por %p160_p2, %p159_p1  ;;  %s144_s29 = ssub.s32 %s4810_s22, %s6335_s26 }
   0xa   : > { %p3808_p6 = scmp.ge.s32.totalorder %s4814_s23, 1  ;;  %p147_p7 = scmp.eq.s32.totalorder %s144_s29, 0 }
   0xb   : > { %p4899_p8 = por %p166_p5, %p165_p3  ;;  %p204_p9 = scmp.lt.s32.totalorder %s4814_s23, 3 }
   0xc   : > { %s4905_s6 = scalar_select %p147_p7, %s4802_s20, %s149_s27  }
   0xd   : > { %p205_p10 = pnand %p3808_p6, %p204_p9 }
   0xe   : > { %v331_v0 = vld [vmem:[%s6316_s1] sm:$0xf] (!%p205_p10)  ;;  %vm468_vm0 = vcmask (!%p205_p10), 1043456   ;;  %p232_p11 = scmp.lt.s32.totalorder (!%p205_p10), %s4806_s21, 1  ;;  %vm243_vm1 = vcmask (!%p205_p10), 125952   ;;  %v4816_v2 = vmov (!%p205_p10), 0  }
   0xf   : > { %208 = sbr.rel (%p205_p10) target bundleno = 827 (0x33b), region = 40  ;;  %4528 = vmatprep.subr.msk.bf16.mxu0 (!%p205_p10), %vm468_vm0, %v331_v0  ;;  %v470_v1 = vsel (!%p205_p10), %vm468_vm0, %v331_v0, 0  ;;  %251 = vst.msk [vmem:[#allocation2 + $0x18] sm:$0xf] (!%p205_p10), %vm243_vm1, %v4816_v2  ;;  %244 = vst.msk [vmem:[#allocation2] sm:$0xf] (!%p205_p10), %vm243_vm1, %v4816_v2 }
  0x10   : > { %4317 = vmatpush3.bf16.msra.mxu0 (!%p205_p10), %v470_v1  ;;  %245 = vst.msk [vmem:[#allocation2 + $0x4] sm:$0xf] (!%p205_p10), %vm243_vm1, %v4816_v2  ;;  %248 = vst.msk [vmem:[#allocation2 + $0xc] sm:$0xf] (!%p205_p10), %vm243_vm1, %v4816_v2  ;;  %vm419_vm2 = vcmask (!%p205_p10), 64512   ;;  %vm246_vm3 = vcmask (!%p205_p10), 122880  }
  0x11   : > { %249 = vst.msk [vmem:[#allocation2 + $0x10] sm:$0xf] (!%p205_p10), %vm243_vm1, %v4816_v2  ;;  %252 = vst.msk [vmem:[#allocation2 + $0x1c] sm:$0xf] (!%p205_p10), %vm243_vm1, %v4816_v2  ;;  %vm1350_vm4 = vsmask.f32 (!%p205_p10), 7424 }
  0x12   : > { %254 = vst.msk [vmem:[#allocation2 + $0x24] sm:$0xf] (!%p205_p10), %vm243_vm1, %v4816_v2  ;;  %255 = vst.msk [vmem:[#allocation2 + $0x28] sm:$0xf] (!%p205_p10), %vm243_vm1, %v4816_v2  ;;  %vm1575_vm5 = vcmask (!%p205_p10), 1046528   ;;  %s4817_s14 = smov (!%p205_p10), 16  }
  0x13   : > { %257 = vst.msk [vmem:[#allocation2 + $0x30] sm:$0xf] (!%p205_p10), %vm243_vm1, %v4816_v2  ;;  %258 = vst.msk [vmem:[#allocation2 + $0x34] sm:$0xf] (!%p205_p10), %vm243_vm1, %v4816_v2  ;;  %s4818_s15 = smov (!%p205_p10), 32   ;;  %vm1656_vm12 = vcmask (!%p205_p10), 130048  }
  0x14   : > { %260 = vst.msk [vmem:[#allocation2 + $0x3c] sm:$0xf] (!%p205_p10), %vm243_vm1, %v4816_v2  ;;  %261 = vst.msk [vmem:[#allocation2 + $0x40] sm:$0xf] (!%p205_p10), %vm243_vm1, %v4816_v2  ;;  %v5067_v31 = vld [vmem:[%s6317_s2] ss:$0 sm:$0xff] (!%p205_p10) }
  0x15   : > { %263 = vst.msk [vmem:[#allocation2 + $0x48] sm:$0xf] (!%p205_p10), %vm243_vm1, %v4816_v2  ;;  %264 = vst.msk [vmem:[#allocation2 + $0x4c] sm:$0xf] (!%p205_p10), %vm243_vm1, %v4816_v2  ;;  %vm1054_vm6 = vsmask.f32 (!%p205_p10), 7938 }
  0x16   : > { %s4912_s9 = scalar_select %p232_p11, %s4806_s21, 1  ;;  %266 = vst.msk [vmem:[#allocation2 + $0x54] sm:$0xf] %vm243_vm1, %v4816_v2  ;;  %267 = vst.msk [vmem:[#allocation2 + $0x58] sm:$0xf] %vm243_vm1, %v4816_v2  ;;  %vm1689_vm13 = vcmask 261120  }
  0x17   : > { %269 = vst.msk [vmem:[#allocation2 + $0x60] sm:$0xf] %vm243_vm1, %v4816_v2  ;;  %270 = vst.msk [vmem:[#allocation2 + $0x64] sm:$0xf] %vm243_vm1, %v4816_v2  ;;  %v4605_v19 = vld [vmem:[#allocation2] sm:$0xff]   ;;  %vm2301_vm14 = vcmask 392192  }
  0x18   : > { %272 = vst.msk [vmem:[#allocation2 + $0x6c] sm:$0xf] %vm243_vm1, %v4816_v2  ;;  %273 = vst.msk [vmem:[#allocation2 + $0x70] sm:$0xf] %vm243_vm1, %v4816_v2  ;;  %s4176_s10 = sshll.u32 %s4912_s9, 7  ;;  %v1354_v21 = vshll.u32 %v4605_v19, 16 }
  0x19   : > { %275 = vst.msk [vmem:[#allocation2 + $0x78] sm:$0xf] %vm243_vm1, %v4816_v2  ;;  %276 = vst.msk [vmem:[#allocation2 + $0x7c] sm:$0xf] %vm243_vm1, %v4816_v2  ;;  %s4990_s13 = scalar_lea.vmem %s6315_s0, %s4176_s10  ;;  %v1352_v22 = vshrl.u32 %v4605_v19, 16  ;;  %v1576_v27 = vrot.slane %v4605_v19, 1 }
  0x1a   : > { %278 = vst.msk [vmem:[#allocation2 + $0x84] sm:$0xf] %vm243_vm1, %v4816_v2  ;;  %279 = vst.msk [vmem:[#allocation2 + $0x88] sm:$0xf] %vm243_vm1, %v4816_v2  ;;  %v4589_v3 = vld [vmem:[%s4990_s13] sm:$0xff]   ;;  %v4590_v4 = vld [vmem:[%s4990_s13 + $0x8] sm:$0xff]  }
  0x1b   : > { %281 = vst.msk [vmem:[#allocation2 + $0x90] sm:$0xf] %vm243_vm1, %v4816_v2  ;;  %282 = vst.msk [vmem:[#allocation2 + $0x94] sm:$0xf] %vm243_vm1, %v4816_v2  ;;  %4318 = vmatprep.mubr.msk.bf16.mxu0 %vm419_vm2, %v4589_v3  ;;  %v4591_v5 = vld [vmem:[%s4990_s13 + $0x10] sm:$0xff]   ;;  %v4592_v6 = vld [vmem:[%s4990_s13 + $0x18] sm:$0xff]  }
  0x1c   : > { %284 = vst.msk [vmem:[#allocation2 + $0x9c] sm:$0xf] %vm243_vm1, %v4816_v2  ;;  %285 = vst.msk [vmem:[#allocation2 + $0xa0] sm:$0xf] %vm243_vm1, %v4816_v2  ;;  %4319 = vmatmul.mubr.msk.bf16.vlgmr.msra.gmra.mrb[0].mxu0 %vm419_vm2, %v4590_v4  ;;  %v4593_v7 = vld [vmem:[%s4990_s13 + $0x20] sm:$0xff]   ;;  %v4594_v8 = vld [vmem:[%s4990_s13 + $0x28] sm:$0xff]  }
  0x1d   : > { %287 = vst.msk [vmem:[#allocation2 + $0xa8] sm:$0xf] %vm243_vm1, %v4816_v2  ;;  %288 = vst.msk [vmem:[#allocation2 + $0xac] sm:$0xf] %vm243_vm1, %v4816_v2  ;;  %4322 = vmatprep.mubr.msk.bf16.mxu0 %vm419_vm2, %v4591_v5  ;;  %v4595_v9 = vld [vmem:[%s4990_s13 + $0x30] sm:$0xff]   ;;  %v4596_v10 = vld [vmem:[%s4990_s13 + $0x38] sm:$0xff]  }
  0x1e   : > { %290 = vst.msk [vmem:[#allocation2 + $0xb4] sm:$0xf] %vm243_vm1, %v4816_v2  ;;  %291 = vst.msk [vmem:[#allocation2 + $0xb8] sm:$0xf] %vm243_vm1, %v4816_v2  ;;  %v4597_v11 = vld [vmem:[%s4990_s13 + $0x40] sm:$0xff]   ;;  %v4598_v12 = vld [vmem:[%s4990_s13 + $0x48] sm:$0xff]  }
  0x1f   : > { %293 = vst.msk [vmem:[#allocation2 + $0xc0] sm:$0xf] %vm243_vm1, %v4816_v2  ;;  %294 = vst.msk [vmem:[#allocation2 + $0xc4] sm:$0xf] %vm243_vm1, %v4816_v2  ;;  %v4599_v13 = vld [vmem:[%s4990_s13 + $0x50] sm:$0xff]   ;;  %v4600_v14 = vld [vmem:[%s4990_s13 + $0x58] sm:$0xff]  }
  0x20   : > { %296 = vst.msk [vmem:[#allocation2 + $0xcc] sm:$0xf] %vm243_vm1, %v4816_v2  ;;  %297 = vst.msk [vmem:[#allocation2 + $0xd0] sm:$0xf] %vm243_vm1, %v4816_v2  ;;  %v4601_v15 = vld [vmem:[%s4990_s13 + $0x60] sm:$0xff]   ;;  %v4602_v16 = vld [vmem:[%s4990_s13 + $0x68] sm:$0xff]  }
  0x21   : > { %v4603_v17 = vld [vmem:[%s4990_s13 + $0x70] sm:$0xff]   ;;  %v4604_v18 = vld [vmem:[%s4990_s13 + $0x78] sm:$0xff]   ;;  %253 = vst.msk [vmem:[#allocation2 + $0x20] sm:$0x1] %vm246_vm3, %v4816_v2  ;;  %247 = vst.msk [vmem:[#allocation2 + $0x8] sm:$0x1] %vm246_vm3, %v4816_v2 }
  0x22   : > { %250 = vst.msk [vmem:[#allocation2 + $0x14] sm:$0x1] %vm246_vm3, %v4816_v2  ;;  %256 = vst.msk [vmem:[#allocation2 + $0x2c] sm:$0x1] %vm246_vm3, %v4816_v2  ;;  %v1356_v23 = vrot.slane %v1354_v21, 1  ;;  %s4241_s13 = sshll.u32 %s4806_s21, 11 }
  0x23   : > { %259 = vst.msk [vmem:[#allocation2 + $0x38] sm:$0x1] %vm246_vm3, %v4816_v2  ;;  %262 = vst.msk [vmem:[#allocation2 + $0x44] sm:$0x1] %vm246_vm3, %v4816_v2  ;;  %vm729_vm7 = vsmask.f32 256  ;;  %s6257_s25 = scalar_lea.hbm %s6320_s5, %s4241_s13 }
  0x24   : > { %4323 = vmatmul.mubr.msk.bf16.gmra.mrb[4].mxu0 %vm419_vm2, %v4592_v6  ;;  %265 = vst.msk [vmem:[#allocation2 + $0x50] sm:$0x1] %vm246_vm3, %v4816_v2  ;;  %268 = vst.msk [vmem:[#allocation2 + $0x5c] sm:$0x1] %vm246_vm3, %v4816_v2  ;;  %v1357_v25 = vor.u32 %v1356_v23, %v1352_v22  ;;  %vm730_vm8 = vsmask.f32 4368 }
  0x25   : > { %4326 = vmatprep.mubr.msk.bf16.mxu0 %vm419_vm2, %v4593_v7  ;;  %271 = vst.msk [vmem:[#allocation2 + $0x68] sm:$0x1] %vm246_vm3, %v4816_v2  ;;  %274 = vst.msk [vmem:[#allocation2 + $0x74] sm:$0x1] %vm246_vm3, %v4816_v2  ;;  %v1065_v48 = vld [vmem:[#allocation2 + $0x18] sm:$0xf] }
  0x26   : > { %277 = vst.msk [vmem:[#allocation2 + $0x80] sm:$0x1] %vm246_vm3, %v4816_v2  ;;  %280 = vst.msk [vmem:[#allocation2 + $0x8c] sm:$0x1] %vm246_vm3, %v4816_v2  ;;  %v1056_v59 = vld [vmem:[#allocation2 + $0xc] sm:$0xf] }
  0x27   : > { %283 = vst.msk [vmem:[#allocation2 + $0x98] sm:$0x1] %vm246_vm3, %v4816_v2  ;;  %286 = vst.msk [vmem:[#allocation2 + $0xa4] sm:$0x1] %vm246_vm3, %v4816_v2  ;;  %s4819_s29 = smov [#allocation3]  }
  0x28   : > { %289 = vst.msk [vmem:[#allocation2 + $0xb0] sm:$0x1] %vm246_vm3, %v4816_v2  ;;  %292 = vst.msk [vmem:[#allocation2 + $0xbc] sm:$0x1] %vm246_vm3, %v4816_v2  ;;  %v1069_v3 = vld [vmem:[#allocation2 + $0x20] sm:$0x1] }
  0x29   : > { %295 = vst.msk [vmem:[#allocation2 + $0xc8] sm:$0x1] %vm246_vm3, %v4816_v2  ;;  %298 = vst.msk [vmem:[#allocation2 + $0xd4] sm:$0x1] %vm246_vm3, %v4816_v2  ;;  %s4740_s7 = sshll.u32 %s4819_s29, 4  ;;  %s4741_s7 = int_to_ptr.vmem [resolvable:$false] %s4740_s7 }
  0x2a   : > { %v4606_v20 = vld [vmem:[#allocation2 + $0x8] ss:$0 sps:$4 sm:$0x11]   ;;  %vm5074_vm9 = vmand %vm243_vm1, %vm1054_vm6  ;;  %s4742_s8 = scalar_lea.vmem %s4741_s7, 4096 }
  0x2b   : > { %v1359_v24 = vshll.u32 %v4606_v20, 16  ;;  %v1577_v28 = vrot.slane %v4606_v20, 1  ;;  %vm5080_vm10 = vmor %vm729_vm7, %vm730_vm8 }
  0x2c   : > { %4327 = vmatmul.mubr.msk.bf16.gmra.mrb[8].mxu0 %vm419_vm2, %v4594_v8  ;;  %vm5087_vm11 = vmand %vm246_vm3, %vm729_vm7 }
  0x2d   : > { %4330 = vmatprep.mubr.msk.bf16.mxu0 %vm419_vm2, %v4595_v9  ;;  %v1361_v26 = vrot.slane %v1359_v24, 1  ;;  %v1578_v30 = vsel %vm1575_vm5, %v1576_v27, %v1577_v28  ;;  %v1079_v28 = vld [vmem:[#allocation2 + $0x30] sm:$0xf] }
  0x2e   : > { %1624 = vrot.lane.b32.xlu1 %v1578_v30, %s4818_s15 }
  0x2f   : > { %v1362_v29 = vsel %vm1350_vm4, %v1357_v25, %v1361_v26 }
  0x30   : > { %1543 = vrot.lane.b32.xlu0 %v1362_v29, %s4817_s14 }
  0x34   : > { %4331 = vmatmul.mubr.msk.bf16.gmra.mrb[12].mxu0 %vm419_vm2, %v4596_v10  ;;  %v1062_v10 = vld [vmem:[#allocation2 + $0x14] sm:$0x1] }
  0x35   : > { %4334 = vmatprep.mubr.msk.bf16.mxu0 %vm419_vm2, %v4597_v11 }
  0x3c   : > { %4335 = vmatmul.mubr.msk.bf16.gmra.mrb[16].mxu0 %vm419_vm2, %v4598_v12 }
  0x3d   : > { %4338 = vmatprep.mubr.msk.bf16.mxu0 %vm419_vm2, %v4599_v13 }
  0x44   : > { %4339 = vmatmul.mubr.msk.bf16.gmra.mrb[20].mxu0 %vm419_vm2, %v4600_v14 }
  0x45   : > { %4342 = vmatprep.mubr.msk.bf16.mxu0 %vm419_vm2, %v4601_v15 }
  0x4c   : > { %4343 = vmatmul.mubr.msk.bf16.gmra.mrb[24].mxu0 %vm419_vm2, %v4602_v16 }
  0x4d   : > { %4346 = vmatprep.mubr.msk.bf16.mxu0 %vm419_vm2, %v4603_v17 }
  0x54   : > { %4347 = vmatmul.mubr.msk.bf16.gmra.mrb[28].mxu0 %vm419_vm2, %v4604_v18 }
  0xef   : > { %v4320_v32 = vpop.f32.mrb[0].mxu0 }
  0xf0   : > { %v515_v33 = vadd.f32 %v4320_v32, %v5067_v31  ;;  %v506_v34 = vpop.f32.mrb[1].mxu0 }
  0xf1   : > { %v507_v35 = vadd.f32 %v5067_v31, %v506_v34  ;;  %v4321_v36 = vpop.f32.mrb[2].mxu0 }
  0xf2   : > { %v4179_v37 = vpack.c.bf16 %v515_v33, %v515_v33  ;;  %v518_v38 = vadd.f32 %v4321_v36, %v5067_v31  ;;  %v509_v39 = vpop.f32.mrb[3].mxu0  ;;  %v1072_v33 = vld [vmem:[#allocation2 + $0x24] sm:$0xf] }
  0xf3   : > { %v4177_v40 = vpack.c.bf16 %v507_v35, %v507_v35  ;;  %v510_v41 = vadd.f32 %v5067_v31, %v509_v39 }
  0xf4   : > { %v750_v42 = vshrl.u32 %v4179_v37, 16  ;;  %v4180_v43 = vpack.c.bf16 %v518_v38, %v518_v38  ;;  %v753_v47 = vshll.u32 %v4179_v37, 16 }
  0xf5   : > { %v733_v44 = vshrl.u32 %v4177_v40, 16  ;;  %v4178_v45 = vpack.c.bf16 %v510_v41, %v510_v41  ;;  %v736_v49 = vshll.u32 %v4177_v40, 16 }
  0xf6   : > { %v752_v46 = vrot.slane %v750_v42, 7  ;;  %v758_v50 = vshrl.u32 %v4180_v43, 16  ;;  %v761_v53 = vshll.u32 %v4180_v43, 16 }
  0xf7   : > { %v735_v52 = vrot.slane %v733_v44, 7  ;;  %v741_v54 = vshrl.u32 %v4178_v45, 16  ;;  %v744_v55 = vshll.u32 %v4178_v45, 16  ;;  %v4324_v56 = vpop.f32.mrb[4].mxu0 }
  0xf8   : > { %v755_v57 = vor.u32 %v753_v47, %v752_v46  ;;  %v756_v58 = vrot.slane %v752_v46, 4  ;;  %v760_v61 = vrot.slane %v758_v50, 7  ;;  %v531_v62 = vadd.f32 %v4324_v56, %v5067_v31  ;;  %v522_v63 = vpop.f32.mrb[5].mxu0  ;;  %v1076_v50 = vld [vmem:[#allocation2 + $0x2c] sm:$0x1] }
  0xf9   : > { %v738_v0 = vor.u32 %v736_v49, %v735_v52  ;;  %v739_v1 = vrot.slane %v735_v52, 4  ;;  %v743_v4 = vrot.slane %v741_v54, 7  ;;  %v523_v5 = vadd.f32 %v5067_v31, %v522_v63  ;;  %v4325_v6 = vpop.f32.mrb[6].mxu0 }
  0xfa   : > { %v1066_v7 = vsel %vm5074_vm9, %v755_v57, %v1065_v48  ;;  %v763_v8 = vor.u32 %v761_v53, %v760_v61  ;;  %v765_v9 = vrot.slane %v760_v61, 4  ;;  %v4183_v11 = vpack.c.bf16 %v531_v62, %v531_v62  ;;  %v525_v12 = vpop.f32.mrb[7].mxu0  ;;  %v1083_v48 = vld [vmem:[#allocation2 + $0x38] sm:$0x1] }
  0xfb   : > { %1067 = vst [vmem:[#allocation2 + $0x18] sm:$0xf] %v1066_v7  ;;  %v1057_v13 = vsel %vm5074_vm9, %v738_v0, %v1056_v59  ;;  %v746_v14 = vor.u32 %v744_v55, %v743_v4  ;;  %v748_v15 = vrot.slane %v743_v4, 4  ;;  %v4181_v16 = vpack.c.bf16 %v523_v5, %v523_v5 }
  0xfc   : > { %1058 = vst [vmem:[#allocation2 + $0xc] sm:$0xf] %v1057_v13  ;;  %v764_v17 = vsel %vm5080_vm10, %v756_v58, %v763_v8  ;;  %v1070_v18 = vsel %vm5087_vm11, %v765_v9, %v1069_v3  ;;  %v784_v19 = vshrl.u32 %v4183_v11, 16  ;;  %v787_v20 = vshll.u32 %v4183_v11, 16 }
  0xfd   : > { %1068 = vst.msk [vmem:[#allocation2 + $0x1c] sm:$0xf] %vm243_vm1, %v764_v17  ;;  %1071 = vst [vmem:[#allocation2 + $0x20] sm:$0x1] %v1070_v18  ;;  %v747_v21 = vsel %vm5080_vm10, %v739_v1, %v746_v14  ;;  %v1063_v22 = vsel %vm5087_vm11, %v748_v15, %v1062_v10  ;;  %v767_v23 = vshrl.u32 %v4181_v16, 16  ;;  %v770_v24 = vshll.u32 %v4181_v16, 16 }
  0xfe   : > { %1059 = vst.msk [vmem:[#allocation2 + $0x10] sm:$0xf] %vm243_vm1, %v747_v21  ;;  %1064 = vst [vmem:[#allocation2 + $0x14] sm:$0x1] %v1063_v22  ;;  %v786_v25 = vrot.slane %v784_v19, 7  ;;  %v534_v26 = vadd.f32 %v4325_v6, %v5067_v31  ;;  %v526_v27 = vadd.f32 %v5067_v31, %v525_v12 }
  0xff   : > { %v769_v29 = vrot.slane %v767_v23, 7  ;;  %v4328_v30 = vpop.f32.mrb[8].mxu0 }
 0x100   : > { %v789_v32 = vor.u32 %v787_v20, %v786_v25  ;;  %v4184_v34 = vpack.c.bf16 %v534_v26, %v534_v26  ;;  %v4182_v35 = vpack.c.bf16 %v526_v27, %v526_v27  ;;  %v538_v36 = vpop.f32.mrb[9].mxu0  ;;  %v790_v37 = vrot.slane %v786_v25, 4  ;;  %v1093_v26 = vld [vmem:[#allocation2 + $0x48] sm:$0xf] }
 0x101   : > { %v772_v38 = vor.u32 %v770_v24, %v769_v29  ;;  %v547_v39 = vadd.f32 %v4328_v30, %v5067_v31  ;;  %v4329_v40 = vpop.f32.mrb[10].mxu0  ;;  %v773_v46 = vrot.slane %v769_v29, 4  ;;  %v539_v52 = vadd.f32 %v5067_v31, %v538_v36  ;;  %v1086_v30 = vld [vmem:[#allocation2 + $0x3c] sm:$0xf] }
 0x102   : > { %v1080_v41 = vsel %vm5074_vm9, %v789_v32, %v1079_v28  ;;  %v792_v42 = vshrl.u32 %v4184_v34, 16  ;;  %v795_v43 = vshll.u32 %v4184_v34, 16  ;;  %v775_v44 = vshrl.u32 %v4182_v35, 16  ;;  %v541_v45 = vpop.f32.mrb[11].mxu0 }
 0x103   : > { %1081 = vst [vmem:[#allocation2 + $0x30] sm:$0xf] %v1080_v41  ;;  %v1073_v47 = vsel %vm5074_vm9, %v772_v38, %v1072_v33  ;;  %v778_v49 = vshll.u32 %v4182_v35, 16  ;;  %v4187_v57 = vpack.c.bf16 %v547_v39, %v547_v39  ;;  %v550_v58 = vadd.f32 %v4329_v40, %v5067_v31 }
 0x104   : > { %1074 = vst [vmem:[#allocation2 + $0x24] sm:$0xf] %v1073_v47  ;;  %v794_v53 = vrot.slane %v792_v42, 7  ;;  %v777_v54 = vrot.slane %v775_v44, 7  ;;  %v5114_v55 = vld [vmem:[#allocation2 + $0x18] sm:$0xff]   ;;  %v542_v59 = vadd.f32 %v5067_v31, %v541_v45  ;;  %v4185_v8 = vpack.c.bf16 %v539_v52, %v539_v52 }
 0x105   : > { %v5116_v56 = vld [vmem:[#allocation2 + $0x20] ss:$0 sps:$4 sm:$0x11]   ;;  %v4609_v1 = vld [vmem:[#allocation2 + $0x18] sm:$0xff]   ;;  %v3110_v4 = vrot.slane %v5114_v55, 1  ;;  %v5124_v7 = vld [vmem:[#allocation2 + $0xc] sm:$0xff]   ;;  %v4188_v20 = vpack.c.bf16 %v550_v58, %v550_v58 }
 0x106   : > { %v797_v61 = vor.u32 %v795_v43, %v794_v53  ;;  %v799_v62 = vrot.slane %v794_v53, 4  ;;  %v780_v63 = vor.u32 %v778_v49, %v777_v54  ;;  %v782_v0 = vrot.slane %v777_v54, 4  ;;  %v5120_v3 = vld [vmem:[#allocation2 + $0x18] sm:$0xff]   ;;  %v4610_v6 = vld [vmem:[#allocation2 + $0x20] ss:$0 sps:$4 sm:$0x11]  }
 0x107   : > { %v3111_v5 = vrot.slane %v5116_v56, 1  ;;  %v1582_v14 = vrot.slane %v4609_v1, 1  ;;  %v1583_v15 = vrot.slane %v4610_v6, 1  ;;  %v5137_v16 = vld [vmem:[#allocation2 + $0x20] ss:$0 sps:$4 sm:$0x11]   ;;  %v4186_v21 = vpack.c.bf16 %v542_v59, %v542_v59 }
 0x108   : > { %v798_v9 = vsel %vm5080_vm10, %v790_v37, %v797_v61  ;;  %v1084_v10 = vsel %vm5087_vm11, %v799_v62, %v1083_v48  ;;  %v781_v11 = vsel %vm5080_vm10, %v773_v46, %v780_v63  ;;  %v1077_v12 = vsel %vm5087_vm11, %v782_v0, %v1076_v50  ;;  %v5144_v24 = vld [vmem:[#allocation2 + $0x14] ss:$0 sps:$4 sm:$0x11]   ;;  %v5149_v38 = vld [vmem:[#allocation2 + $0xc] sm:$0xff]   ;;  %v5151_v43 = vpop.f32.mrb[12].mxu0 }
 0x109   : > { %1082 = vst.msk [vmem:[#allocation2 + $0x34] sm:$0xf] %vm243_vm1, %v798_v9  ;;  %1085 = vst [vmem:[#allocation2 + $0x38] sm:$0x1] %v1084_v10  ;;  %v3112_v13 = vsel %vm1575_vm5, %v3110_v4, %v3111_v5  ;;  %v2135_v17 = vrot.slane %v5120_v3, 1  ;;  %v1579_v18 = vrot.slane %v5124_v7, 1  ;;  %v1584_v22 = vsel %vm1575_vm5, %v1582_v14, %v1583_v15 }
 0x10a   : > { %1075 = vst.msk [vmem:[#allocation2 + $0x28] sm:$0xf] %vm243_vm1, %v781_v11  ;;  %1078 = vst [vmem:[#allocation2 + $0x2c] sm:$0x1] %v1077_v12  ;;  %3158 = vrot.lane.b32.xlu1 %v3112_v13, %s4818_s15  ;;  %v818_v19 = vshrl.u32 %v4187_v57, 16  ;;  %v2136_v23 = vrot.slane %v5137_v16, 1  ;;  %1628 = vrot.lane.b32.xlu0 %v1584_v22, %s4818_s15 }
 0x10b   : > { %v821_v25 = vshll.u32 %v4187_v57, 16  ;;  %v801_v27 = vshrl.u32 %v4185_v8, 16  ;;  %v804_v29 = vshll.u32 %v4185_v8, 16  ;;  %v1376_v32 = vshrl.u32 %v4609_v1, 16  ;;  %v1097_v48 = vld [vmem:[#allocation2 + $0x50] sm:$0x1] }
 0x10c   : > { %v820_v28 = vrot.slane %v818_v19, 7  ;;  %v1378_v33 = vshll.u32 %v4609_v1, 16  ;;  %v2137_v34 = vsel %vm1575_vm5, %v2135_v17, %v2136_v23  ;;  %v1580_v35 = vrot.slane %v5144_v24, 1  ;;  %v5154_v49 = vld [vmem:[#allocation2 + $0x14] ss:$0 sps:$4 sm:$0x11]  }
 0x10d   : > { %v803_v36 = vrot.slane %v801_v27, 7  ;;  %v1383_v37 = vshll.u32 %v4610_v6, 16  ;;  %v826_v42 = vshrl.u32 %v4188_v20, 16  ;;  %v5156_v50 = vpop.f32.mrb[13].mxu0  ;;  %v829_v57 = vshll.u32 %v4188_v20, 16 }
 0x10e   : > { %v823_v39 = vor.u32 %v821_v25, %v820_v28  ;;  %v824_v40 = vrot.slane %v820_v28, 4  ;;  %v1380_v41 = vrot.slane %v1378_v33, 1  ;;  %v1581_v44 = vsel %vm1575_vm5, %v1579_v18, %v1580_v35  ;;  %2182 = vrot.lane.b32.xlu0 %v2137_v34, %s4818_s15  ;;  %v1090_v5 = vld [vmem:[#allocation2 + $0x44] sm:$0x1] }
 0x10f   : > { %v806_v45 = vor.u32 %v804_v29, %v803_v36  ;;  %v807_v46 = vrot.slane %v803_v36, 4  ;;  %v1385_v47 = vrot.slane %v1383_v37, 1  ;;  %1626 = vrot.lane.b32.xlu1 %v1581_v44, %s4818_s15  ;;  %v828_v54 = vrot.slane %v826_v42, 7 }
 0x110   : > { %v1094_v52 = vsel %vm5074_vm9, %v823_v39, %v1093_v26  ;;  %v1381_v53 = vor.u32 %v1380_v41, %v1376_v32  ;;  %v2132_v59 = vrot.slane %v5149_v38, 1  ;;  %v2133_v61 = vrot.slane %v5154_v49, 1  ;;  %v5167_v6 = vld [vmem:[#allocation2 + $0x38] ss:$0 sps:$4 sm:$0x11]   ;;  %v5172_v12 = vld [vmem:[#allocation2 + $0x30] sm:$0xff]  }
 0x111   : > { %1095 = vst [vmem:[#allocation2 + $0x48] sm:$0xf] %v1094_v52  ;;  %v1087_v58 = vsel %vm5074_vm9, %v806_v45, %v1086_v30  ;;  %v809_v62 = vshrl.u32 %v4186_v21, 16  ;;  %v831_v0 = vor.u32 %v829_v57, %v828_v54  ;;  %v833_v1 = vrot.slane %v828_v54, 4 }
 0x112   : > { %1088 = vst [vmem:[#allocation2 + $0x3c] sm:$0xf] %v1087_v58  ;;  %v1386_v63 = vsel %vm1350_vm4, %v1381_v53, %v1385_v47  ;;  %v812_v4 = vshll.u32 %v4186_v21, 16  ;;  %v2134_v8 = vsel %vm1575_vm5, %v2132_v59, %v2133_v61  ;;  %v1921_v10 = vshrl.u32 %v5120_v3, 16  ;;  %v5184_v21 = vld [vmem:[#allocation2 + $0x24] sm:$0xff]  }
 0x113   : > { %v811_v9 = vrot.slane %v809_v62, 7  ;;  %v1923_v11 = vshll.u32 %v5120_v3, 16  ;;  %1547 = vrot.lane.b32.xlu0 %v1386_v63, %s4817_s14  ;;  %v832_v13 = vsel %vm5080_vm10, %v824_v40, %v831_v0  ;;  %v1098_v14 = vsel %vm5087_vm11, %v833_v1, %v1097_v48  ;;  %2180 = vrot.lane.b32.xlu1 %v2134_v8, %s4818_s15  ;;  %v5186_v22 = vld [vmem:[#allocation2 + $0x2c] ss:$0 sps:$4 sm:$0x11]   ;;  %v5205_v40 = vld [vmem:[#allocation2 + $0x30] sm:$0xff]  }
 0x114   : > { %v1928_v15 = vshll.u32 %v5137_v16, 16  ;;  %v2887_v17 = vshrl.u32 %v5114_v55, 16  ;;  %1096 = vst.msk [vmem:[#allocation2 + $0x4c] sm:$0xf] %vm243_vm1, %v832_v13  ;;  %1099 = vst [vmem:[#allocation2 + $0x50] sm:$0x1] %v1098_v14 }
 0x115   : > { %v814_v3 = vor.u32 %v812_v4, %v811_v9  ;;  %v816_v18 = vrot.slane %v811_v9, 4  ;;  %v1925_v19 = vrot.slane %v1923_v11, 1  ;;  %v2889_v20 = vshll.u32 %v5114_v55, 16  ;;  %v5195_v55 = vld [vmem:[#allocation2 + $0x24] sm:$0xff]   ;;  %v5229_v4 = vld [vmem:[#allocation2 + $0x30] sm:$0xff]   ;;  %v4333_v11 = vpop.f32.mrb[14].mxu0 }
 0x116   : > { %v1930_v23 = vrot.slane %v1928_v15, 1  ;;  %v2894_v25 = vshll.u32 %v5116_v56, 16  ;;  %v3116_v26 = vrot.slane %v5172_v12, 1  ;;  %v3117_v16 = vrot.slane %v5167_v6, 1  ;;  %v5221_v61 = vld [vmem:[#allocation2 + $0x24] sm:$0xff]  }
 0x117   : > { %v815_v27 = vsel %vm5080_vm10, %v807_v46, %v814_v3  ;;  %v1091_v28 = vsel %vm5087_vm11, %v816_v18, %v1090_v5  ;;  %v1926_v29 = vor.u32 %v1925_v19, %v1921_v10  ;;  %v2891_v30 = vrot.slane %v2889_v20, 1  ;;  %v5200_v34 = vld [vmem:[#allocation2 + $0x2c] ss:$0 sps:$4 sm:$0x11]   ;;  %v557_v3 = vpop.f32.mrb[15].mxu0 }
 0x118   : > { %1089 = vst.msk [vmem:[#allocation2 + $0x40] sm:$0xf] %vm243_vm1, %v815_v27  ;;  %1092 = vst [vmem:[#allocation2 + $0x44] sm:$0x1] %v1091_v28  ;;  %v2896_v32 = vrot.slane %v2894_v25, 1  ;;  %v1364_v56 = vshrl.u32 %v5124_v7, 16  ;;  %v3118_v52 = vsel %vm1575_vm5, %v3116_v26, %v3117_v16  ;;  %v555_v5 = vadd.f32 %v5067_v31, %v5156_v50 }
 0x119   : > { %v1366_v33 = vshll.u32 %v5124_v7, 16  ;;  %v1931_v35 = vsel %vm1350_vm4, %v1926_v29, %v1930_v23  ;;  %v2892_v36 = vor.u32 %v2891_v30, %v2887_v17  ;;  %v1371_v37 = vshll.u32 %v5144_v24, 16  ;;  %v5214_v48 = vld [vmem:[#allocation2 + $0x38] ss:$0 sps:$4 sm:$0x11]  }
 0x11a   : > { %v1585_v39 = vrot.slane %v5184_v21, 1  ;;  %2102 = vrot.lane.b32.xlu0 %v1931_v35, %s4817_s14  ;;  %v1586_v42 = vrot.slane %v5186_v22, 1  ;;  %v1909_v44 = vshrl.u32 %v5149_v38, 16  ;;  %v1911_v7 = vshll.u32 %v5149_v38, 16  ;;  %v1107_v16 = vld [vmem:[#allocation2 + $0x60] sm:$0xf] }
 0x11b   : > { %v1368_v41 = vrot.slane %v1366_v33, 1  ;;  %v2897_v45 = vsel %vm1350_vm4, %v2892_v36, %v2896_v32  ;;  %v1373_v46 = vrot.slane %v1371_v37, 1  ;;  %v1916_v47 = vshll.u32 %v5154_v49, 16  ;;  %v5227_v1 = vld [vmem:[#allocation2 + $0x2c] ss:$0 sps:$4 sm:$0x11]  }
 0x11c   : > { %v3113_v24 = vrot.slane %v5195_v55, 1  ;;  %3078 = vrot.lane.b32.xlu1 %v2897_v45, %s4817_s14  ;;  %v1913_v54 = vrot.slane %v1911_v7, 1  ;;  %v3114_v57 = vrot.slane %v5200_v34, 1  ;;  %v1588_v38 = vrot.slane %v5205_v40, 1  ;;  %v1100_v36 = vld [vmem:[#allocation2 + $0x54] sm:$0xf] }
 0x11d   : > { %v1369_v53 = vor.u32 %v1368_v41, %v1364_v56  ;;  %v1918_v58 = vrot.slane %v1916_v47, 1  ;;  %v1589_v59 = vrot.slane %v5214_v48, 1  ;;  %v563_v49 = vadd.f32 %v5151_v43, %v5067_v31  ;;  %v5240_v15 = vld [vmem:[#allocation2 + $0x38] ss:$0 sps:$4 sm:$0x11]  }
 0x11e   : > { %v1587_v63 = vsel %vm1575_vm5, %v1585_v39, %v1586_v42  ;;  %v1914_v0 = vor.u32 %v1913_v54, %v1909_v44  ;;  %v3115_v8 = vsel %vm1575_vm5, %v3113_v24, %v3114_v57  ;;  %v2138_v43 = vrot.slane %v5221_v61, 1 }
 0x11f   : > { %v1374_v62 = vsel %vm1350_vm4, %v1369_v53, %v1373_v46  ;;  %v1590_v9 = vsel %vm1575_vm5, %v1588_v38, %v1589_v59  ;;  %v4191_v10 = vpack.c.bf16 %v563_v49, %v563_v49  ;;  %v2139_v14 = vrot.slane %v5227_v1, 1  ;;  %v5267_v59 = vld [vmem:[#allocation2 + $0x50] ss:$0 sps:$4 sm:$0x11]  }
 0x120   : > { %1545 = vrot.lane.b32.xlu0 %v1374_v62, %s4817_s14  ;;  %3162 = vrot.lane.b32.xlu1 %v3118_v52, %s4818_s15  ;;  %v1919_v13 = vsel %vm1350_vm4, %v1914_v0, %v1918_v58  ;;  %v2141_v50 = vrot.slane %v5229_v4, 1  ;;  %v4189_v17 = vpack.c.bf16 %v555_v5, %v555_v5  ;;  %v566_v20 = vadd.f32 %v4333_v11, %v5067_v31 }
 0x121   : > { %v852_v18 = vshrl.u32 %v4191_v10, 16  ;;  %v855_v19 = vshll.u32 %v4191_v10, 16  ;;  %v2911_v23 = vshrl.u32 %v5172_v12, 16  ;;  %v2140_v25 = vsel %vm1575_vm5, %v2138_v43, %v2139_v14  ;;  %v5272_v43 = vld [vmem:[#allocation2 + $0x48] sm:$0xff]   ;;  %v5274_v10 = vpop.f32.mrb[16].mxu0 }
 0x122   : > { %v2142_v26 = vrot.slane %v5240_v15, 1  ;;  %v835_v27 = vshrl.u32 %v4189_v17, 16  ;;  %v838_v28 = vshll.u32 %v4189_v17, 16  ;;  %v4192_v30 = vpack.c.bf16 %v566_v20, %v566_v20  ;;  %v5283_v17 = vld [vmem:[#allocation2 + $0x44] ss:$0 sps:$4 sm:$0x11]  }
 0x123   : > { %v854_v29 = vrot.slane %v852_v18, 7  ;;  %v2913_v32 = vshll.u32 %v5172_v12, 16  ;;  %v2918_v56 = vshll.u32 %v5167_v6, 16  ;;  %v1400_v37 = vshrl.u32 %v5205_v40, 16  ;;  %v1111_v6 = vld [vmem:[#allocation2 + $0x68] sm:$0x1] }
 0x124   : > { %2100 = vrot.lane.b32.xlu0 %v1919_v13, %s4817_s14  ;;  %1630 = vrot.lane.b32.xlu1 %v1587_v63, %s4818_s15  ;;  %v2143_v33 = vsel %vm1575_vm5, %v2141_v50, %v2142_v26  ;;  %v5252_v35 = vrot.slane %v835_v27, 7  ;;  %v1402_v39 = vshll.u32 %v5205_v40, 16  ;;  %v860_v44 = vshrl.u32 %v4192_v30, 16  ;;  %v1104_v20 = vld [vmem:[#allocation2 + $0x5c] sm:$0x1] }
 0x125   : > { %v857_v41 = vor.u32 %v855_v19, %v854_v29  ;;  %v858_v42 = vrot.slane %v854_v29, 4  ;;  %v863_v7 = vshll.u32 %v4192_v30, 16  ;;  %v2915_v46 = vrot.slane %v2913_v32, 1 }
 0x126   : > { %v840_v45 = vor.u32 %v838_v28, %v5252_v35  ;;  %v841_v12 = vrot.slane %v5252_v35, 4  ;;  %v2920_v47 = vrot.slane %v2918_v56, 1  ;;  %v862_v52 = vrot.slane %v860_v44, 7  ;;  %v5293_v28 = vld [vmem:[#allocation2 + $0x3c] sm:$0xff]  }
 0x127   : > { %v1108_v24 = vsel %vm5074_vm9, %v857_v41, %v1107_v16  ;;  %v1404_v53 = vrot.slane %v1402_v39, 1  ;;  %v1407_v40 = vshll.u32 %v5214_v48, 16  ;;  %v2916_v57 = vor.u32 %v2915_v46, %v2911_v23  ;;  %v5297_v56 = vld [vmem:[#allocation2 + $0x44] ss:$0 sps:$4 sm:$0x11]  }
 0x128   : > { %1632 = vrot.lane.b32.xlu0 %v1590_v9, %s4818_s15  ;;  %3160 = vrot.lane.b32.xlu1 %v3115_v8, %s4818_s15  ;;  %1109 = vst [vmem:[#allocation2 + $0x60] sm:$0xf] %v1108_v24  ;;  %v1101_v54 = vsel %vm5074_vm9, %v840_v45, %v1100_v36  ;;  %v558_v58 = vadd.f32 %v5067_v31, %v557_v3  ;;  %v1388_v38 = vshrl.u32 %v5184_v21, 16  ;;  %v867_v62 = vrot.slane %v862_v52, 4  ;;  %v5308_v45 = vld [vmem:[#allocation2 + $0x48] sm:$0xff]   ;;  %v5312_v24 = vld [vmem:[#allocation2 + $0x3c] sm:$0xff]  }
 0x129   : > { %1102 = vst [vmem:[#allocation2 + $0x54] sm:$0xf] %v1101_v54  ;;  %v865_v49 = vor.u32 %v863_v7, %v862_v52  ;;  %v1405_v63 = vor.u32 %v1404_v53, %v1400_v37  ;;  %v1409_v0 = vrot.slane %v1407_v40, 1  ;;  %v2921_v48 = vsel %vm1350_vm4, %v2916_v57, %v2920_v47  ;;  %v5302_v37 = vld [vmem:[#allocation2 + $0x50] ss:$0 sps:$4 sm:$0x11]  }
 0x12a   : > { %v4190_v5 = vpack.c.bf16 %v558_v58, %v558_v58  ;;  %v1390_v8 = vshll.u32 %v5184_v21, 16  ;;  %v1395_v9 = vshll.u32 %v5186_v22, 16  ;;  %v1112_v13 = vsel %vm5087_vm11, %v867_v62, %v1111_v6  ;;  %v5285_v21 = vpop.f32.mrb[17].mxu0  ;;  %v5306_v7 = vld [vmem:[#allocation2 + $0x3c] sm:$0xff]   ;;  %v5323_v58 = vld [vmem:[#allocation2 + $0x48] sm:$0xff]  }
 0x12b   : > { %v866_v11 = vsel %vm5080_vm10, %v858_v42, %v865_v49  ;;  %v1410_v14 = vsel %vm1350_vm4, %v1405_v63, %v1409_v0  ;;  %v1945_v50 = vshrl.u32 %v5229_v4, 16  ;;  %1113 = vst [vmem:[#allocation2 + $0x68] sm:$0x1] %v1112_v13  ;;  %v1947_v23 = vshll.u32 %v5229_v4, 16  ;;  %v4337_v39 = vpop.f32.mrb[18].mxu0 }
 0x12c   : > { %2186 = vrot.lane.b32.xlu0 %v2143_v33, %s4818_s15  ;;  %2184 = vrot.lane.b32.xlu1 %v2140_v25, %s4818_s15  ;;  %1110 = vst.msk [vmem:[#allocation2 + $0x64] sm:$0xf] %vm243_vm1, %v866_v11  ;;  %v843_v22 = vshrl.u32 %v4190_v5, 16  ;;  %v846_v3 = vshll.u32 %v4190_v5, 16  ;;  %v1392_v18 = vrot.slane %v1390_v8, 1  ;;  %v1397_v19 = vrot.slane %v1395_v9, 1 }
 0x12d   : > { %v1952_v26 = vshll.u32 %v5240_v15, 16  ;;  %v3122_v16 = vrot.slane %v5272_v43, 1  ;;  %v3123_v27 = vrot.slane %v5267_v59, 1  ;;  %v2899_v30 = vshrl.u32 %v5195_v55, 16 }
 0x12e   : > { %v845_v29 = vrot.slane %v843_v22, 7  ;;  %v1393_v25 = vor.u32 %v1392_v18, %v1388_v38  ;;  %v2901_v32 = vshll.u32 %v5195_v55, 16  ;;  %v1949_v33 = vrot.slane %v1947_v23, 1  ;;  %v5314_v52 = vld [vmem:[#allocation2 + $0x44] ss:$0 sps:$4 sm:$0x11]  }
 0x12f   : > { %v1954_v4 = vrot.slane %v1952_v26, 1  ;;  %v3124_v15 = vsel %vm1575_vm5, %v3122_v16, %v3123_v27  ;;  %v2906_v36 = vshll.u32 %v5200_v34, 16  ;;  %v1591_v47 = vrot.slane %v5293_v28, 1  ;;  %v573_v38 = vpop.f32.mrb[19].mxu0 }
 0x130   : > { %1551 = vrot.lane.b32.xlu0 %v1410_v14, %s4817_s14  ;;  %3082 = vrot.lane.b32.xlu1 %v2921_v48, %s4817_s14  ;;  %v848_v41 = vor.u32 %v846_v3, %v845_v29  ;;  %v850_v42 = vrot.slane %v845_v29, 4  ;;  %v1398_v44 = vsel %vm1350_vm4, %v1393_v25, %v1397_v19  ;;  %v2903_v55 = vrot.slane %v2901_v32, 1  ;;  %v5330_v63 = vld [vmem:[#allocation2 + $0x50] ss:$0 sps:$4 sm:$0x11]   ;;  %v5332_v0 = vpop.f32.mrb[20].mxu0 }
 0x131   : > { %v1950_v6 = vor.u32 %v1949_v33, %v1945_v50  ;;  %v2908_v46 = vrot.slane %v2906_v36, 1  ;;  %v1592_v34 = vrot.slane %v5283_v17, 1  ;;  %v1933_v57 = vshrl.u32 %v5221_v61, 16  ;;  %v5340_v11 = vpop.f32.mrb[21].mxu0 }
 0x132   : > { %v849_v53 = vsel %vm5080_vm10, %v841_v12, %v848_v41  ;;  %v1105_v40 = vsel %vm5087_vm11, %v850_v42, %v1104_v20  ;;  %v2904_v54 = vor.u32 %v2903_v55, %v2899_v30  ;;  %v1935_v35 = vshll.u32 %v5221_v61, 16  ;;  %v5344_v50 = vpop.f32.mrb[22].mxu0 }
 0x133   : > { %1103 = vst.msk [vmem:[#allocation2 + $0x58] sm:$0xf] %vm243_vm1, %v849_v53  ;;  %1106 = vst [vmem:[#allocation2 + $0x5c] sm:$0x1] %v1105_v40  ;;  %v1955_v49 = vsel %vm1350_vm4, %v1950_v6, %v1954_v4  ;;  %v1593_v62 = vsel %vm1575_vm5, %v1591_v47, %v1592_v34  ;;  %v1940_v12 = vshll.u32 %v5227_v1, 16  ;;  %v3119_v5 = vrot.slane %v5306_v7, 1 }
 0x134   : > { %1549 = vrot.lane.b32.xlu1 %v1398_v44, %s4817_s14  ;;  %2106 = vrot.lane.b32.xlu0 %v1955_v49, %s4817_s14  ;;  %v2909_v48 = vsel %vm1350_vm4, %v2904_v54, %v2908_v46  ;;  %v3120_v8 = vrot.slane %v5297_v56, 1  ;;  %v1594_v9 = vrot.slane %v5308_v45, 1  ;;  %v1937_v61 = vrot.slane %v1935_v35, 1  ;;  %v5350_v20 = vpop.f32.mrb[23].mxu0  ;;  %v1121_v53 = vld [vmem:[#allocation2 + $0x78] sm:$0xf] }
 0x135   : > { %v1942_v1 = vrot.slane %v1940_v12, 1  ;;  %v1595_v13 = vrot.slane %v5302_v37, 1  ;;  %v2144_v14 = vrot.slane %v5312_v24, 1  ;;  %v2145_v3 = vrot.slane %v5314_v52, 1  ;;  %v5357_v29 = vpop.f32.mrb[24].mxu0 }
 0x136   : > { %v3121_v22 = vsel %vm1575_vm5, %v3119_v5, %v3120_v8  ;;  %v2147_v18 = vrot.slane %v5323_v58, 1  ;;  %v2148_v19 = vrot.slane %v5330_v63, 1  ;;  %v1938_v23 = vor.u32 %v1937_v61, %v1933_v57  ;;  %v1114_v40 = vld [vmem:[#allocation2 + $0x6c] sm:$0xf]  ;;  %v1125_v35 = vld [vmem:[#allocation2 + $0x80] sm:$0x1] }
 0x137   : > { %v1596_v26 = vsel %vm1575_vm5, %v1594_v9, %v1595_v13  ;;  %v579_v16 = vadd.f32 %v5274_v10, %v5067_v31  ;;  %v571_v27 = vadd.f32 %v5067_v31, %v5285_v21  ;;  %v5362_v25 = vsel %vm1575_vm5, %v2144_v14, %v2145_v3  ;;  %v5369_v10 = vpop.f32.mrb[25].mxu0 }
 0x138   : > { %3166 = vrot.lane.b32.xlu1 %v3124_v15, %s4818_s15  ;;  %3080 = vrot.lane.b32.xlu0 %v2909_v48, %s4817_s14  ;;  %v5365_v30 = vsel %vm1575_vm5, %v2147_v18, %v2148_v19  ;;  %v582_v32 = vadd.f32 %v4337_v39, %v5067_v31  ;;  %v2935_v33 = vshrl.u32 %v5272_v43, 16  ;;  %v1943_v21 = vsel %vm1350_vm4, %v1938_v23, %v1942_v1  ;;  %v5373_v41 = vpop.f32.mrb[26].mxu0 }
 0x139   : > { %v4195_v4 = vpack.c.bf16 %v579_v16, %v579_v16  ;;  %v4193_v36 = vpack.c.bf16 %v571_v27, %v571_v27  ;;  %v574_v15 = vadd.f32 %v5067_v31, %v573_v38  ;;  %v2937_v44 = vshll.u32 %v5272_v43, 16  ;;  %v5381_v48 = vpop.f32.mrb[27].mxu0 }
 0x13a   : > { %v4196_v42 = vpack.c.bf16 %v582_v32, %v582_v32  ;;  %v2942_v55 = vshll.u32 %v5267_v59, 16  ;;  %v1424_v6 = vshrl.u32 %v5308_v45, 16  ;;  %v1426_v12 = vshll.u32 %v5308_v45, 16  ;;  %v5386_v45 = vpop.f32.mrb[28].mxu0  ;;  %v1118_v32 = vld [vmem:[#allocation2 + $0x74] sm:$0x1] }
 0x13b   : > { %v886_v39 = vshrl.u32 %v4195_v4, 16  ;;  %v889_v46 = vshll.u32 %v4195_v4, 16  ;;  %v869_v47 = vshrl.u32 %v4193_v36, 16  ;;  %v872_v34 = vshll.u32 %v4193_v36, 16 }
 0x13c   : > { %1634 = vrot.lane.b32.xlu1 %v1593_v62, %s4818_s15  ;;  %2104 = vrot.lane.b32.xlu0 %v1943_v21, %s4817_s14  ;;  %v894_v31 = vshrl.u32 %v4196_v42, 16  ;;  %v897_v54 = vshll.u32 %v4196_v42, 16  ;;  %v4194_v57 = vpack.c.bf16 %v574_v15, %v574_v15  ;;  %v2939_v38 = vrot.slane %v2937_v44, 1 }
 0x13d   : > { %v888_v49 = vrot.slane %v886_v39, 7  ;;  %v871_v43 = vrot.slane %v869_v47, 7  ;;  %v2944_v59 = vrot.slane %v2942_v55, 1  ;;  %v1431_v21 = vshll.u32 %v5302_v37, 16 }
 0x13e   : > { %v896_v5 = vrot.slane %v894_v31, 7  ;;  %v877_v8 = vshrl.u32 %v4194_v57, 16  ;;  %v880_v9 = vshll.u32 %v4194_v57, 16  ;;  %v2940_v62 = vor.u32 %v2939_v38, %v2935_v33  ;;  %v5430_v38 = vld [vmem:[%s6317_s2] ss:$0 sm:$0xff] }
 0x13f   : > { %v891_v61 = vor.u32 %v889_v46, %v888_v49  ;;  %v892_v1 = vrot.slane %v888_v49, 4  ;;  %v874_v13 = vor.u32 %v872_v34, %v871_v43  ;;  %v875_v14 = vrot.slane %v871_v43, 4 }
 0x140   : > { %3164 = vrot.lane.b32.xlu1 %v3121_v22, %s4818_s15  ;;  %1636 = vrot.lane.b32.xlu0 %v1596_v26, %s4818_s15  ;;  %v899_v3 = vor.u32 %v897_v54, %v896_v5  ;;  %v901_v18 = vrot.slane %v896_v5, 4  ;;  %v879_v19 = vrot.slane %v877_v8, 7  ;;  %v2945_v23 = vsel %vm1350_vm4, %v2940_v62, %v2944_v59  ;;  %v5393_v22 = vpop.f32.mrb[29].mxu0  ;;  %v4679_v62 = vld [vmem:[%s6318_s3 + $0x20] sm:$0xff]  }
 0x141   : > { %v1122_v16 = vsel %vm5074_vm9, %v891_v61, %v1121_v53  ;;  %v1115_v27 = vsel %vm5074_vm9, %v874_v13, %v1114_v40  ;;  %v1428_v33 = vrot.slane %v1426_v12, 1  ;;  %v5399_v42 = vpop.f32.mrb[30].mxu0  ;;  %v1433_v55 = vrot.slane %v1431_v21, 1  ;;  %v5416_v40 = vld [vmem:[#allocation2 + $0x60] sm:$0xff]  }
 0x142   : > { %1123 = vst [vmem:[#allocation2 + $0x78] sm:$0xf] %v1122_v16  ;;  %1116 = vst [vmem:[#allocation2 + $0x6c] sm:$0xf] %v1115_v27  ;;  %v900_v26 = vsel %vm5080_vm10, %v892_v1, %v899_v3  ;;  %v1126_v4 = vsel %vm5087_vm11, %v901_v18, %v1125_v35  ;;  %v882_v36 = vor.u32 %v880_v9, %v879_v19  ;;  %v884_v15 = vrot.slane %v879_v19, 4  ;;  %v5404_v46 = vpop.f32.mrb[31].mxu0 }
 0x143   : > { %1124 = vst.msk [vmem:[#allocation2 + $0x7c] sm:$0xf] %vm243_vm1, %v900_v26  ;;  %1127 = vst [vmem:[#allocation2 + $0x80] sm:$0x1] %v1126_v4  ;;  %v1429_v44 = vor.u32 %v1428_v33, %v1424_v6  ;;  %v1412_v37 = vshrl.u32 %v5293_v28, 16  ;;  %v1414_v39 = vshll.u32 %v5293_v28, 16  ;;  %v595_v49 = vadd.f32 %v5430_v38, %v5332_v0 }
 0x144   : > { %2188 = vrot.lane.b32.xlu1 %v5362_v25, %s4818_s15  ;;  %2190 = vrot.lane.b32.xlu0 %v5365_v30, %s4818_s15  ;;  %v883_v47 = vsel %vm5080_vm10, %v875_v14, %v882_v36  ;;  %v1119_v34 = vsel %vm5087_vm11, %v884_v15, %v1118_v32  ;;  %v1419_v6 = vshll.u32 %v5283_v17, 16  ;;  %v1969_v53 = vshrl.u32 %v5323_v58, 16  ;;  %v5418_v28 = vld [vmem:[#allocation2 + $0x68] ss:$0 sps:$4 sm:$0x11]   ;;  %v4669_v17 = vld [vmem:[%s6318_s3] sm:$0xff]  }
 0x145   : > { %1117 = vst.msk [vmem:[#allocation2 + $0x70] sm:$0xf] %vm243_vm1, %v883_v47  ;;  %1120 = vst [vmem:[#allocation2 + $0x74] sm:$0x1] %v1119_v34  ;;  %v1434_v25 = vsel %vm1350_vm4, %v1429_v44, %v1433_v55  ;;  %v1416_v30 = vrot.slane %v1414_v39, 1  ;;  %v1971_v31 = vshll.u32 %v5323_v58, 16  ;;  %v587_v43 = vadd.f32 %v5430_v38, %v5340_v11  ;;  %4388 = vmatprep.subr.bf16.mxu1 %v4669_v17 }
 0x146   : > { %v1976_v54 = vshll.u32 %v5330_v63, 16  ;;  %v1421_v57 = vrot.slane %v1419_v6, 1  ;;  %v598_v58 = vadd.f32 %v5430_v38, %v5344_v50  ;;  %v4674_v63 = vld [vmem:[%s6318_s3 + $0x8] sm:$0xff]   ;;  %v590_v5 = vadd.f32 %v5430_v38, %v5350_v20  ;;  %v4675_v0 = vld [vmem:[%s6318_s3 + $0x18] sm:$0xff]   ;;  %4389 = vmatpush3.bf16.msra.mxu1 %v4669_v17  ;;  %v4678_v14 = vld [vmem:[%s6318_s3 + $0x10] sm:$0xff]  }
 0x147   : > { %v1417_v35 = vor.u32 %v1416_v30, %v1412_v37  ;;  %v1973_v59 = vrot.slane %v1971_v31, 1  ;;  %v4199_v11 = vpack.c.bf16 %v595_v49, %v595_v49  ;;  %v4197_v50 = vpack.c.bf16 %v587_v43, %v587_v43  ;;  %4350 = vmatprep.subr.bf16.mxu0 %v4675_v0  ;;  %4390 = vmatprep.subr.bf16.mxu1 %v4674_v63  ;;  %v1135_v27 = vld [vmem:[#allocation2 + $0x90] sm:$0xf]  ;;  %v1128_v32 = vld [vmem:[#allocation2 + $0x84] sm:$0xf]  ;;  %v4682_v4 = vld [vmem:[%s6318_s3 + $0x28] sm:$0xff]  }
 0x148   : > { %v1978_v12 = vrot.slane %v1976_v54, 1  ;;  %3086 = vrot.lane.b32.xlu1 %v2945_v23, %s4817_s14  ;;  %1555 = vrot.lane.b32.xlu0 %v1434_v25, %s4817_s14  ;;  %v4200_v8 = vpack.c.bf16 %v598_v58, %v598_v58  ;;  %v3128_v9 = vrot.slane %v5416_v40, 1  ;;  %v4198_v1 = vpack.c.bf16 %v590_v5, %v590_v5  ;;  %v1139_v44 = vld [vmem:[#allocation2 + $0x98] sm:$0x1]  ;;  %v1132_v37 = vld [vmem:[#allocation2 + $0x8c] sm:$0x1] }
 0x149   : > { %v1422_v20 = vsel %vm1350_vm4, %v1417_v35, %v1421_v57  ;;  %v1974_v61 = vor.u32 %v1973_v59, %v1969_v53  ;;  %v3129_v13 = vrot.slane %v5418_v28, 1  ;;  %v920_v3 = vshrl.u32 %v4199_v11, 16  ;;  %4351 = vmatpush3.bf16.msra.mxu0 %v4675_v0  ;;  %v5466_v17 = vld [vmem:[#allocation2 + $0x5c] ss:$0 sps:$4 sm:$0x11]   ;;  %v5468_v35 = vld [vmem:[#allocation2 + $0x54] sm:$0xff]  }
 0x14a   : > { %v923_v18 = vshll.u32 %v4199_v11, 16  ;;  %v903_v19 = vshrl.u32 %v4197_v50, 16  ;;  %v906_v23 = vshll.u32 %v4197_v50, 16  ;;  %v928_v33 = vshrl.u32 %v4200_v8, 16  ;;  %4352 = vmatprep.subr.bf16.mxu0 %v4679_v62  ;;  %4391 = vmatpush3.bf16.msra.mxu1 %v4674_v63 }
 0x14b   : > { %v1979_v16 = vsel %vm1350_vm4, %v1974_v61, %v1978_v12  ;;  %v931_v21 = vshll.u32 %v4200_v8, 16  ;;  %v911_v26 = vshrl.u32 %v4198_v1, 16  ;;  %v922_v36 = vrot.slane %v920_v3, 7  ;;  %4392 = vmatprep.subr.bf16.mxu1 %v4678_v14  ;;  %v5484_v8 = vld [vmem:[#allocation2 + $0x5c] ss:$0 sps:$4 sm:$0x11]  }
 0x14c   : > { %1553 = vrot.lane.b32.xlu1 %v1422_v20, %s4817_s14  ;;  %2110 = vrot.lane.b32.xlu0 %v1979_v16, %s4817_s14  ;;  %v905_v15 = vrot.slane %v903_v19, 7  ;;  %v914_v55 = vshll.u32 %v4198_v1, 16  ;;  %v3130_v39 = vsel %vm1575_vm5, %v3128_v9, %v3129_v13  ;;  %v930_v47 = vrot.slane %v928_v33, 7  ;;  %v5501_v16 = vld [vmem:[#allocation2 + $0x54] sm:$0xff]  }
 0x14d   : > { %v913_v34 = vrot.slane %v911_v26, 7  ;;  %v2923_v6 = vshrl.u32 %v5306_v7, 16  ;;  %v2925_v53 = vshll.u32 %v5306_v7, 16  ;;  %v925_v25 = vor.u32 %v923_v18, %v922_v36  ;;  %4353 = vmatpush3.bf16.msra.mxu0 %v4679_v62 }
 0x14e   : > { %v926_v30 = vrot.slane %v922_v36, 4  ;;  %v908_v31 = vor.u32 %v906_v23, %v905_v15  ;;  %v909_v54 = vrot.slane %v905_v15, 4  ;;  %v933_v57 = vor.u32 %v931_v21, %v930_v47  ;;  %4354 = vmatprep.subr.bf16.mxu0 %v4682_v4  ;;  %4393 = vmatpush3.bf16.msra.mxu1 %v4678_v14 }
 0x14f   : > { %v935_v49 = vrot.slane %v930_v47, 4  ;;  %v916_v43 = vor.u32 %v914_v55, %v913_v34  ;;  %v918_v58 = vrot.slane %v913_v34, 4  ;;  %v1136_v59 = vsel %vm5074_vm9, %v925_v25, %v1135_v27  ;;  %v4648_v55 = vld [vmem:[#allocation2 + $0x68] ss:$0 sps:$4 sm:$0x11]  }
 0x150   : > { %v1129_v7 = vsel %vm5074_vm9, %v908_v31, %v1128_v32  ;;  %3170 = vrot.lane.b32.xlu1 %v3130_v39, %s4818_s15  ;;  %v2927_v63 = vrot.slane %v2925_v53, 1  ;;  %v2930_v12 = vshll.u32 %v5297_v56, 16  ;;  %1137 = vst [vmem:[#allocation2 + $0x90] sm:$0xf] %v1136_v59  ;;  %v934_v5 = vsel %vm5080_vm10, %v926_v30, %v933_v57  ;;  %v1142_v25 = vld [vmem:[#allocation2 + $0x9c] sm:$0xf] }
 0x151   : > { %1130 = vst [vmem:[#allocation2 + $0x84] sm:$0xf] %v1129_v7  ;;  %v1140_v0 = vsel %vm5087_vm11, %v935_v49, %v1139_v44  ;;  %v917_v11 = vsel %vm5080_vm10, %v909_v54, %v916_v43  ;;  %v1133_v50 = vsel %vm5087_vm11, %v918_v58, %v1132_v37  ;;  %1138 = vst.msk [vmem:[#allocation2 + $0x94] sm:$0xf] %vm243_vm1, %v934_v5  ;;  %v1597_v62 = vrot.slane %v5468_v35, 1  ;;  %v5515_v44 = vld [vmem:[#allocation2 + $0x60] sm:$0xff]  }
 0x152   : > { %1141 = vst [vmem:[#allocation2 + $0x98] sm:$0x1] %v1140_v0  ;;  %1131 = vst.msk [vmem:[#allocation2 + $0x88] sm:$0xf] %vm243_vm1, %v917_v11  ;;  %v2928_v56 = vor.u32 %v2927_v63, %v2923_v6  ;;  %v2932_v9 = vrot.slane %v2930_v12, 1  ;;  %v1598_v20 = vrot.slane %v5466_v17, 1  ;;  %4355 = vmatpush3.bf16.msra.mxu0 %v4682_v4  ;;  %v611_v14 = vadd.f32 %v5430_v38, %v5357_v29 }
 0x153   : > { %1134 = vst [vmem:[#allocation2 + $0x8c] sm:$0x1] %v1133_v50  ;;  %v1957_v61 = vshrl.u32 %v5312_v24, 16  ;;  %v1959_v1 = vshll.u32 %v5312_v24, 16  ;;  %v1964_v13 = vshll.u32 %v5314_v52, 16  ;;  %v603_v19 = vadd.f32 %v5430_v38, %v5369_v10  ;;  %v5506_v24 = vld [vmem:[%s6318_s3 + $0x30] sm:$0xff]  }
 0x154   : > { %v2933_v3 = vsel %vm1350_vm4, %v2928_v56, %v2932_v9  ;;  %v1599_v18 = vsel %vm1575_vm5, %v1597_v62, %v1598_v20  ;;  %v614_v23 = vadd.f32 %v5430_v38, %v5373_v41  ;;  %v4203_v27 = vpack.c.bf16 %v611_v14, %v611_v14  ;;  %4426 = vmatprep.subr.bf16.mxu1 %v5506_v24  ;;  %v1149_v37 = vld [vmem:[#allocation2 + $0xa8] sm:$0xf]  ;;  %v1153_v30 = vld [vmem:[#allocation2 + $0xb0] sm:$0x1]  ;;  %v1146_v43 = vld [vmem:[#allocation2 + $0xa4] sm:$0x1] }
 0x155   : > { %3084 = vrot.lane.b32.xlu0 %v2933_v3, %s4817_s14  ;;  %1638 = vrot.lane.b32.xlu1 %v1599_v18, %s4818_s15  ;;  %v1961_v52 = vrot.slane %v1959_v1, 1  ;;  %v1966_v29 = vrot.slane %v1964_v13, 1  ;;  %v606_v10 = vadd.f32 %v5430_v38, %v5381_v48  ;;  %v4201_v32 = vpack.c.bf16 %v603_v19, %v603_v19  ;;  %v5521_v7 = vld [vmem:[#allocation2 + $0x54] sm:$0xff]   ;;  %v5524_v11 = vld [vmem:[#allocation2 + $0x5c] ss:$0 sps:$4 sm:$0x11]  }
 0x156   : > { %v4204_v33 = vpack.c.bf16 %v614_v23, %v614_v23  ;;  %v3125_v41 = vrot.slane %v5501_v16, 1  ;;  %v3126_v21 = vrot.slane %v5484_v8, 1  ;;  %v954_v4 = vshrl.u32 %v4203_v27, 16 }
 0x157   : > { %v1962_v26 = vor.u32 %v1961_v52, %v1957_v61  ;;  %v957_v36 = vshll.u32 %v4203_v27, 16  ;;  %v4202_v15 = vpack.c.bf16 %v606_v10, %v606_v10  ;;  %v937_v39 = vshrl.u32 %v4201_v32, 16 }
 0x158   : > { %v940_v47 = vshll.u32 %v4201_v32, 16  ;;  %v962_v34 = vshrl.u32 %v4204_v33, 16  ;;  %v965_v48 = vshll.u32 %v4204_v33, 16  ;;  %v956_v53 = vrot.slane %v954_v4, 7 }
 0x159   : > { %v1967_v6 = vsel %vm1350_vm4, %v1962_v26, %v1966_v29  ;;  %v945_v31 = vshrl.u32 %v4202_v15, 16  ;;  %v948_v54 = vshll.u32 %v4202_v15, 16  ;;  %v939_v57 = vrot.slane %v937_v39, 7 }
 0x15a   : > { %2108 = vrot.lane.b32.xlu0 %v1967_v6, %s4817_s14  ;;  %v964_v49 = vrot.slane %v962_v34, 7  ;;  %v3127_v58 = vsel %vm1575_vm5, %v3125_v41, %v3126_v21  ;;  %v1600_v59 = vrot.slane %v5515_v44, 1  ;;  %v959_v63 = vor.u32 %v957_v36, %v956_v53 }
 0x15b   : > { %v960_v12 = vrot.slane %v956_v53, 4  ;;  %v947_v5 = vrot.slane %v945_v31, 7  ;;  %3168 = vrot.lane.b32.xlu1 %v3127_v58, %s4818_s15  ;;  %v1601_v0 = vrot.slane %v4648_v55, 1  ;;  %v942_v50 = vor.u32 %v940_v47, %v939_v57  ;;  %v1163_v53 = vld [vmem:[#allocation2 + $0xc0] sm:$0xf] }
 0x15c   : > { %v943_v56 = vrot.slane %v939_v57, 4  ;;  %v967_v9 = vor.u32 %v965_v48, %v964_v49  ;;  %v969_v62 = vrot.slane %v964_v49, 4  ;;  %v1150_v20 = vsel %vm5074_vm9, %v959_v63, %v1149_v37 }
 0x15d   : > { %v950_v61 = vor.u32 %v948_v54, %v947_v5  ;;  %v952_v1 = vrot.slane %v947_v5, 4  ;;  %v1602_v13 = vsel %vm1575_vm5, %v1600_v59, %v1601_v0  ;;  %1151 = vst [vmem:[#allocation2 + $0xa8] sm:$0xf] %v1150_v20  ;;  %v1143_v14 = vsel %vm5074_vm9, %v942_v50, %v1142_v25  ;;  %v1160_v59 = vld [vmem:[#allocation2 + $0xbc] sm:$0x1] }
 0x15e   : > { %v968_v3 = vsel %vm5080_vm10, %v960_v12, %v967_v9  ;;  %v1154_v18 = vsel %vm5087_vm11, %v969_v62, %v1153_v30  ;;  %1640 = vrot.lane.b32.xlu0 %v1602_v13, %s4818_s15  ;;  %v2150_v19 = vrot.slane %v5521_v7, 1  ;;  %1144 = vst [vmem:[#allocation2 + $0x9c] sm:$0xf] %v1143_v14  ;;  %v2151_v29 = vrot.slane %v5524_v11, 1  ;;  %v5563_v62 = vld [vmem:[#allocation2 + $0x60] sm:$0xff]  }
 0x15f   : > { %1152 = vst.msk [vmem:[#allocation2 + $0xac] sm:$0xf] %vm243_vm1, %v968_v3  ;;  %1155 = vst [vmem:[#allocation2 + $0xb0] sm:$0x1] %v1154_v18  ;;  %v951_v23 = vsel %vm5080_vm10, %v943_v56, %v950_v61  ;;  %v1147_v52 = vsel %vm5087_vm11, %v952_v1, %v1146_v43  ;;  %v1448_v27 = vshrl.u32 %v5515_v44, 16  ;;  %v1450_v10 = vshll.u32 %v5515_v44, 16 }
 0x160   : > { %1145 = vst.msk [vmem:[#allocation2 + $0xa0] sm:$0xf] %vm243_vm1, %v951_v23  ;;  %1148 = vst [vmem:[#allocation2 + $0xa4] sm:$0x1] %v1147_v52  ;;  %v1455_v32 = vshll.u32 %v4648_v55, 16  ;;  %v627_v33 = vadd.f32 %v5430_v38, %v5386_v45  ;;  %v619_v41 = vadd.f32 %v5430_v38, %v5393_v22  ;;  %v2152_v21 = vsel %vm1575_vm5, %v2150_v19, %v2151_v29 }
 0x161   : > { %v630_v26 = vadd.f32 %v5430_v38, %v5399_v42  ;;  %v622_v4 = vadd.f32 %v5430_v38, %v5404_v46  ;;  %v2959_v36 = vshrl.u32 %v5416_v40, 16  ;;  %2192 = vrot.lane.b32.xlu1 %v2152_v21, %s4818_s15  ;;  %v1452_v15 = vrot.slane %v1450_v10, 1  ;;  %v1156_v38 = vld [vmem:[#allocation2 + $0xb4] sm:$0xf]  ;;  %v1167_v43 = vld [vmem:[#allocation2 + $0xc8] sm:$0x1] }
 0x162   : > { %v1457_v44 = vrot.slane %v1455_v32, 1  ;;  %v4207_v55 = vpack.c.bf16 %v627_v33, %v627_v33  ;;  %v4205_v37 = vpack.c.bf16 %v619_v41, %v619_v41  ;;  %v2961_v22 = vshll.u32 %v5416_v40, 16  ;;  %v5560_v40 = vld [vmem:[#allocation2 + $0x68] ss:$0 sps:$4 sm:$0x11]  }
 0x163   : > { %v4208_v45 = vpack.c.bf16 %v630_v26, %v630_v26  ;;  %v4206_v39 = vpack.c.bf16 %v622_v4, %v622_v4  ;;  %v2966_v47 = vshll.u32 %v5418_v28, 16  ;;  %v1453_v34 = vor.u32 %v1452_v15, %v1448_v27  ;;  %v4654_v10 = vld [vmem:[#allocation2 + $0x74] ss:$0 sps:$4 sm:$0x11]  }
 0x164   : > { %v988_v48 = vshrl.u32 %v4207_v55, 16  ;;  %v991_v42 = vshll.u32 %v4207_v55, 16  ;;  %v971_v6 = vshrl.u32 %v4205_v37, 16  ;;  %v974_v46 = vshll.u32 %v4205_v37, 16 }
 0x165   : > { %v996_v25 = vshrl.u32 %v4208_v45, 16  ;;  %v999_v30 = vshll.u32 %v4208_v45, 16  ;;  %v979_v31 = vshrl.u32 %v4206_v39, 16  ;;  %v1458_v54 = vsel %vm1350_vm4, %v1453_v34, %v1457_v44  ;;  %v5590_v44 = vld [vmem:[#allocation2 + $0x6c] sm:$0xff]  }
 0x166   : > { %v990_v57 = vrot.slane %v988_v48, 7  ;;  %v973_v49 = vrot.slane %v971_v6, 7  ;;  %v982_v58 = vshll.u32 %v4206_v39, 16  ;;  %1559 = vrot.lane.b32.xlu0 %v1458_v54, %s4817_s14  ;;  %v2963_v12 = vrot.slane %v2961_v22, 1 }
 0x167   : > { %v998_v28 = vrot.slane %v996_v25, 7  ;;  %v981_v63 = vrot.slane %v979_v31, 7  ;;  %v2968_v5 = vrot.slane %v2966_v47, 1  ;;  %v1993_v19 = vshrl.u32 %v5563_v62, 16 }
 0x168   : > { %v993_v0 = vor.u32 %v991_v42, %v990_v57  ;;  %v994_v50 = vrot.slane %v990_v57, 4  ;;  %v976_v56 = vor.u32 %v974_v46, %v973_v49  ;;  %v977_v9 = vrot.slane %v973_v49, 4  ;;  %v5595_v42 = vld [vmem:[#allocation2 + $0x78] sm:$0xff]   ;;  %v4656_v54 = vld [vmem:[#allocation2 + $0x80] ss:$0 sps:$4 sm:$0x11]  }
 0x169   : > { %v1001_v20 = vor.u32 %v999_v30, %v998_v28  ;;  %v1003_v61 = vrot.slane %v998_v28, 4  ;;  %v984_v1 = vor.u32 %v982_v58, %v981_v63  ;;  %v986_v13 = vrot.slane %v981_v63, 4  ;;  %v4658_v57 = vld [vmem:[#allocation2 + $0x8c] ss:$0 sps:$4 sm:$0x11]   ;;  %v1625_v28 = vpop.permute.xlu1 %1624 }
 0x16a   : > { %v1164_v14 = vsel %vm5074_vm9, %v993_v0, %v1163_v53  ;;  %v1157_v3 = vsel %vm5074_vm9, %v976_v56, %v1156_v38  ;;  %v2964_v18 = vor.u32 %v2963_v12, %v2959_v36  ;;  %v1995_v32 = vshll.u32 %v5563_v62, 16  ;;  %v5600_v38 = vld [vmem:[#allocation2 + $0x84] sm:$0xff]   ;;  %v1544_v56 = vpop.permute.xlu0 %1543 }
 0x16b   : > { %1165 = vst [vmem:[#allocation2 + $0xc0] sm:$0xf] %v1164_v14  ;;  %1158 = vst [vmem:[#allocation2 + $0xb4] sm:$0xf] %v1157_v3  ;;  %v1002_v23 = vsel %vm5080_vm10, %v994_v50, %v1001_v20  ;;  %v1168_v52 = vsel %vm5087_vm11, %v1003_v61, %v1167_v43  ;;  %v985_v29 = vsel %vm5080_vm10, %v977_v9, %v984_v1  ;;  %v2000_v33 = vshll.u32 %v5560_v40, 16 }
 0x16c   : > { %v1161_v27 = vsel %vm5087_vm11, %v986_v13, %v1160_v59  ;;  %1166 = vst.msk [vmem:[#allocation2 + $0xc4] sm:$0xf] %vm243_vm1, %v1002_v23  ;;  %1169 = vst [vmem:[#allocation2 + $0xc8] sm:$0x1] %v1168_v52  ;;  %v2969_v51 = vsel %vm1350_vm4, %v2964_v18, %v2968_v5  ;;  %v1436_v41 = vshrl.u32 %v5468_v35, 16  ;;  %v1438_v60 = vshll.u32 %v5468_v35, 16 }
 0x16d   : > { %1159 = vst.msk [vmem:[#allocation2 + $0xb8] sm:$0xf] %vm243_vm1, %v985_v29  ;;  %1162 = vst [vmem:[#allocation2 + $0xbc] sm:$0x1] %v1161_v27  ;;  %3090 = vrot.lane.b32.xlu1 %v2969_v51, %s4817_s14  ;;  %v1443_v2 = vshll.u32 %v5466_v17, 16  ;;  %v2947_v21 = vshrl.u32 %v5501_v16, 16 }
 0x16e   : > { %v2949_v26 = vshll.u32 %v5501_v16, 16  ;;  %v1997_v4 = vrot.slane %v1995_v32, 1  ;;  %v2002_v36 = vrot.slane %v2000_v33, 1  ;;  %v2954_v15 = vshll.u32 %v5484_v8, 16  ;;  %v5608_v59 = vld [vmem:[#allocation2 + $0x6c] sm:$0xff]  }
 0x16f   : > { %v1440_v55 = vrot.slane %v1438_v60, 1  ;;  %v1445_v37 = vrot.slane %v1443_v2, 1  ;;  %v1603_v22 = vrot.slane %v5590_v44, 1  ;;  %v1604_v47 = vrot.slane %v4654_v10, 1 }
 0x170   : > { %v2951_v45 = vrot.slane %v2949_v26, 1  ;;  %v1998_v39 = vor.u32 %v1997_v4, %v1993_v19  ;;  %v1983_v35 = vshll.u32 %v5521_v7, 16  ;;  %v2956_v48 = vrot.slane %v2954_v15, 1  ;;  %v5618_v18 = vld [vmem:[#allocation2 + $0x74] ss:$0 sps:$4 sm:$0x11]  }
 0x171   : > { %v1441_v17 = vor.u32 %v1440_v55, %v1436_v41  ;;  %v1981_v16 = vshrl.u32 %v5521_v7, 16  ;;  %v1988_v53 = vshll.u32 %v5524_v11, 16  ;;  %v1462_v46 = vshll.u32 %v5590_v44, 16  ;;  %v4662_v60 = vld [vmem:[#allocation2 + $0xa4] ss:$0 sps:$4 sm:$0x11]  }
 0x172   : > { %v2952_v34 = vor.u32 %v2951_v45, %v2947_v21  ;;  %v2003_v8 = vsel %vm1350_vm4, %v1998_v39, %v2002_v36  ;;  %v1985_v6 = vrot.slane %v1983_v35, 1  ;;  %v1460_v30 = vshrl.u32 %v5590_v44, 16  ;;  %v5633_v36 = vld [vmem:[#allocation2 + $0x90] sm:$0xff]   ;;  %v4711_v39 = vld [vmem:[#allocation2] sm:$0xff]  }
 0x173   : > { %2114 = vrot.lane.b32.xlu0 %v2003_v8, %s4817_s14  ;;  %v1446_v25 = vsel %vm1350_vm4, %v1441_v17, %v1445_v37  ;;  %v1467_v31 = vshll.u32 %v4654_v10, 16  ;;  %v1464_v7 = vrot.slane %v1462_v46, 1  ;;  %v1990_v11 = vrot.slane %v1988_v53, 1  ;;  %v5624_v10 = vld [vmem:[#allocation2 + $0x9c] sm:$0xff]  }
 0x174   : > { %1557 = vrot.lane.b32.xlu1 %v1446_v25, %s4817_s14  ;;  %v2957_v49 = vsel %vm1350_vm4, %v2952_v34, %v2956_v48  ;;  %v1986_v43 = vor.u32 %v1985_v6, %v1981_v16  ;;  %v1474_v58 = vshll.u32 %v5595_v42, 16  ;;  %v1605_v63 = vsel %vm1575_vm5, %v1603_v22, %v1604_v47  ;;  %v4664_v17 = vld [vmem:[#allocation2 + $0x98] ss:$0 sps:$4 sm:$0x11]  }
 0x175   : > { %v1465_v12 = vor.u32 %v1464_v7, %v1460_v30  ;;  %v1469_v5 = vrot.slane %v1467_v31, 1  ;;  %v1486_v0 = vshll.u32 %v5600_v38, 16  ;;  %v1606_v50 = vrot.slane %v5595_v42, 1 }
 0x176   : > { %v1607_v9 = vrot.slane %v4656_v54, 1  ;;  %v1609_v20 = vrot.slane %v5600_v38, 1  ;;  %v1610_v61 = vrot.slane %v4658_v57, 1  ;;  %v1472_v1 = vshrl.u32 %v5595_v42, 16 }
 0x177   : > { %3088 = vrot.lane.b32.xlu0 %v2957_v49, %s4817_s14  ;;  %v1991_v13 = vsel %vm1350_vm4, %v1986_v43, %v1990_v11  ;;  %v1476_v14 = vrot.slane %v1474_v58, 1  ;;  %v1479_v3 = vshll.u32 %v4656_v54, 16  ;;  %v2973_v19 = vshll.u32 %v5608_v59, 16  ;;  %v5653_v54 = vld [vmem:[#allocation2 + $0xb4] sm:$0xff]  }
 0x178   : > { %1642 = vrot.lane.b32.xlu1 %v1605_v63, %s4818_s15  ;;  %v1470_v23 = vsel %vm1350_vm4, %v1465_v12, %v1469_v5  ;;  %v1484_v52 = vshrl.u32 %v5600_v38, 16  ;;  %v1488_v29 = vrot.slane %v1486_v0, 1  ;;  %v1491_v27 = vshll.u32 %v4658_v57, 16  ;;  %v4666_v57 = vld [vmem:[#allocation2 + $0xbc] ss:$0 sps:$4 sm:$0x11]  }
 0x179   : > { %v1608_v32 = vsel %vm1575_vm5, %v1606_v50, %v1607_v9  ;;  %v1611_v33 = vsel %vm1575_vm5, %v1609_v20, %v1610_v61  ;;  %v2971_v41 = vshrl.u32 %v5608_v59, 16  ;;  %v1477_v2 = vor.u32 %v1476_v14, %v1472_v1  ;;  %v5659_v12 = vld [vmem:[#allocation2 + $0xa8] sm:$0xff]   ;;  %v4668_v20 = vld [vmem:[#allocation2 + $0xb0] ss:$0 sps:$4 sm:$0x11]  }
 0x17a   : > { %v1481_v21 = vrot.slane %v1479_v3, 1  ;;  %v2975_v26 = vrot.slane %v2973_v19, 1  ;;  %v2978_v4 = vshll.u32 %v5618_v18, 16  ;;  %v1489_v55 = vor.u32 %v1488_v29, %v1484_v52 }
 0x17b   : > { %2112 = vrot.lane.b32.xlu0 %v1991_v13, %s4817_s14  ;;  %v1493_v37 = vrot.slane %v1491_v27, 1  ;;  %v1510_v45 = vshll.u32 %v5624_v10, 16  ;;  %v1658_v22 = vsel %vm1656_vm12, %v4711_v39, %v1544_v56  ;;  %v1615_v47 = vrot.slane %v5624_v10, 1 }
 0x17c   : > { %1561 = vrot.lane.b32.xlu1 %v1470_v23, %s4817_s14  ;;  %v5627_v51 = vpop.permute.xlu1 %3158  ;;  %v5635_v15 = vpop.permute.xlu0 %1628  ;;  %v1616_v35 = vrot.slane %v4662_v60, 1  ;;  %v1691_v34 = vsel %vm1689_vm13, %v1658_v22, %v1625_v28  ;;  %v1482_v48 = vsel %vm1350_vm4, %v1477_v2, %v1481_v21  ;;  %v2976_v16 = vor.u32 %v2975_v26, %v2971_v41 }
 0x17d   : > { %v2980_v8 = vrot.slane %v2978_v4, 1  ;;  %v1498_v6 = vshll.u32 %v5633_v36, 16  ;;  %4394 = vmatprep.mubr.msk.bf16.mxu1 %vm2301_vm14, %v1691_v34  ;;  %v1494_v25 = vsel %vm1350_vm4, %v1489_v55, %v1493_v37  ;;  %v1508_v30 = vshrl.u32 %v5624_v10, 16  ;;  %v5679_v37 = vld [vmem:[#allocation2 + $0x6c] sm:$0xff]  }
 0x17e   : > { %v1512_v31 = vrot.slane %v1510_v45, 1  ;;  %v1515_v7 = vshll.u32 %v4662_v60, 16  ;;  %v1612_v49 = vrot.slane %v5633_v36, 1  ;;  %v1613_v43 = vrot.slane %v4664_v17, 1 }
 0x17f   : > { %1644 = vrot.lane.b32.xlu0 %v1608_v32, %s4818_s15  ;;  %v1503_v11 = vshll.u32 %v4664_v17, 16  ;;  %v2981_v58 = vsel %vm1350_vm4, %v2976_v16, %v2980_v8  ;;  %v1496_v28 = vshrl.u32 %v5633_v36, 16  ;;  %v1500_v63 = vrot.slane %v1498_v6, 1  ;;  %v4712_v6 = vld [vmem:[#allocation2 + $0x18] sm:$0xff]  }
 0x180   : > { %1646 = vrot.lane.b32.xlu1 %v1611_v33, %s4818_s15  ;;  %v5646_v53 = vpop.permute.xlu0 %2182  ;;  %v1617_v0 = vsel %vm1575_vm5, %v1615_v47, %v1616_v35  ;;  %v1513_v50 = vor.u32 %v1512_v31, %v1508_v30  ;;  %v1517_v56 = vrot.slane %v1515_v7, 1  ;;  %v1534_v9 = vshll.u32 %v5653_v54, 16  ;;  %v5673_v33 = vld [vmem:[#allocation2 + $0x78] sm:$0xff]   ;;  %v5685_v35 = vld [vmem:[#allocation2 + $0x80] ss:$0 sps:$4 sm:$0x11]  }
 0x181   : > { %v5648_v46 = vpop.permute.xlu1 %1626  ;;  %v1614_v1 = vsel %vm1575_vm5, %v1612_v49, %v1613_v43  ;;  %v1505_v13 = vrot.slane %v1503_v11, 1  ;;  %v1501_v14 = vor.u32 %v1500_v63, %v1496_v28  ;;  %v1621_v3 = vrot.slane %v5653_v54, 1  ;;  %v5693_v30 = vld [vmem:[#allocation2 + $0x74] ss:$0 sps:$4 sm:$0x11]   ;;  %v5697_v43 = vld [vmem:[#allocation2 + $0x78] sm:$0xff]  }
 0x182   : > { %v1622_v19 = vrot.slane %v4666_v57, 1  ;;  %v1522_v23 = vshll.u32 %v5659_v12, 16  ;;  %v1518_v52 = vsel %vm1350_vm4, %v1513_v50, %v1517_v56  ;;  %v1532_v29 = vshrl.u32 %v5653_v54, 16 }
 0x183   : > { %1563 = vrot.lane.b32.xlu0 %v1482_v48, %s4817_s14  ;;  %v1536_v27 = vrot.slane %v1534_v9, 1  ;;  %v1539_v32 = vshll.u32 %v4666_v57, 16  ;;  %v1618_v41 = vrot.slane %v5659_v12, 1  ;;  %v1619_v60 = vrot.slane %v4668_v20, 1 }
 0x184   : > { %1565 = vrot.lane.b32.xlu1 %v1494_v25, %s4817_s14  ;;  %v1527_v21 = vshll.u32 %v4668_v20, 16  ;;  %v1506_v26 = vsel %vm1350_vm4, %v1501_v14, %v1505_v13  ;;  %v1520_v4 = vshrl.u32 %v5659_v12, 16  ;;  %v1524_v55 = vrot.slane %v1522_v23, 1  ;;  %v4714_v13 = vld [vmem:[#allocation2 + $0x18] sm:$0xff]  }
 0x185   : > { %v1548_v5 = vpop.permute.xlu0 %1547  ;;  %v5665_v61 = vpop.permute.xlu1 %2180  ;;  %v1623_v39 = vsel %vm1575_vm5, %v1621_v3, %v1622_v19  ;;  %v1537_v22 = vor.u32 %v1536_v27, %v1532_v29  ;;  %v1541_v47 = vrot.slane %v1539_v32, 1  ;;  %v2985_v17 = vshll.u32 %v5673_v33, 16  ;;  %v5719_v3 = vld [vmem:[#allocation2 + $0x80] ss:$0 sps:$4 sm:$0x11]  }
 0x186   : > { %v1620_v34 = vsel %vm1575_vm5, %v1618_v41, %v1619_v60  ;;  %v1529_v48 = vrot.slane %v1527_v21, 1  ;;  %v3131_v16 = vrot.slane %v5608_v59, 1  ;;  %v3132_v8 = vrot.slane %v5618_v18, 1  ;;  %v4708_v18 = vld [vmem:[%s6318_s3 + $0x38] sm:$0xff]   ;;  %v4709_v27 = vld [vmem:[%s6318_s3 + $0x40] sm:$0xff]  }
 0x187   : > { %3092 = vrot.lane.b32.xlu0 %v2981_v58, %s4817_s14  ;;  %v1662_v25 = vsel %vm1656_vm12, %v4712_v6, %v1548_v5  ;;  %v1525_v7 = vor.u32 %v1524_v55, %v1520_v4  ;;  %v2983_v57 = vshrl.u32 %v5673_v33, 16  ;;  %v2007_v49 = vshll.u32 %v5679_v37, 16  ;;  %v4713_v58 = vld [vmem:[#allocation2 + $0xc] sm:$0xff]  }
 0x188   : > { %1650 = vrot.lane.b32.xlu1 %v1617_v0, %s4818_s15  ;;  %v1542_v28 = vsel %vm1350_vm4, %v1537_v22, %v1541_v47  ;;  %v2987_v63 = vrot.slane %v2985_v17, 1  ;;  %v2990_v5 = vshll.u32 %v5685_v35, 16  ;;  %v2153_v50 = vrot.slane %v5563_v62, 1  ;;  %v4681_v47 = vld [vmem:[#allocation2 + $0x8c] ss:$0 sps:$4 sm:$0x11]  }
 0x189   : > { %v1695_v56 = vsel %vm1689_vm13, %v1662_v25, %v5635_v15  ;;  %v2154_v9 = vrot.slane %v5560_v40, 1  ;;  %v2005_v20 = vshrl.u32 %v5679_v37, 16  ;;  %v1530_v62 = vsel %vm1350_vm4, %v1525_v7, %v1529_v48  ;;  %v5725_v40 = vld [vmem:[#allocation2 + $0x84] sm:$0xff]  }
 0x18a   : > { %v2009_v19 = vrot.slane %v2007_v49, 1  ;;  %v2019_v15 = vshll.u32 %v5697_v43, 16  ;;  %v2988_v32 = vor.u32 %v2987_v63, %v2983_v57  ;;  %v2992_v41 = vrot.slane %v2990_v5, 1  ;;  %v5760_v57 = vld [vmem:[#allocation2 + $0x84] sm:$0xff]  }
 0x18b   : > { %1648 = vrot.lane.b32.xlu0 %v1614_v1, %s4818_s15  ;;  %v2012_v1 = vshll.u32 %v5693_v30, 16  ;;  %v2155_v21 = vsel %vm1575_vm5, %v2153_v50, %v2154_v9  ;;  %v2024_v4 = vshll.u32 %v5719_v3, 16  ;;  %v2997_v17 = vshll.u32 %v5725_v40, 16  ;;  %v5769_v5 = vld [vmem:[#allocation2 + $0x98] ss:$0 sps:$4 sm:$0x11]  }
 0x18c   : > { %1569 = vrot.lane.b32.xlu1 %v1518_v52, %s4817_s14  ;;  %v2103_v2 = vpop.permute.xlu0 %2102  ;;  %v4715_v52 = vld [vmem:[#allocation2 + $0xc] sm:$0xff]   ;;  %v2021_v22 = vrot.slane %v2019_v15, 1  ;;  %v2156_v48 = vrot.slane %v5679_v37, 1  ;;  %v3134_v25 = vrot.slane %v5673_v33, 1  ;;  %v2995_v7 = vshrl.u32 %v5725_v40, 16 }
 0x18d   : > { %v2215_v14 = vsel %vm1656_vm12, %v4714_v13, %v2103_v2  ;;  %v2026_v6 = vrot.slane %v2024_v4, 1  ;;  %v5774_v50 = vld [vmem:[#allocation2 + $0x8c] ss:$0 sps:$4 sm:$0x11]   ;;  %v4716_v4 = vld [vmem:[#allocation2 + $0x30] sm:$0xff]  }
 0x18e   : > { %v5681_v45 = vpop.permute.xlu1 %3078  ;;  %v2247_v2 = vsel %vm1689_vm13, %v2215_v14, %v5646_v53  ;;  %v3137_v14 = vrot.slane %v5725_v40, 1 }
 0x18f   : > { %1567 = vrot.lane.b32.xlu0 %v1506_v26, %s4817_s14  ;;  %v2017_v26 = vshrl.u32 %v5697_v43, 16 }
 0x190   : > { %1654 = vrot.lane.b32.xlu1 %v1623_v39, %s4818_s15  ;;  %v2010_v39 = vor.u32 %v2009_v19, %v2005_v20  ;;  %v3138_v19 = vrot.slane %v4681_v47, 1 }
 0x192   : > { %v1546_v31 = vpop.permute.xlu0 %1545  ;;  %v5699_v11 = vpop.permute.xlu1 %3162 }
 0x193   : > { %v1660_v59 = vsel %vm1656_vm12, %v4713_v58, %v1546_v31  ;;  %1652 = vrot.lane.b32.xlu0 %v1620_v34, %s4818_s15  ;;  %v2993_v34 = vsel %vm1350_vm4, %v2988_v32, %v2992_v41  ;;  %v3135_v31 = vrot.slane %v5685_v35, 1  ;;  %v2029_v32 = vshrl.u32 %v5760_v57, 16 }
 0x194   : > { %v1693_v0 = vsel %vm1689_vm13, %v1660_v59, %v5648_v46  ;;  %1573 = vrot.lane.b32.xlu1 %v1542_v28, %s4817_s14  ;;  %v2022_v59 = vor.u32 %v2021_v22, %v2017_v26 }
 0x195   : > { %4395 = vmatmul.mubr.msk.bf16.vlgmr.msra.gmra.mrb[0].mxu1 %vm2301_vm14, %v1693_v0  ;;  %v3136_v0 = vsel %vm1575_vm5, %v3134_v25, %v3135_v31 }
 0x196   : > { %4398 = vmatprep.mubr.msk.bf16.mxu1 %vm2301_vm14, %v1695_v56  ;;  %v2101_v46 = vpop.permute.xlu0 %2100  ;;  %4427 = vmatpush3.bf16.msra.mxu1 %v5506_v24  ;;  %v5727_v23 = vpop.permute.xlu1 %1630  ;;  %v3133_v24 = vsel %vm1575_vm5, %v3131_v16, %v3132_v8  ;;  %v2157_v16 = vrot.slane %v5693_v30, 1  ;;  %v5754_v8 = vld [vmem:[#allocation2 + $0x90] sm:$0xff]   ;;  %v2999_v30 = vrot.slane %v2997_v17, 1  ;;  %v2031_v56 = vshll.u32 %v5760_v57, 16 }
 0x197   : > { %v2213_v29 = vsel %vm1656_vm12, %v4715_v52, %v2101_v46  ;;  %4428 = vmatprep.subr.bf16.mxu1 %v4708_v18  ;;  %1571 = vrot.lane.b32.xlu0 %v1530_v62, %s4817_s14  ;;  %v3009_v35 = vshll.u32 %v5754_v8, 16  ;;  %v2027_v20 = vsel %vm1350_vm4, %v2022_v59, %v2026_v6  ;;  %v5779_v46 = vld [vmem:[#allocation2 + $0x90] sm:$0xff]   ;;  %v3007_v15 = vshrl.u32 %v5754_v8, 16 }
 0x198   : > { %v2245_v60 = vsel %vm1689_vm13, %v2213_v29, %v5665_v61  ;;  %3172 = vrot.lane.b32.xlu1 %v3133_v24, %s4818_s15  ;;  %v2014_v61 = vrot.slane %v2012_v1, 1  ;;  %v2158_v63 = vsel %vm1575_vm5, %v2156_v48, %v2157_v16  ;;  %v3000_v1 = vor.u32 %v2999_v30, %v2995_v7  ;;  %v4717_v16 = vld [vmem:[#allocation2 + $0x24] sm:$0xff]  }
 0x199   : > { %4356 = vmatprep.mubr.msk.bf16.mxu0 %vm2301_vm14, %v2245_v60  ;;  %v3011_v52 = vrot.slane %v3009_v35, 1  ;;  %v3014_v29 = vshll.u32 %v5769_v5, 16  ;;  %v2159_v24 = vrot.slane %v5697_v43, 1  ;;  %v2033_v41 = vrot.slane %v2031_v56, 1 }
 0x19a   : > { %4357 = vmatmul.mubr.msk.bf16.vlgmr.msra.gmra.mrb[32].mxu0 %vm2301_vm14, %v2247_v2  ;;  %v5745_v55 = vpop.permute.xlu0 %1632  ;;  %4429 = vmatpush3.bf16.msra.mxu1 %v4708_v18  ;;  %v5748_v53 = vpop.permute.xlu1 %3160  ;;  %v2015_v58 = vsel %vm1350_vm4, %v2010_v39, %v2014_v61  ;;  %v3002_v18 = vshll.u32 %v4681_v47, 16  ;;  %v2036_v60 = vshll.u32 %v5774_v50, 16  ;;  %v2043_v26 = vshll.u32 %v5779_v46, 16  ;;  %v5796_v61 = vld [vmem:[#allocation2 + $0x9c] sm:$0xff]  }
 0x19b   : > { %4430 = vmatprep.subr.bf16.mxu1 %v4709_v27  ;;  %2194 = vrot.lane.b32.xlu0 %v2155_v21, %s4818_s15  ;;  %v2160_v21 = vrot.slane %v5719_v3, 1  ;;  %v3139_v17 = vsel %vm1575_vm5, %v3137_v14, %v3138_v19  ;;  %v3016_v48 = vrot.slane %v3014_v29, 1  ;;  %v2034_v25 = vor.u32 %v2033_v41, %v2029_v32 }
 0x19c   : > { %3094 = vrot.lane.b32.xlu1 %v2993_v34, %s4817_s14  ;;  %v3004_v13 = vrot.slane %v3002_v18, 1  ;;  %v3012_v34 = vor.u32 %v3011_v52, %v3007_v15  ;;  %v2038_v31 = vrot.slane %v2036_v60, 1  ;;  %v2041_v30 = vshrl.u32 %v5779_v46, 16 }
 0x19d   : > { %v2161_v59 = vsel %vm1575_vm5, %v2159_v24, %v2160_v21  ;;  %v2045_v18 = vrot.slane %v2043_v26, 1  ;;  %v3021_v35 = vshll.u32 %v5796_v61, 16  ;;  %v3140_v14 = vrot.slane %v5754_v8, 1  ;;  %v5832_v24 = vld [vmem:[#allocation2 + $0x9c] sm:$0xff]  }
 0x19e   : > { %v5762_v49 = vpop.permute.xlu0 %2186  ;;  %4431 = vmatpush3.bf16.msra.mxu1 %v4709_v27  ;;  %v5765_v28 = vpop.permute.xlu1 %2184  ;;  %v5787_v27 = vld [vmem:[#allocation2 + $0x98] ss:$0 sps:$4 sm:$0x11]   ;;  %v3005_v2 = vsel %vm1350_vm4, %v3000_v1, %v3004_v13  ;;  %v3017_v56 = vsel %vm1350_vm4, %v3012_v34, %v3016_v48  ;;  %v5821_v13 = vld [vmem:[#allocation2 + $0xa8] sm:$0xff]   ;;  %v2039_v15 = vsel %vm1350_vm4, %v2034_v25, %v2038_v31  ;;  %v3141_v29 = vrot.slane %v5769_v5, 1 }
 0x19f   : > { %2116 = vrot.lane.b32.xlu0 %v2015_v58, %s4817_s14  ;;  %v2048_v7 = vshll.u32 %v5787_v27, 16  ;;  %v2046_v32 = vor.u32 %v2045_v18, %v2041_v30  ;;  %v3023_v41 = vrot.slane %v3021_v35, 1  ;;  %v3033_v5 = vshll.u32 %v5821_v13, 16  ;;  %v4721_v34 = vld [vmem:[#allocation2 + $0x18] sm:$0xff]   ;;  %v5858_v30 = vld [vmem:[#allocation2 + $0xa8] sm:$0xff]  }
 0x1a0   : > { %2196 = vrot.lane.b32.xlu1 %v2158_v63, %s4818_s15  ;;  %v5810_v63 = vld [vmem:[#allocation2 + $0xa4] ss:$0 sps:$4 sm:$0x11]   ;;  %v3191_v48 = vsel %vm1656_vm12, %v4721_v34, %v5681_v45  ;;  %v2055_v25 = vshll.u32 %v5832_v24, 16  ;;  %v4722_v45 = vld [vmem:[#allocation2 + $0x30] sm:$0xff]  }
 0x1a1   : > { %v2050_v52 = vrot.slane %v2048_v7, 1  ;;  %v3026_v60 = vshll.u32 %v5810_v63, 16  ;;  %v5896_v34 = vld [vmem:[#allocation2 + $0xc0] sm:$0xff]  }
 0x1a2   : > { %v1552_v9 = vpop.permute.xlu0 %1551  ;;  %v5781_v62 = vpop.permute.xlu1 %3082 }
 0x1a3   : > { %2118 = vrot.lane.b32.xlu0 %v2027_v20, %s4817_s14  ;;  %v1666_v39 = vsel %vm1656_vm12, %v4716_v4, %v1552_v9  ;;  %v2163_v9 = vrot.slane %v5774_v50, 1  ;;  %v4718_v20 = vld [vmem:[#allocation2 + $0x24] sm:$0xff]   ;;  %v3019_v50 = vshrl.u32 %v5796_v61, 16  ;;  %v2051_v7 = vsel %vm1350_vm4, %v2046_v32, %v2050_v52 }
 0x1a4   : > { %3174 = vrot.lane.b32.xlu1 %v3136_v0, %s4818_s15  ;;  %v1699_v58 = vsel %vm1689_vm13, %v1666_v39, %v5745_v55  ;;  %v2162_v55 = vrot.slane %v5760_v57, 1  ;;  %v5840_v39 = vld [vmem:[#allocation2 + $0xb0] ss:$0 sps:$4 sm:$0x11]   ;;  %v2166_v52 = vrot.slane %v5787_v27, 1  ;;  %v2168_v27 = vrot.slane %v5832_v24, 1 }
 0x1a6   : > { %v1550_v22 = vpop.permute.xlu1 %1549  ;;  %v2107_v47 = vpop.permute.xlu0 %2106  ;;  %v2164_v4 = vsel %vm1575_vm5, %v2162_v55, %v2163_v9  ;;  %v3038_v55 = vshll.u32 %v5840_v39, 16  ;;  %v2057_v9 = vrot.slane %v2055_v25, 1 }
 0x1a7   : > { %3096 = vrot.lane.b32.xlu0 %v3005_v2, %s4817_s14  ;;  %v1664_v6 = vsel %vm1656_vm12, %v4717_v16, %v1550_v22  ;;  %v4719_v2 = vld [vmem:[#allocation2 + $0x30] sm:$0xff]   ;;  %v4720_v22 = vld [vmem:[#allocation2 + $0x24] sm:$0xff]   ;;  %v3142_v16 = vsel %vm1575_vm5, %v3140_v14, %v3141_v29 }
 0x1a8   : > { %3176 = vrot.lane.b32.xlu1 %v3139_v17, %s4818_s15  ;;  %v1697_v3 = vsel %vm1689_vm13, %v1664_v6, %v5727_v23  ;;  %v2219_v21 = vsel %vm1656_vm12, %v4719_v2, %v2107_v47  ;;  %v3143_v6 = vrot.slane %v5796_v61, 1  ;;  %v5882_v29 = vld [vmem:[#allocation2 + $0xb0] ss:$0 sps:$4 sm:$0x11]  }
 0x1a9   : > { %4399 = vmatmul.mubr.msk.bf16.gmra.mrb[4].mxu1 %vm2301_vm14, %v1697_v3  ;;  %v4694_v3 = vld [vmem:[#allocation2 + $0xa4] ss:$0 sps:$4 sm:$0x11]   ;;  %v2251_v31 = vsel %vm1689_vm13, %v2219_v21, %v5762_v49  ;;  %v3144_v49 = vrot.slane %v5810_v63, 1 }
 0x1aa   : > { %v5813_v0 = vpop.permute.xlu1 %3166  ;;  %4402 = vmatprep.mubr.msk.bf16.mxu1 %vm2301_vm14, %v1699_v58  ;;  %v3081_v23 = vpop.permute.xlu0 %3080  ;;  %v3195_v58 = vsel %vm1656_vm12, %v4722_v45, %v5781_v62  ;;  %v2053_v62 = vshrl.u32 %v5832_v24, 16 }
 0x1ab   : > { %2198 = vrot.lane.b32.xlu0 %v2161_v59, %s4818_s15  ;;  %v3193_v1 = vsel %vm1656_vm12, %v4718_v20, %v3081_v23  ;;  %v3024_v59 = vor.u32 %v3023_v41, %v3019_v50  ;;  %v3031_v23 = vshrl.u32 %v5821_v13, 16  ;;  %v2060_v20 = vshll.u32 %v4694_v3, 16 }
 0x1ac   : > { %3098 = vrot.lane.b32.xlu1 %v3017_v56, %s4817_s14  ;;  %v5827_v19 = vsel %vm1689_vm13, %v3193_v1, %v5748_v53  ;;  %v3035_v56 = vrot.slane %v3033_v5, 1  ;;  %v5873_v1 = vsel %vm1689_vm13, %v3191_v48, %v5627_v51  ;;  %v5877_v14 = vsel %vm1689_vm13, %v3195_v58, %v5699_v11  ;;  %v5910_v58 = vld [vmem:[#allocation2 + $0xb4] sm:$0xff]  }
 0x1ad   : > { %v2067_v50 = vshll.u32 %v5858_v30, 16  ;;  %v3145_v51 = vsel %vm1575_vm5, %v3143_v6, %v3144_v49  ;;  %v2058_v2 = vor.u32 %v2057_v9, %v2053_v62  ;;  %v2062_v21 = vrot.slane %v2060_v20, 1 }
 0x1ae   : > { %v5836_v26 = vpop.permute.xlu1 %1634  ;;  %v2105_v53 = vpop.permute.xlu0 %2104  ;;  %v3036_v11 = vor.u32 %v3035_v56, %v3031_v23  ;;  %v2065_v5 = vshrl.u32 %v5858_v30, 16  ;;  %v5912_v23 = vld [vmem:[#allocation2 + $0xc8] ss:$0 sps:$4 sm:$0x11]   ;;  %v2091_v56 = vshll.u32 %v5896_v34, 16  ;;  %v3147_v20 = vrot.slane %v5840_v39, 1 }
 0x1af   : > { %2120 = vrot.lane.b32.xlu0 %v2039_v15, %s4817_s14  ;;  %v2217_v17 = vsel %vm1656_vm12, %v4720_v22, %v2105_v53  ;;  %v2165_v15 = vrot.slane %v5779_v46, 1  ;;  %v2169_v53 = vrot.slane %v4694_v3, 1  ;;  %v2069_v22 = vrot.slane %v2067_v50, 1 }
 0x1b0   : > { %2200 = vrot.lane.b32.xlu1 %v2164_v4, %s4818_s15  ;;  %v2249_v47 = vsel %vm1689_vm13, %v2217_v17, %v5765_v28  ;;  %v3028_v28 = vrot.slane %v3026_v60, 1  ;;  %v3040_v60 = vrot.slane %v3038_v55, 1  ;;  %v2072_v17 = vshll.u32 %v5882_v29, 16  ;;  %v4724_v55 = vld [vmem:[#allocation2 + $0x48] sm:$0xff]  }
 0x1b1   : > { %4360 = vmatprep.mubr.msk.bf16.mxu0 %vm2301_vm14, %v2249_v47  ;;  %v2167_v4 = vsel %vm1575_vm5, %v2165_v15, %v2166_v52  ;;  %v2170_v45 = vsel %vm1575_vm5, %v2168_v27, %v2169_v53  ;;  %v4725_v52 = vld [vmem:[#allocation2 + $0x3c] sm:$0xff]   ;;  %v3149_v39 = vrot.slane %v5910_v58, 1  ;;  %v3045_v27 = vshll.u32 %v5910_v58, 16 }
 0x1b2   : > { %v5860_v18 = vpop.permute.xlu1 %3164  ;;  %4361 = vmatmul.mubr.msk.bf16.gmra.mrb[36].mxu0 %vm2301_vm14, %v2251_v31  ;;  %v5863_v35 = vpop.permute.xlu0 %1636  ;;  %v3029_v63 = vsel %vm1350_vm4, %v3024_v59, %v3028_v28  ;;  %v3041_v47 = vsel %vm1350_vm4, %v3036_v11, %v3040_v60  ;;  %v5901_v31 = vld [vmem:[#allocation2 + $0xc0] sm:$0xff]   ;;  %v4698_v59 = vld [vmem:[#allocation2 + $0xbc] ss:$0 sps:$4 sm:$0x11]   ;;  %v2070_v28 = vor.u32 %v2069_v22, %v2065_v5  ;;  %v2074_v49 = vrot.slane %v2072_v17, 1  ;;  %v5926_v60 = vld [vmem:[#allocation2 + $0xcc] sm:$0xff]  }
 0x1b3   : > { %2122 = vrot.lane.b32.xlu0 %v2051_v7, %s4817_s14  ;;  %v2063_v7 = vsel %vm1350_vm4, %v2058_v2, %v2062_v21  ;;  %v3057_v15 = vshll.u32 %v5901_v31, 16  ;;  %v2172_v11 = vrot.slane %v5882_v29, 1  ;;  %v3150_v21 = vrot.slane %v4698_v59, 1 }
 0x1b4   : > { %3178 = vrot.lane.b32.xlu1 %v3142_v16, %s4818_s15  ;;  %v4723_v16 = vld [vmem:[#allocation2 + $0x48] sm:$0xff]   ;;  %v2075_v5 = vsel %vm1350_vm4, %v2070_v28, %v2074_v49  ;;  %v2089_v29 = vshrl.u32 %v5896_v34, 16  ;;  %v2093_v22 = vrot.slane %v2091_v56, 1  ;;  %v2096_v17 = vshll.u32 %v5912_v23, 16 }
 0x1b6   : > { %v5885_v32 = vpop.permute.xlu1 %2188  ;;  %v5887_v41 = vpop.permute.xlu0 %2190  ;;  %v2094_v49 = vor.u32 %v2093_v22, %v2089_v29  ;;  %v2098_v56 = vrot.slane %v2096_v17, 1 }
 0x1b7   : > { %3100 = vrot.lane.b32.xlu0 %v3029_v63, %s4817_s14  ;;  %v5919_v63 = vld [vmem:[#allocation2 + $0xc8] ss:$0 sps:$4 sm:$0x11]  }
 0x1b8   : > { %3180 = vrot.lane.b32.xlu1 %v3145_v51, %s4818_s15  ;;  %v2171_v51 = vrot.slane %v5858_v30, 1 }
 0x1ba   : > { %v3087_v48 = vpop.permute.xlu1 %3086  ;;  %v1556_v25 = vpop.permute.xlu0 %1555  ;;  %v2173_v28 = vsel %vm1575_vm5, %v2171_v51, %v2172_v11  ;;  %v4726_v11 = vld [vmem:[#allocation2 + $0x3c] sm:$0xff]  }
 0x1bb   : > { %2202 = vrot.lane.b32.xlu0 %v2167_v4, %s4818_s15  ;;  %v3199_v6 = vsel %vm1656_vm12, %v4723_v16, %v3087_v48  ;;  %v1670_v62 = vsel %vm1656_vm12, %v4724_v55, %v1556_v25  ;;  %v3055_v48 = vshrl.u32 %v5901_v31, 16  ;;  %v3062_v16 = vshll.u32 %v5919_v63, 16  ;;  %v5949_v55 = vld [vmem:[#allocation2 + $0xb4] sm:$0xff]  }
 0x1bc   : > { %3102 = vrot.lane.b32.xlu1 %v3041_v47, %s4817_s14  ;;  %v5906_v3 = vsel %vm1689_vm13, %v3199_v6, %v5813_v0  ;;  %v3146_v0 = vrot.slane %v5821_v13, 1  ;;  %v1703_v4 = vsel %vm1689_vm13, %v1670_v62, %v5863_v35  ;;  %v3059_v47 = vrot.slane %v3057_v15, 1  ;;  %v5944_v35 = vld [vmem:[#allocation2 + $0xd4] ss:$0 sps:$4 sm:$0x11]  }
 0x1bd   : > { %v3069_v6 = vshll.u32 %v5926_v60, 16  ;;  %v3043_v25 = vshrl.u32 %v5910_v58, 16  ;;  %v3151_v62 = vsel %vm1575_vm5, %v3149_v39, %v3150_v21  ;;  %v3074_v51 = vshll.u32 %v5944_v35, 16 }
 0x1be   : > { %v1554_v9 = vpop.permute.xlu1 %1553  ;;  %v2111_v53 = vpop.permute.xlu0 %2110  ;;  %v2099_v21 = vsel %vm1350_vm4, %v2094_v49, %v2098_v56  ;;  %v2174_v22 = vrot.slane %v5949_v55, 1 }
 0x1bf   : > { %2124 = vrot.lane.b32.xlu0 %v2063_v7, %s4817_s14  ;;  %v1668_v50 = vsel %vm1656_vm12, %v4725_v52, %v1554_v9  ;;  %v3047_v7 = vrot.slane %v3045_v27, 1  ;;  %v3060_v9 = vor.u32 %v3059_v47, %v3055_v48 }
 0x1c0   : > { %2204 = vrot.lane.b32.xlu1 %v2170_v45, %s4818_s15  ;;  %v1701_v2 = vsel %vm1689_vm13, %v1668_v50, %v5836_v26  ;;  %v3148_v26 = vsel %vm1575_vm5, %v3146_v0, %v3147_v20  ;;  %v3050_v45 = vshll.u32 %v4698_v59, 16  ;;  %v3064_v0 = vrot.slane %v3062_v16, 1  ;;  %v4704_v20 = vld [vmem:[#allocation2 + $0xbc] ss:$0 sps:$4 sm:$0x11]  }
 0x1c1   : > { %4403 = vmatmul.mubr.msk.bf16.gmra.mrb[8].mxu1 %vm2301_vm14, %v1701_v2  ;;  %v3067_v59 = vshrl.u32 %v5926_v60, 16  ;;  %v3071_v50 = vrot.slane %v3069_v6, 1  ;;  %v3048_v27 = vor.u32 %v3047_v7, %v3043_v25  ;;  %v2175_v17 = vrot.slane %v4704_v20, 1  ;;  %v4728_v7 = vld [vmem:[#allocation2 + $0x3c] sm:$0xff]  }
 0x1c2   : > { %4406 = vmatprep.mubr.msk.bf16.mxu1 %vm2301_vm14, %v1703_v4  ;;  %v5953_v15 = vpop.permute.xlu1 %3170  ;;  %v3052_v4 = vrot.slane %v3050_v45, 1  ;;  %v3065_v29 = vsel %vm1350_vm4, %v3060_v9, %v3064_v0  ;;  %v3076_v16 = vrot.slane %v3074_v51, 1  ;;  %v2084_v56 = vshll.u32 %v4704_v20, 16 }
 0x1c3   : > { %2126 = vrot.lane.b32.xlu0 %v2075_v5, %s4817_s14  ;;  %v2079_v5 = vshll.u32 %v5949_v55, 16  ;;  %v3072_v47 = vor.u32 %v3071_v50, %v3067_v59  ;;  %v3152_v9 = vrot.slane %v5901_v31, 1  ;;  %v3153_v0 = vrot.slane %v5919_v63, 1 }
 0x1c4   : > { %3182 = vrot.lane.b32.xlu1 %v3148_v26, %s4818_s15  ;;  %v4727_v26 = vld [vmem:[#allocation2 + $0x48] sm:$0xff]   ;;  %v3053_v6 = vsel %vm1350_vm4, %v3048_v27, %v3052_v4  ;;  %v3156_v59 = vrot.slane %v5944_v35, 1  ;;  %v2086_v51 = vrot.slane %v2084_v56, 1  ;;  %v2177_v27 = vrot.slane %v5896_v34, 1 }
 0x1c5   : > { %v2223_v48 = vsel %vm1656_vm12, %v4727_v26, %v2111_v53  ;;  %v2081_v49 = vrot.slane %v2079_v5, 1  ;;  %v2176_v53 = vsel %vm1575_vm5, %v2174_v22, %v2175_v17  ;;  %v3077_v20 = vsel %vm1350_vm4, %v3072_v47, %v3076_v16  ;;  %v4729_v17 = vld [vmem:[#allocation2 + $0x60] sm:$0xff]  }
 0x1c6   : > { %v3154_v63 = vsel %vm1575_vm5, %v3152_v9, %v3153_v0  ;;  %v2178_v4 = vrot.slane %v5912_v23, 1  ;;  %v4730_v47 = vld [vmem:[#allocation2 + $0x60] sm:$0xff]  }
 0x1c7   : > { %2206 = vrot.lane.b32.xlu0 %v2173_v28, %s4818_s15  ;;  %v3085_v52 = vpop.permute.xlu0 %3084  ;;  %v1639_v25 = vpop.permute.xlu1 %1638  ;;  %v2077_v28 = vshrl.u32 %v5949_v55, 16 }
 0x1c8   : > { %3184 = vrot.lane.b32.xlu1 %v3151_v62, %s4818_s15  ;;  %v3197_v2 = vsel %vm1656_vm12, %v4726_v11, %v3085_v52  ;;  %v2255_v52 = vsel %vm1689_vm13, %v2223_v48, %v5887_v41  ;;  %v2179_v5 = vsel %vm1575_vm5, %v2177_v27, %v2178_v4 }
 0x1c9   : > { %v5961_v39 = vsel %vm1689_vm13, %v3197_v2, %v5860_v18  ;;  %v2082_v50 = vor.u32 %v2081_v49, %v2077_v28 }
 0x1cb   : > { %2130 = vrot.lane.b32.xlu0 %v2099_v21, %s4817_s14  ;;  %v2087_v2 = vsel %vm1350_vm4, %v2082_v50, %v2086_v51 }
 0x1cc   : > { %3106 = vrot.lane.b32.xlu1 %v3065_v29, %s4817_s14  ;;  %v2109_v18 = vpop.permute.xlu0 %2108 }
 0x1cd   : > { %v2221_v45 = vsel %vm1656_vm12, %v4728_v7, %v2109_v18  ;;  %v5989_v11 = vpop.permute.xlu1 %3168 }
 0x1ce   : > { %v2253_v62 = vsel %vm1689_vm13, %v2221_v45, %v5885_v32  ;;  %v3155_v32 = vrot.slane %v5926_v60, 1 }
 0x1cf   : > { %3104 = vrot.lane.b32.xlu0 %v3053_v6, %s4817_s14  ;;  %4364 = vmatprep.mubr.msk.bf16.mxu0 %vm2301_vm14, %v2253_v62  ;;  %v4731_v6 = vld [vmem:[#allocation2 + $0x54] sm:$0xff]  }
 0x1d0   : > { %2208 = vrot.lane.b32.xlu1 %v2176_v53, %s4818_s15  ;;  %4365 = vmatmul.mubr.msk.bf16.gmra.mrb[40].mxu0 %vm2301_vm14, %v2255_v52  ;;  %v3157_v41 = vsel %vm1575_vm5, %v3155_v32, %v3156_v59  ;;  %v1641_v35 = vpop.permute.xlu0 %1640  ;;  %v4732_v62 = vld [vmem:[#allocation2 + $0x54] sm:$0xff]  }
 0x1d3   : > { %3108 = vrot.lane.b32.xlu0 %v3077_v20, %s4817_s14  ;;  %v2193_v21 = vpop.permute.xlu1 %2192 }
 0x1d4   : > { %3186 = vrot.lane.b32.xlu1 %v3154_v63, %s4818_s15 }
 0x1d7   : > { %2128 = vrot.lane.b32.xlu0 %v2087_v2, %s4817_s14  ;;  %s229_s14 = sand.u32 1, %s4798_s19  }
 0x1d8   : > { %3188 = vrot.lane.b32.xlu1 %v3157_v41, %s4818_s15  ;;  %v1560_v29 = vpop.permute.xlu0 %1559  ;;  %s3809_s11 = sshll.u32 %s229_s14, 7  ;;  %s6269_s21 = scalar_lea.sflag [#allocation4], %s229_s14 }
 0x1d9   : > { %v1674_v16 = vsel %vm1656_vm12, %v4730_v47, %v1560_v29  ;;  %s6154_s12 = scalar_lea.vmem [#allocation3], %s3809_s11 }
 0x1da   : > { %v1707_v49 = vsel %vm1689_vm13, %v1674_v16, %v1641_v35  ;;  %s3721_s16 = sshll.u32 %s6154_s12, 4  ;;  %s6259_s16 = int_to_ptr.vmem [resolvable:$true] %s3721_s16 }
 0x1db   : > { %2210 = vrot.lane.b32.xlu0 %v2179_v5, %s4818_s15  ;;  %s4736_s27 = scalar_lea.vmem %s6259_s16, 2048  ;;  %p4743_p1 = scmp.lt.s32.totalorder %s6259_s16, %s4741_s7 }
 0x1dc   : > { %p4737_p12 = scmp.ne.s32.totalorder %s6259_s16, %s4736_s27  ;;  %p4744_p2 = scmp.lt.s32.totalorder %s4742_s8, %s4736_s27 }
 0x1de   : > { %p4738_p13 = pnand %p4737_p12, %p4892_p4  ;;  %p4745_p3 = por %p4744_p2, %p4743_p1 }
 0x1df   : > { %v3091_v22 = vpop.permute.xlu1 %3090 }
 0x1e0   : > { %v3203_v26 = vsel %vm1656_vm12, %v4729_v17, %v3091_v22  ;;  %p4739_p0 = pneg %p4738_p13 }
 0x1e1   : > { %v6003_v48 = vsel %vm1689_vm13, %v3203_v26, %v5953_v15 }
 0x1e2   : > { %p4746_p5 = pnand %p4745_p3, %p4739_p0 }
 0x1e5   : > { %v2115_v23 = vpop.permute.xlu0 %2114 }
 0x1e6   : > { %v1558_v18 = vpop.permute.xlu1 %1557 }
 0x1e7   : > { %v1672_v7 = vsel %vm1656_vm12, %v4731_v6, %v1558_v18 }
 0x1e8   : > { %v1705_v45 = vsel %vm1689_vm13, %v1672_v7, %v1639_v25  ;;  %v4733_v7 = vld [vmem:[#allocation2 + $0x60] sm:$0xff]  }
 0x1e9   : > { %v6008_v28 = vpop.permute.xlu0 %3088  ;;  %4407 = vmatmul.mubr.msk.bf16.gmra.mrb[12].mxu1 %vm2301_vm14, %v1705_v45  ;;  %v2227_v45 = vsel %vm1656_vm12, %v4733_v7, %v2115_v23 }
 0x1ea   : > { %v1643_v56 = vpop.permute.xlu1 %1642  ;;  %4410 = vmatprep.mubr.msk.bf16.mxu1 %vm2301_vm14, %v1707_v49 }
 0x1ed   : > { %v2113_v15 = vpop.permute.xlu0 %2112 }
 0x1ee   : > { %v2225_v53 = vsel %vm1656_vm12, %v4732_v62, %v2113_v15  ;;  %v1562_v9 = vpop.permute.xlu1 %1561 }
 0x1ef   : > { %v2257_v0 = vsel %vm1689_vm13, %v2225_v53, %v2193_v21  ;;  %v1676_v52 = vsel %vm1656_vm12, %v5590_v44, %v1562_v9 }
 0x1f0   : > { %4368 = vmatprep.mubr.msk.bf16.mxu0 %vm2301_vm14, %v2257_v0  ;;  %v1709_v25 = vsel %vm1689_vm13, %v1676_v52, %v1643_v56 }
 0x1f1   : > { %v1645_v20 = vpop.permute.xlu0 %1644  ;;  %4411 = vmatmul.mubr.msk.bf16.gmra.mrb[16].mxu1 %vm2301_vm14, %v1709_v25 }
 0x1f2   : > { %v1647_v32 = vpop.permute.xlu1 %1646 }
 0x1f5   : > { %v1564_v59 = vpop.permute.xlu0 %1563 }
 0x1f6   : > { %v1678_v50 = vsel %vm1656_vm12, %v5595_v42, %v1564_v59  ;;  %v1566_v51 = vpop.permute.xlu1 %1565 }
 0x1f7   : > { %v1711_v63 = vsel %vm1689_vm13, %v1678_v50, %v1645_v20  ;;  %v1680_v41 = vsel %vm1656_vm12, %v5600_v38, %v1566_v51  ;;  %v4734_v20 = vld [vmem:[#allocation2 + $0x54] sm:$0xff]  }
 0x1f8   : > { %4414 = vmatprep.mubr.msk.bf16.mxu1 %vm2301_vm14, %v1711_v63  ;;  %v1713_v44 = vsel %vm1689_vm13, %v1680_v41, %v1647_v32  ;;  %v4735_v41 = vld [vmem:[#allocation2 + $0x6c] sm:$0xff]  }
 0x1f9   : > { %v6027_v2 = vpop.permute.xlu0 %3092  ;;  %4415 = vmatmul.mubr.msk.bf16.gmra.mrb[20].mxu1 %vm2301_vm14, %v1713_v44 }
 0x1fa   : > { %v1651_v27 = vpop.permute.xlu1 %1650 }
 0x1fd   : > { %v1649_v4 = vpop.permute.xlu0 %1648 }
 0x1fe   : > { %v1570_v35 = vpop.permute.xlu1 %1569 }
 0x1ff   : > { %v1684_v42 = vsel %vm1656_vm12, %v5624_v10, %v1570_v35 }
 0x200   : > { %v1717_v38 = vsel %vm1689_vm13, %v1684_v42, %v1651_v27 }
 0x201   : > { %v1568_v21 = vpop.permute.xlu0 %1567 }
 0x202   : > { %v1682_v5 = vsel %vm1656_vm12, %v5633_v36, %v1568_v21  ;;  %v1655_v29 = vpop.permute.xlu1 %1654 }
 0x203   : > { %v1715_v22 = vsel %vm1689_vm13, %v1682_v5, %v1649_v4 }
 0x204   : > { %4418 = vmatprep.mubr.msk.bf16.mxu1 %vm2301_vm14, %v1715_v22 }
 0x205   : > { %4419 = vmatmul.mubr.msk.bf16.gmra.mrb[24].mxu1 %vm2301_vm14, %v1717_v38  ;;  %v1653_v17 = vpop.permute.xlu0 %1652 }
 0x206   : > { %v1574_v26 = vpop.permute.xlu1 %1573 }
 0x207   : > { %v1688_v47 = vsel %vm1656_vm12, %v5653_v54, %v1574_v26 }
 0x208   : > { %v1721_v36 = vsel %vm1689_vm13, %v1688_v47, %v1655_v29 }
 0x209   : > { %v1572_v16 = vpop.permute.xlu0 %1571 }
 0x20a   : > { %v1686_v10 = vsel %vm1656_vm12, %v5659_v12, %v1572_v16  ;;  %v3173_v18 = vpop.permute.xlu1 %3172 }
 0x20b   : > { %v1719_v6 = vsel %vm1689_vm13, %v1686_v10, %v1653_v17 }
 0x20c   : > { %4422 = vmatprep.mubr.msk.bf16.mxu1 %vm2301_vm14, %v1719_v6 }
 0x20d   : > { %4423 = vmatmul.mubr.msk.bf16.gmra.mrb[28].mxu1 %vm2301_vm14, %v1721_v36  ;;  %v2195_v49 = vpop.permute.xlu0 %2194 }
 0x20e   : > { %v2259_v56 = vsel %vm1689_vm13, %v2227_v45, %v2195_v49  ;;  %4432 = vmatprep.mubr.msk.bf16.mxu1 %vm2301_vm14, %v5873_v1  ;;  %v3095_v54 = vpop.permute.xlu1 %3094 }
 0x20f   : > { %4369 = vmatmul.mubr.msk.bf16.gmra.mrb[44].mxu0 %vm2301_vm14, %v2259_v56 }
 0x211   : > { %v2117_v12 = vpop.permute.xlu0 %2116 }
 0x212   : > { %v2229_v15 = vsel %vm1656_vm12, %v5679_v37, %v2117_v12  ;;  %v2197_v62 = vpop.permute.xlu1 %2196 }
 0x213   : > { %v2261_v53 = vsel %vm1689_vm13, %v2229_v15, %v2197_v62 }
 0x214   : > { %4372 = vmatprep.mubr.msk.bf16.mxu0 %vm2301_vm14, %v2261_v53 }
 0x215   : > { %4433 = vmatmul.mubr.msk.bf16.vlgmr.msra.gmra.mrb[0].mxu1 %vm2301_vm14, %v5827_v19  ;;  %v2119_v23 = vpop.permute.xlu0 %2118 }
 0x216   : > { %4436 = vmatprep.mubr.msk.bf16.mxu1 %vm2301_vm14, %v5877_v14  ;;  %v3175_v1 = vpop.permute.xlu1 %3174  ;;  %v2231_v52 = vsel %vm1656_vm12, %v5697_v43, %v2119_v23  ;;  %v3201_v14 = vsel %vm1656_vm12, %v4734_v20, %v6008_v28 }
 0x217   : > { %v3233_v50 = vsel %vm1689_vm13, %v3201_v14, %v5989_v11  ;;  %v3207_v11 = vsel %vm1656_vm12, %v5673_v33, %v3095_v54 }
 0x218   : > { %v3239_v27 = vsel %vm1689_vm13, %v3207_v11, %v3175_v1 }
 0x219   : > { %v3097_v9 = vpop.permute.xlu0 %3096 }
 0x21a   : > { %v3177_v0 = vpop.permute.xlu1 %3176  ;;  %v3209_v5 = vsel %vm1656_vm12, %v5725_v40, %v3097_v9 }
 0x21b   : > { %v3241_v29 = vsel %vm1689_vm13, %v3209_v5, %v3177_v0 }
 0x21d   : > { %4437 = vmatmul.mubr.msk.bf16.gmra.mrb[4].mxu1 %vm2301_vm14, %v5961_v39  ;;  %v2199_v37 = vpop.permute.xlu0 %2198 }
 0x21e   : > { %v2263_v25 = vsel %vm1689_vm13, %v2231_v52, %v2199_v37  ;;  %4440 = vmatprep.mubr.msk.bf16.mxu1 %vm2301_vm14, %v5906_v3  ;;  %v3099_v19 = vpop.permute.xlu1 %3098 }
 0x21f   : > { %4373 = vmatmul.mubr.msk.bf16.gmra.mrb[48].mxu0 %vm2301_vm14, %v2263_v25  ;;  %v3211_v38 = vsel %vm1656_vm12, %v5754_v8, %v3099_v19 }
 0x221   : > { %v2121_v32 = vpop.permute.xlu0 %2120 }
 0x222   : > { %v2233_v43 = vsel %vm1656_vm12, %v5760_v57, %v2121_v32  ;;  %v2201_v59 = vpop.permute.xlu1 %2200  ;;  %v3205_v57 = vsel %vm1656_vm12, %v4735_v41, %v6027_v2 }
 0x223   : > { %v2265_v39 = vsel %vm1689_vm13, %v2233_v43, %v2201_v59  ;;  %v3237_v44 = vsel %vm1689_vm13, %v3205_v57, %v3173_v18 }
 0x224   : > { %4376 = vmatprep.mubr.msk.bf16.mxu0 %vm2301_vm14, %v2265_v39 }
 0x225   : > { %4441 = vmatmul.mubr.msk.bf16.gmra.mrb[8].mxu1 %vm2301_vm14, %v3233_v50  ;;  %v2123_v3 = vpop.permute.xlu0 %2122 }
 0x226   : > { %4444 = vmatprep.mubr.msk.bf16.mxu1 %vm2301_vm14, %v6003_v48  ;;  %v3179_v51 = vpop.permute.xlu1 %3178  ;;  %v2235_v4 = vsel %vm1656_vm12, %v5779_v46, %v2123_v3 }
 0x227   : > { %v3243_v22 = vsel %vm1689_vm13, %v3211_v38, %v3179_v51 }
 0x229   : > { %v3101_v28 = vpop.permute.xlu0 %3100 }
 0x22a   : > { %v3181_v63 = vpop.permute.xlu1 %3180  ;;  %v3213_v8 = vsel %vm1656_vm12, %v5796_v61, %v3101_v28 }
 0x22b   : > { %v3245_v10 = vsel %vm1689_vm13, %v3213_v8, %v3181_v63  ;;  %v6146_v63 = vld [vmem:[%s6319_s4] ss:$0 sm:$0xff] }
 0x22d   : > { %4445 = vmatmul.mubr.msk.bf16.gmra.mrb[12].mxu1 %vm2301_vm14, %v3237_v44  ;;  %v2203_v48 = vpop.permute.xlu0 %2202 }
 0x22e   : > { %v2267_v35 = vsel %vm1689_vm13, %v2235_v4, %v2203_v48  ;;  %4448 = vmatprep.mubr.msk.bf16.mxu1 %vm2301_vm14, %v3239_v27  ;;  %v3103_v42 = vpop.permute.xlu1 %3102 }
 0x22f   : > { %4377 = vmatmul.mubr.msk.bf16.gmra.mrb[52].mxu0 %vm2301_vm14, %v2267_v35  ;;  %v3215_v18 = vsel %vm1656_vm12, %v5821_v13, %v3103_v42 }
 0x231   : > { %v2125_v2 = vpop.permute.xlu0 %2124 }
 0x232   : > { %v2237_v21 = vsel %vm1656_vm12, %v5832_v24, %v2125_v2  ;;  %v2205_v33 = vpop.permute.xlu1 %2204 }
 0x233   : > { %v2269_v46 = vsel %vm1689_vm13, %v2237_v21, %v2205_v33 }
 0x234   : > { %4380 = vmatprep.mubr.msk.bf16.mxu0 %vm2301_vm14, %v2269_v46 }
 0x235   : > { %4449 = vmatmul.mubr.msk.bf16.gmra.mrb[16].mxu1 %vm2301_vm14, %v3241_v29  ;;  %v2127_v17 = vpop.permute.xlu0 %2126 }
 0x236   : > { %4452 = vmatprep.mubr.msk.bf16.mxu1 %vm2301_vm14, %v3243_v22  ;;  %v3183_v24 = vpop.permute.xlu1 %3182  ;;  %v2239_v40 = vsel %vm1656_vm12, %v5858_v30, %v2127_v17 }
 0x237   : > { %v3247_v36 = vsel %vm1689_vm13, %v3215_v18, %v3183_v24 }
 0x239   : > { %v2207_v26 = vpop.permute.xlu0 %2206 }
 0x23a   : > { %v2271_v47 = vsel %vm1689_vm13, %v2239_v40, %v2207_v26  ;;  %v3185_v16 = vpop.permute.xlu1 %3184 }
 0x23b   : > { %4381 = vmatmul.mubr.msk.bf16.gmra.mrb[56].mxu0 %vm2301_vm14, %v2271_v47 }
 0x23d   : > { %4453 = vmatmul.mubr.msk.bf16.gmra.mrb[20].mxu1 %vm2301_vm14, %v3245_v10  ;;  %v2131_v6 = vpop.permute.xlu0 %2130 }
 0x23e   : > { %4456 = vmatprep.mubr.msk.bf16.mxu1 %vm2301_vm14, %v3247_v36  ;;  %v3107_v30 = vpop.permute.xlu1 %3106 }
 0x23f   : > { %v3219_v13 = vsel %vm1656_vm12, %v5901_v31, %v3107_v30  ;;  %v2243_v31 = vsel %vm1656_vm12, %v5896_v34, %v2131_v6 }
 0x241   : > { %v3105_v7 = vpop.permute.xlu0 %3104 }
 0x242   : > { %v3217_v45 = vsel %vm1656_vm12, %v5910_v58, %v3105_v7  ;;  %v2209_v61 = vpop.permute.xlu1 %2208 }
 0x243   : > { %v3249_v49 = vsel %vm1689_vm13, %v3217_v45, %v3185_v16 }
 0x245   : > { %4457 = vmatmul.mubr.msk.bf16.gmra.mrb[24].mxu1 %vm2301_vm14, %v3249_v49  ;;  %v3109_v56 = vpop.permute.xlu0 %3108 }
 0x246   : > { %v3187_v54 = vpop.permute.xlu1 %3186  ;;  %v3221_v62 = vsel %vm1656_vm12, %v5926_v60, %v3109_v56 }
 0x247   : > { %v3251_v12 = vsel %vm1689_vm13, %v3219_v13, %v3187_v54 }
 0x248   : > { %4460 = vmatprep.mubr.msk.bf16.mxu1 %vm2301_vm14, %v3251_v12 }
 0x249   : > { %v2129_v15 = vpop.permute.xlu0 %2128 }
 0x24a   : > { %v2241_v58 = vsel %vm1656_vm12, %v5949_v55, %v2129_v15  ;;  %v3189_v53 = vpop.permute.xlu1 %3188 }
 0x24b   : > { %v2273_v23 = vsel %vm1689_vm13, %v2241_v58, %v2209_v61  ;;  %v3253_v1 = vsel %vm1689_vm13, %v3221_v62, %v3189_v53 }
 0x24c   : > { %4384 = vmatprep.mubr.msk.bf16.mxu0 %vm2301_vm14, %v2273_v23 }
 0x24d   : > { %v2211_v9 = vpop.permute.xlu0 %2210  ;;  %4461 = vmatmul.mubr.msk.bf16.gmra.mrb[28].mxu1 %vm2301_vm14, %v3253_v1 }
 0x24e   : > { %v2275_v0 = vsel %vm1689_vm13, %v2243_v31, %v2211_v9 }
 0x24f   : > { %4385 = vmatmul.mubr.msk.bf16.gmra.mrb[60].mxu0 %vm2301_vm14, %v2275_v0 }
 0x26d   : > { %v4358_v60 = vpop.f32.mrb[32].mxu0 }
 0x26e   : > { %v2368_v55 = vpop.f32.mrb[33].mxu0 }
 0x26f   : > { %v4359_v52 = vpop.f32.mrb[34].mxu0 }
 0x270   : > { %v2371_v37 = vpop.f32.mrb[35].mxu0 }
 0x285   : > { %v4362_v25 = vpop.f32.mrb[36].mxu0 }
 0x286   : > { %v2384_v19 = vpop.f32.mrb[37].mxu0 }
 0x287   : > { %v4363_v20 = vpop.f32.mrb[38].mxu0 }
 0x288   : > { %v2387_v14 = vpop.f32.mrb[39].mxu0 }
 0x2a3   : > { %v4366_v32 = vpop.f32.mrb[40].mxu0 }
 0x2a4   : > { %v2400_v43 = vpop.f32.mrb[41].mxu0 }
 0x2a5   : > { %v4367_v34 = vpop.f32.mrb[42].mxu0 }
 0x2a6   : > { %v2403_v59 = vpop.f32.mrb[43].mxu0 }
 0x2e2   : > { %v6134_v39 = vpop.f32.mrb[44].mxu0 }
 0x2e3   : > { %v6136_v50 = vpop.f32.mrb[45].mxu0 }
 0x2e4   : > { %v6138_v3 = vpop.f32.mrb[46].mxu0 }
 0x2e5   : > { %v6140_v51 = vpop.f32.mrb[47].mxu0 }
 0x2e8   : > { %v4434_v28 = vpop.f32.mrb[0].mxu1 }
 0x2e9   : > { %v4464_v41 = vadd.f32 %v4434_v28, %v4358_v60  ;;  %v3345_v57 = vpop.f32.mrb[1].mxu1 }
 0x2ea   : > { %v4465_v44 = vadd.f32 %v3345_v57, %v2368_v55  ;;  %v4435_v11 = vpop.f32.mrb[2].mxu1 }
 0x2eb   : > { %v3513_v27 = vadd.f32 %v4464_v41, %v6146_v63  ;;  %v4466_v4 = vadd.f32 %v4435_v11, %v4359_v52  ;;  %v3348_v48 = vpop.f32.mrb[3].mxu1 }
 0x2ec   : > { %v3511_v35 = vadd.f32 %v4465_v44, %v6146_v63  ;;  %v4467_v42 = vadd.f32 %v3348_v48, %v2371_v37 }
 0x2ed   : > { %v4211_v2 = vpack.c.bf16 %v3513_v27, %v3513_v27  ;;  %v3514_v21 = vadd.f32 %v4466_v4, %v6146_v63 }
 0x2ee   : > { %v4209_v33 = vpack.c.bf16 %v3511_v35, %v3511_v35  ;;  %v3512_v5 = vadd.f32 %v4467_v42, %v6146_v63 }
 0x2ef   : > { %3674 = vst.msk [vmem:[%s6154_s12 + $0x8] sm:$0xf] %vm243_vm1, %v4211_v2  ;;  %v4212_v46 = vpack.c.bf16 %v3514_v21, %v3514_v21 }
 0x2f0   : > { %3672 = vst.msk [vmem:[%s6154_s12] sm:$0xf] %vm243_vm1, %v4209_v33  ;;  %v4210_v29 = vpack.c.bf16 %v3512_v5, %v3512_v5  ;;  %v4438_v38 = vpop.f32.mrb[4].mxu1 }
 0x2f1   : > { %3675 = vst.msk [vmem:[%s6154_s12 + $0xc] sm:$0xf] %vm243_vm1, %v4212_v46  ;;  %v4468_v22 = vadd.f32 %v4438_v38, %v4362_v25  ;;  %v3361_v17 = vpop.f32.mrb[5].mxu1 }
 0x2f2   : > { %3673 = vst.msk [vmem:[%s6154_s12 + $0x4] sm:$0xf] %vm243_vm1, %v4210_v29  ;;  %v4469_v24 = vadd.f32 %v3361_v17, %v2384_v19  ;;  %v6164_v40 = vpop.f32.mrb[48].mxu0  ;;  %v4439_v26 = vpop.f32.mrb[6].mxu1 }
 0x2f3   : > { %v3517_v47 = vadd.f32 %v4468_v22, %v6146_v63  ;;  %v4470_v16 = vadd.f32 %v4439_v26, %v4363_v20  ;;  %v6167_v8 = vpop.f32.mrb[49].mxu0  ;;  %v3364_v10 = vpop.f32.mrb[7].mxu1 }
 0x2f4   : > { %v3515_v18 = vadd.f32 %v4469_v24, %v6146_v63  ;;  %v4471_v36 = vadd.f32 %v3364_v10, %v2387_v14  ;;  %v4375_v6 = vpop.f32.mrb[50].mxu0 }
 0x2f5   : > { %v4215_v30 = vpack.c.bf16 %v3517_v47, %v3517_v47  ;;  %v3518_v7 = vadd.f32 %v4470_v16, %v6146_v63  ;;  %v2435_v45 = vpop.f32.mrb[51].mxu0 }
 0x2f6   : > { %v4213_v61 = vpack.c.bf16 %v3515_v18, %v3515_v18  ;;  %v3516_v49 = vadd.f32 %v4471_v36, %v6146_v63 }
 0x2f7   : > { %3678 = vst.msk [vmem:[%s6154_s12 + $0x18] sm:$0xf] %vm243_vm1, %v4215_v30  ;;  %v4216_v56 = vpack.c.bf16 %v3518_v7, %v3518_v7 }
 0x2f8   : > { %3676 = vst.msk [vmem:[%s6154_s12 + $0x10] sm:$0xf] %vm243_vm1, %v4213_v61  ;;  %v4214_v13 = vpack.c.bf16 %v3516_v49, %v3516_v49  ;;  %v4442_v54 = vpop.f32.mrb[8].mxu1 }
 0x2f9   : > { %3679 = vst.msk [vmem:[%s6154_s12 + $0x1c] sm:$0xf] %vm243_vm1, %v4216_v56  ;;  %v4472_v12 = vadd.f32 %v4442_v54, %v4366_v32  ;;  %v3377_v15 = vpop.f32.mrb[9].mxu1 }
 0x2fa   : > { %3677 = vst.msk [vmem:[%s6154_s12 + $0x14] sm:$0xf] %vm243_vm1, %v4214_v13  ;;  %v4473_v62 = vadd.f32 %v3377_v15, %v2400_v43  ;;  %v4443_v58 = vpop.f32.mrb[10].mxu1 }
 0x2fb   : > { %v3521_v53 = vadd.f32 %v4472_v12, %v6146_v63  ;;  %v4474_v23 = vadd.f32 %v4443_v58, %v4367_v34  ;;  %v3380_v1 = vpop.f32.mrb[11].mxu1 }
 0x2fc   : > { %v3519_v31 = vadd.f32 %v4473_v62, %v6146_v63  ;;  %v4475_v9 = vadd.f32 %v3380_v1, %v2403_v59 }
 0x2fd   : > { %v4219_v0 = vpack.c.bf16 %v3521_v53, %v3521_v53  ;;  %v3522_v60 = vadd.f32 %v4474_v23, %v6146_v63 }
 0x2fe   : > { %v4217_v55 = vpack.c.bf16 %v3519_v31, %v3519_v31  ;;  %v3520_v52 = vadd.f32 %v4475_v9, %v6146_v63 }
 0x2ff   : > { %3682 = vst.msk [vmem:[%s6154_s12 + $0x28] sm:$0xf] %vm243_vm1, %v4219_v0  ;;  %v4220_v37 = vpack.c.bf16 %v3522_v60, %v3522_v60 }
 0x300   : > { %3680 = vst.msk [vmem:[%s6154_s12 + $0x20] sm:$0xf] %vm243_vm1, %v4217_v55  ;;  %v4218_v25 = vpack.c.bf16 %v3520_v52, %v3520_v52  ;;  %v4446_v19 = vpop.f32.mrb[12].mxu1 }
 0x301   : > { %3683 = vst.msk [vmem:[%s6154_s12 + $0x2c] sm:$0xf] %vm243_vm1, %v4220_v37  ;;  %v4476_v20 = vadd.f32 %v4446_v19, %v6134_v39  ;;  %v3393_v14 = vpop.f32.mrb[13].mxu1 }
 0x302   : > { %3681 = vst.msk [vmem:[%s6154_s12 + $0x24] sm:$0xf] %vm243_vm1, %v4218_v25  ;;  %v4477_v32 = vadd.f32 %v3393_v14, %v6136_v50  ;;  %v4378_v43 = vpop.f32.mrb[52].mxu0  ;;  %v4447_v34 = vpop.f32.mrb[14].mxu1 }
 0x303   : > { %v3525_v59 = vadd.f32 %v4476_v20, %v6146_v63  ;;  %v4478_v28 = vadd.f32 %v4447_v34, %v6138_v3  ;;  %v2448_v41 = vpop.f32.mrb[53].mxu0  ;;  %v3396_v57 = vpop.f32.mrb[15].mxu1 }
 0x304   : > { %v3523_v44 = vadd.f32 %v4477_v32, %v6146_v63  ;;  %v4479_v39 = vadd.f32 %v3396_v57, %v6140_v51  ;;  %v4379_v11 = vpop.f32.mrb[54].mxu0 }
 0x305   : > { %v4223_v27 = vpack.c.bf16 %v3525_v59, %v3525_v59  ;;  %v3526_v4 = vadd.f32 %v4478_v28, %v6146_v63  ;;  %v2451_v50 = vpop.f32.mrb[55].mxu0 }
 0x306   : > { %v4221_v48 = vpack.c.bf16 %v3523_v44, %v3523_v44  ;;  %v3524_v35 = vadd.f32 %v4479_v39, %v6146_v63 }
 0x307   : > { %3686 = vst.msk [vmem:[%s6154_s12 + $0x38] sm:$0xf] %vm243_vm1, %v4223_v27  ;;  %v4224_v42 = vpack.c.bf16 %v3526_v4, %v3526_v4 }
 0x308   : > { %3684 = vst.msk [vmem:[%s6154_s12 + $0x30] sm:$0xf] %vm243_vm1, %v4221_v48  ;;  %v4222_v3 = vpack.c.bf16 %v3524_v35, %v3524_v35  ;;  %v4450_v2 = vpop.f32.mrb[16].mxu1 }
 0x309   : > { %3687 = vst.msk [vmem:[%s6154_s12 + $0x3c] sm:$0xf] %vm243_vm1, %v4224_v42  ;;  %v4480_v51 = vadd.f32 %v4450_v2, %v6164_v40  ;;  %v3409_v21 = vpop.f32.mrb[17].mxu1 }
 0x30a   : > { %3685 = vst.msk [vmem:[%s6154_s12 + $0x34] sm:$0xf] %vm243_vm1, %v4222_v3  ;;  %v4481_v33 = vadd.f32 %v3409_v21, %v6167_v8  ;;  %v4451_v5 = vpop.f32.mrb[18].mxu1 }
 0x30b   : > { %v3529_v46 = vadd.f32 %v4480_v51, %v6146_v63  ;;  %v4482_v29 = vadd.f32 %v4451_v5, %v4375_v6  ;;  %v3412_v38 = vpop.f32.mrb[19].mxu1 }
 0x30c   : > { %v3527_v22 = vadd.f32 %v4481_v33, %v6146_v63  ;;  %v4483_v17 = vadd.f32 %v3412_v38, %v2435_v45 }
 0x30d   : > { %v4227_v24 = vpack.c.bf16 %v3529_v46, %v3529_v46  ;;  %v3530_v26 = vadd.f32 %v4482_v29, %v6146_v63 }
 0x30e   : > { %v4225_v40 = vpack.c.bf16 %v3527_v22, %v3527_v22  ;;  %v3528_v47 = vadd.f32 %v4483_v17, %v6146_v63  ;;  %v4382_v16 = vpop.f32.mrb[56].mxu0 }
 0x30f   : > { %3690 = vst.msk [vmem:[%s6154_s12 + $0x48] sm:$0xf] %vm243_vm1, %v4227_v24  ;;  %v4228_v8 = vpack.c.bf16 %v3530_v26, %v3530_v26  ;;  %v2464_v10 = vpop.f32.mrb[57].mxu0 }
 0x310   : > { %3688 = vst.msk [vmem:[%s6154_s12 + $0x40] sm:$0xf] %vm243_vm1, %v4225_v40  ;;  %v4226_v18 = vpack.c.bf16 %v3528_v47, %v3528_v47  ;;  %v4383_v36 = vpop.f32.mrb[58].mxu0  ;;  %v4454_v6 = vpop.f32.mrb[20].mxu1 }
 0x311   : > { %3691 = vst.msk [vmem:[%s6154_s12 + $0x4c] sm:$0xf] %vm243_vm1, %v4228_v8  ;;  %v4484_v30 = vadd.f32 %v4454_v6, %v4378_v43  ;;  %v2467_v7 = vpop.f32.mrb[59].mxu0  ;;  %v3425_v45 = vpop.f32.mrb[21].mxu1 }
 0x312   : > { %3689 = vst.msk [vmem:[%s6154_s12 + $0x44] sm:$0xf] %vm243_vm1, %v4226_v18  ;;  %v4485_v61 = vadd.f32 %v3425_v45, %v2448_v41  ;;  %v4455_v49 = vpop.f32.mrb[22].mxu1 }
 0x313   : > { %v3533_v56 = vadd.f32 %v4484_v30, %v6146_v63  ;;  %v4486_v13 = vadd.f32 %v4455_v49, %v4379_v11  ;;  %v3428_v54 = vpop.f32.mrb[23].mxu1 }
 0x314   : > { %v3531_v12 = vadd.f32 %v4485_v61, %v6146_v63  ;;  %v4487_v15 = vadd.f32 %v3428_v54, %v2451_v50 }
 0x315   : > { %v4231_v62 = vpack.c.bf16 %v3533_v56, %v3533_v56  ;;  %v3534_v58 = vadd.f32 %v4486_v13, %v6146_v63 }
 0x316   : > { %v4229_v53 = vpack.c.bf16 %v3531_v12, %v3531_v12  ;;  %v3532_v23 = vadd.f32 %v4487_v15, %v6146_v63 }
 0x317   : > { %3694 = vst.msk [vmem:[%s6154_s12 + $0x58] sm:$0xf] %vm243_vm1, %v4231_v62  ;;  %v4232_v1 = vpack.c.bf16 %v3534_v58, %v3534_v58 }
 0x318   : > { %3692 = vst.msk [vmem:[%s6154_s12 + $0x50] sm:$0xf] %vm243_vm1, %v4229_v53  ;;  %v4230_v31 = vpack.c.bf16 %v3532_v23, %v3532_v23  ;;  %v4458_v9 = vpop.f32.mrb[24].mxu1 }
 0x319   : > { %3695 = vst.msk [vmem:[%s6154_s12 + $0x5c] sm:$0xf] %vm243_vm1, %v4232_v1  ;;  %v4488_v0 = vadd.f32 %v4458_v9, %v4382_v16  ;;  %v3441_v60 = vpop.f32.mrb[25].mxu1 }
 0x31a   : > { %3693 = vst.msk [vmem:[%s6154_s12 + $0x54] sm:$0xf] %vm243_vm1, %v4230_v31  ;;  %v4489_v55 = vadd.f32 %v3441_v60, %v2464_v10  ;;  %v4459_v52 = vpop.f32.mrb[26].mxu1 }
 0x31b   : > { %v3537_v37 = vadd.f32 %v4488_v0, %v6146_v63  ;;  %v4490_v25 = vadd.f32 %v4459_v52, %v4383_v36  ;;  %v3444_v19 = vpop.f32.mrb[27].mxu1 }
 0x31c   : > { %v3535_v20 = vadd.f32 %v4489_v55, %v6146_v63  ;;  %v4491_v14 = vadd.f32 %v3444_v19, %v2467_v7 }
 0x31d   : > { %v4235_v32 = vpack.c.bf16 %v3537_v37, %v3537_v37  ;;  %v3538_v43 = vadd.f32 %v4490_v25, %v6146_v63 }
 0x31e   : > { %v4233_v34 = vpack.c.bf16 %v3535_v20, %v3535_v20  ;;  %v3536_v59 = vadd.f32 %v4491_v14, %v6146_v63 }
 0x31f   : > { %3698 = vst.msk [vmem:[%s6154_s12 + $0x68] sm:$0xf] %vm243_vm1, %v4235_v32  ;;  %v4236_v28 = vpack.c.bf16 %v3538_v43, %v3538_v43 }
 0x320   : > { %3696 = vst.msk [vmem:[%s6154_s12 + $0x60] sm:$0xf] %vm243_vm1, %v4233_v34  ;;  %v4234_v41 = vpack.c.bf16 %v3536_v59, %v3536_v59  ;;  %v4462_v57 = vpop.f32.mrb[28].mxu1 }
 0x321   : > { %3699 = vst.msk [vmem:[%s6154_s12 + $0x6c] sm:$0xf] %vm243_vm1, %v4236_v28  ;;  %v3457_v44 = vpop.f32.mrb[29].mxu1 }
 0x322   : > { %3697 = vst.msk [vmem:[%s6154_s12 + $0x64] sm:$0xf] %vm243_vm1, %v4234_v41  ;;  %v4386_v39 = vpop.f32.mrb[60].mxu0  ;;  %v4463_v11 = vpop.f32.mrb[30].mxu1 }
 0x323   : > { %v4492_v27 = vadd.f32 %v4462_v57, %v4386_v39  ;;  %v2480_v4 = vpop.f32.mrb[61].mxu0  ;;  %v3460_v50 = vpop.f32.mrb[31].mxu1 }
 0x324   : > { %v4493_v48 = vadd.f32 %v3457_v44, %v2480_v4  ;;  %v4387_v35 = vpop.f32.mrb[62].mxu0 }
 0x325   : > { %v3541_v42 = vadd.f32 %v4492_v27, %v6146_v63  ;;  %v4494_v3 = vadd.f32 %v4463_v11, %v4387_v35  ;;  %v2483_v2 = vpop.f32.mrb[63].mxu0 }
 0x326   : > { %v3539_v51 = vadd.f32 %v4493_v48, %v6146_v63  ;;  %v4495_v21 = vadd.f32 %v3460_v50, %v2483_v2 }
 0x327   : > { %v4239_v33 = vpack.c.bf16 %v3541_v42, %v3541_v42  ;;  %v3542_v5 = vadd.f32 %v4494_v3, %v6146_v63 }
 0x328   : > { %v4237_v46 = vpack.c.bf16 %v3539_v51, %v3539_v51  ;;  %v3540_v29 = vadd.f32 %v4495_v21, %v6146_v63 }
 0x329   : > { %3702 = vst.msk [vmem:[%s6154_s12 + $0x78] sm:$0xf] %vm243_vm1, %v4239_v33  ;;  %v4240_v38 = vpack.c.bf16 %v3542_v5, %v3542_v5 }
 0x32a   : > { %3700 = vst.msk [vmem:[%s6154_s12 + $0x70] sm:$0xf] %vm243_vm1, %v4237_v46  ;;  %v4238_v22 = vpack.c.bf16 %v3540_v29, %v3540_v29 }
 0x32b   : > { %3703 = vst.msk [vmem:[%s6154_s12 + $0x7c] sm:$0xf] %vm243_vm1, %v4240_v38 }
 0x32c   : > { %3701 = vst.msk [vmem:[%s6154_s12 + $0x74] sm:$0xf] %vm243_vm1, %v4238_v22 }
 0x32d   : > { %4749 = shalt.err (!%p4746_p5)
}
 0x32e   : > { %s4750_s9 = scalar_lea.hbm %s6257_s25, 2048  ;;  %s4754_s10 = scalar_lea.hbm %s6320_s5, 4096 }
 0x32f   : > { %p4751_p6 = scmp.ne.s32.totalorder %s6257_s25, %s4750_s9  ;;  %p4755_p10 = scmp.lt.u32.totalorder %s6257_s25, %s6320_s5 }
 0x330   : > { %p4756_p11 = scmp.lt.u32.totalorder %s4754_s10, %s4750_s9  ;;  %p4758_p13 = scmp.lt.u32.totalorder %s4750_s9, %s6257_s25 }
 0x331   : > { %p4752_p7 = pnand %p4751_p6, %p4892_p4 }
 0x332   : > { %p4757_p12 = por %p4756_p11, %p4755_p10 }
 0x333   : > { %p4753_p9 = pneg %p4752_p7 }
 0x334   : > { %p4759_p0 = por %p4758_p13, %p4757_p12 }
 0x336   : > { %p4760_p1 = pnand %p4759_p0, %p4753_p9 }
 0x338   : > { %4763 = shalt.err (!%p4760_p1)
}
 0x339   : > { %s4820_s13 = smov 64   ;;  %s4821_s17 = smov 4  }
 0x33a   : > { %4529 = dma.vmem_to_hbm [thread:$0]  (%p4892_p4), %s6259_s16, 2048, %s6257_s25, %s6269_s21, %s4820_s13, %s4820_s13, %s4821_s17  }
 0x33b PF: > { %p4535_p2 = scmp.ge.s32.totalorder %s4814_s23, 2  ;;  %s3736_s24 = sand.u32 1, %s4794_s18  }
 0x33c   : > { %s3737_s27 = scalar_lea.sflag [#allocation4], %s3736_s24 }
 0x33d   : > { %p4532_p3 = pnand %p4535_p2, %p4899_p8 }
 0x33f   : > { %4789 = dma.done.wait (!%p4532_p3), %s3737_s27, 2048  }
 0x340   : > { %4791 = vsyncadd (!%p4532_p3), %s3737_s27, 4294965248  ;;  %s18_s23 = sadd.s32 1, %s4814_s23   ;;  %s6329_s18 = smov %s4798_s19 }
 0x341   : > { %p15_p5 = scmp.ge.s32.totalorder %s18_s23, 4   ;;  %s6330_s19 = smov %s4802_s20 }
 0x342   : > { %s6331_s20 = smov %s4905_s6  ;;  %s6332_s21 = smov %s4810_s22 }
 0x343   : > { %s6333_s22 = smov %s6335_s26  ;;  %17 = sbr.rel (!%p15_p5) target bundleno = 4 (0x4), region = 85 }
 0x34a   :  { %3742 = vsyncpa [#allocation4], 1 }
 0x34b   :  { %3744 = vsyncpa [#allocation4 + $0x1], 1 }

// kernel: tpu_custom_call.1
= control target key start
LH: loop header
LB: loop body
LE: loop exit
PB: predicated region body
PF: predicated region fallthrough
CT: control target
= control target key end

     0   :  { %10 = vsyncpa [#allocation4], 0  ;;  %s6315_s0 = inlined_call_operand.vmem [shape: bf16[2,16,16,8], index: 0, kind: input, shape index: {}]   ;;  %s6316_s1 = inlined_call_operand.vmem [shape: bf16[8,16], index: 1, kind: input, shape index: {}]   ;;  %s6317_s2 = inlined_call_operand.vmem [shape: f32[1,16], index: 2, kind: input, shape index: {}]   ;;  %s6318_s3 = inlined_call_operand.vmem [shape: bf16[3,48,16], index: 3, kind: input, shape index: {}]   ;;  %s6319_s4 = inlined_call_operand.vmem [shape: f32[1,16], index: 4, kind: input, shape index: {}]   ;;  %s6320_s5 = inlined_call_operand.hbm [shape: bf16[2,16,16,16], index: 5, kind: output, shape index: {}]  }
   0x1   :  { %12 = vsyncpa [#allocation4 + $0x1], 0  ;;  %s4852_s18 = smov 0   ;;  %s4854_s19 = smov 0  }
   0x2   :  { %s4856_s20 = smov 0   ;;  %s4858_s21 = smov 0  }
   0x3   :  { %s4860_s22 = smov 0   ;;  %s4862_s23 = smov 0  }
   0x4 LB: > { %s3804_s24 = sadd.s32 4294967295, %s4814_s23   ;;  %s3805_s25 = sadd.s32 4294967294, %s4814_s23   ;;  %s4814_s23 = sphi %s4862_s23, %s18_s23   ;;  %s4810_s22 = sphi %s4860_s22, %s6333_s22   ;;  %s4806_s21 = sphi %s4858_s21, %s6332_s21   ;;  %s4802_s20 = sphi %s4856_s20, %s6331_s20   ;;  %s4798_s19 = sphi %s4854_s19, %s6330_s19   ;;  %s4794_s18 = sphi %s4852_s18, %s6329_s18  }
   0x5   : > { %s30_s26 = sadd.s32 1, %s4810_s22  ;;  %s149_s27 = sadd.s32 1, %s4802_s20 }
   0x6   : > { %p32_p0 = scmp.ge.s32.totalorder %s30_s26, 2  ;;  %p159_p1 = scmp.ne.s32.totalorder %s4802_s20, %s4798_s19 }
   0x7   : > { %p160_p2 = scmp.eq.s32.totalorder %s3804_s24, 1  ;;  %p165_p3 = scmp.ne.s32.totalorder %s4798_s19, %s4794_s18 }
   0x8   : > { %s6335_s26 = smov (%p32_p0, %s30_s26), 0  ;;  %p166_p5 = scmp.eq.s32.totalorder %s3805_s25, 1 }
   0x9   : > { %p4892_p4 = por %p160_p2, %p159_p1  ;;  %s144_s29 = ssub.s32 %s4810_s22, %s6335_s26 }
   0xa   : > { %p3808_p6 = scmp.ge.s32.totalorder %s4814_s23, 1  ;;  %p147_p7 = scmp.eq.s32.totalorder %s144_s29, 0 }
   0xb   : > { %p4899_p8 = por %p166_p5, %p165_p3  ;;  %p204_p9 = scmp.lt.s32.totalorder %s4814_s23, 3 }
   0xc   : > { %s4905_s6 = scalar_select %p147_p7, %s4802_s20, %s149_s27  }
   0xd   : > { %p205_p10 = pnand %p3808_p6, %p204_p9 }
   0xe   : > { %v331_v0 = vld [vmem:[%s6316_s1] sm:$0xf] (!%p205_p10)  ;;  %vm468_vm0 = vcmask (!%p205_p10), 1043456   ;;  %p232_p11 = scmp.lt.s32.totalorder (!%p205_p10), %s4806_s21, 1  ;;  %vm243_vm1 = vcmask (!%p205_p10), 125952   ;;  %v4816_v2 = vmov (!%p205_p10), 0  }
   0xf   : > { %208 = sbr.rel (%p205_p10) target bundleno = 827 (0x33b), region = 40  ;;  %4528 = vmatprep.subr.msk.bf16.mxu0 (!%p205_p10), %vm468_vm0, %v331_v0  ;;  %v470_v1 = vsel (!%p205_p10), %vm468_vm0, %v331_v0, 0  ;;  %251 = vst.msk [vmem:[#allocation2 + $0x18] sm:$0xf] (!%p205_p10), %vm243_vm1, %v4816_v2  ;;  %244 = vst.msk [vmem:[#allocation2] sm:$0xf] (!%p205_p10), %vm243_vm1, %v4816_v2 }
  0x10   : > { %4317 = vmatpush3.bf16.msra.mxu0 (!%p205_p10), %v470_v1  ;;  %245 = vst.msk [vmem:[#allocation2 + $0x4] sm:$0xf] (!%p205_p10), %vm243_vm1, %v4816_v2  ;;  %248 = vst.msk [vmem:[#allocation2 + $0xc] sm:$0xf] (!%p205_p10), %vm243_vm1, %v4816_v2  ;;  %vm419_vm2 = vcmask (!%p205_p10), 64512   ;;  %vm246_vm3 = vcmask (!%p205_p10), 122880  }
  0x11   : > { %249 = vst.msk [vmem:[#allocation2 + $0x10] sm:$0xf] (!%p205_p10), %vm243_vm1, %v4816_v2  ;;  %252 = vst.msk [vmem:[#allocation2 + $0x1c] sm:$0xf] (!%p205_p10), %vm243_vm1, %v4816_v2  ;;  %vm1350_vm4 = vsmask.f32 (!%p205_p10), 7424 }
  0x12   : > { %254 = vst.msk [vmem:[#allocation2 + $0x24] sm:$0xf] (!%p205_p10), %vm243_vm1, %v4816_v2  ;;  %255 = vst.msk [vmem:[#allocation2 + $0x28] sm:$0xf] (!%p205_p10), %vm243_vm1, %v4816_v2  ;;  %vm1575_vm5 = vcmask (!%p205_p10), 1046528   ;;  %s4817_s14 = smov (!%p205_p10), 16  }
  0x13   : > { %257 = vst.msk [vmem:[#allocation2 + $0x30] sm:$0xf] (!%p205_p10), %vm243_vm1, %v4816_v2  ;;  %258 = vst.msk [vmem:[#allocation2 + $0x34] sm:$0xf] (!%p205_p10), %vm243_vm1, %v4816_v2  ;;  %s4818_s15 = smov (!%p205_p10), 32   ;;  %vm1656_vm12 = vcmask (!%p205_p10), 130048  }
  0x14   : > { %260 = vst.msk [vmem:[#allocation2 + $0x3c] sm:$0xf] (!%p205_p10), %vm243_vm1, %v4816_v2  ;;  %261 = vst.msk [vmem:[#allocation2 + $0x40] sm:$0xf] (!%p205_p10), %vm243_vm1, %v4816_v2  ;;  %v5067_v31 = vld [vmem:[%s6317_s2] ss:$0 sm:$0xff] (!%p205_p10) }
  0x15   : > { %263 = vst.msk [vmem:[#allocation2 + $0x48] sm:$0xf] (!%p205_p10), %vm243_vm1, %v4816_v2  ;;  %264 = vst.msk [vmem:[#allocation2 + $0x4c] sm:$0xf] (!%p205_p10), %vm243_vm1, %v4816_v2  ;;  %vm1054_vm6 = vsmask.f32 (!%p205_p10), 7938 }
  0x16   : > { %s4912_s9 = scalar_select %p232_p11, %s4806_s21, 1  ;;  %266 = vst.msk [vmem:[#allocation2 + $0x54] sm:$0xf] %vm243_vm1, %v4816_v2  ;;  %267 = vst.msk [vmem:[#allocation2 + $0x58] sm:$0xf] %vm243_vm1, %v4816_v2  ;;  %vm1689_vm13 = vcmask 261120  }
  0x17   : > { %269 = vst.msk [vmem:[#allocation2 + $0x60] sm:$0xf] %vm243_vm1, %v4816_v2  ;;  %270 = vst.msk [vmem:[#allocation2 + $0x64] sm:$0xf] %vm243_vm1, %v4816_v2  ;;  %v4605_v19 = vld [vmem:[#allocation2] sm:$0xff]   ;;  %vm2301_vm14 = vcmask 392192  }
  0x18   : > { %272 = vst.msk [vmem:[#allocation2 + $0x6c] sm:$0xf] %vm243_vm1, %v4816_v2  ;;  %273 = vst.msk [vmem:[#allocation2 + $0x70] sm:$0xf] %vm243_vm1, %v4816_v2  ;;  %s4176_s10 = sshll.u32 %s4912_s9, 7  ;;  %v1354_v21 = vshll.u32 %v4605_v19, 16 }
  0x19   : > { %275 = vst.msk [vmem:[#allocation2 + $0x78] sm:$0xf] %vm243_vm1, %v4816_v2  ;;  %276 = vst.msk [vmem:[#allocation2 + $0x7c] sm:$0xf] %vm243_vm1, %v4816_v2  ;;  %s4990_s13 = scalar_lea.vmem %s6315_s0, %s4176_s10  ;;  %v1352_v22 = vshrl.u32 %v4605_v19, 16  ;;  %v1576_v27 = vrot.slane %v4605_v19, 1 }
  0x1a   : > { %278 = vst.msk [vmem:[#allocation2 + $0x84] sm:$0xf] %vm243_vm1, %v4816_v2  ;;  %279 = vst.msk [vmem:[#allocation2 + $0x88] sm:$0xf] %vm243_vm1, %v4816_v2  ;;  %v4589_v3 = vld [vmem:[%s4990_s13] sm:$0xff]   ;;  %v4590_v4 = vld [vmem:[%s4990_s13 + $0x8] sm:$0xff]  }
  0x1b   : > { %281 = vst.msk [vmem:[#allocation2 + $0x90] sm:$0xf] %vm243_vm1, %v4816_v2  ;;  %282 = vst.msk [vmem:[#allocation2 + $0x94] sm:$0xf] %vm243_vm1, %v4816_v2  ;;  %4318 = vmatprep.mubr.msk.bf16.mxu0 %vm419_vm2, %v4589_v3  ;;  %v4591_v5 = vld [vmem:[%s4990_s13 + $0x10] sm:$0xff]   ;;  %v4592_v6 = vld [vmem:[%s4990_s13 + $0x18] sm:$0xff]  }
  0x1c   : > { %284 = vst.msk [vmem:[#allocation2 + $0x9c] sm:$0xf] %vm243_vm1, %v4816_v2  ;;  %285 = vst.msk [vmem:[#allocation2 + $0xa0] sm:$0xf] %vm243_vm1, %v4816_v2  ;;  %4319 = vmatmul.mubr.msk.bf16.vlgmr.msra.gmra.mrb[0].mxu0 %vm419_vm2, %v4590_v4  ;;  %v4593_v7 = vld [vmem:[%s4990_s13 + $0x20] sm:$0xff]   ;;  %v4594_v8 = vld [vmem:[%s4990_s13 + $0x28] sm:$0xff]  }
  0x1d   : > { %287 = vst.msk [vmem:[#allocation2 + $0xa8] sm:$0xf] %vm243_vm1, %v4816_v2  ;;  %288 = vst.msk [vmem:[#allocation2 + $0xac] sm:$0xf] %vm243_vm1, %v4816_v2  ;;  %4322 = vmatprep.mubr.msk.bf16.mxu0 %vm419_vm2, %v4591_v5  ;;  %v4595_v9 = vld [vmem:[%s4990_s13 + $0x30] sm:$0xff]   ;;  %v4596_v10 = vld [vmem:[%s4990_s13 + $0x38] sm:$0xff]  }
  0x1e   : > { %290 = vst.msk [vmem:[#allocation2 + $0xb4] sm:$0xf] %vm243_vm1, %v4816_v2  ;;  %291 = vst.msk [vmem:[#allocation2 + $0xb8] sm:$0xf] %vm243_vm1, %v4816_v2  ;;  %v4597_v11 = vld [vmem:[%s4990_s13 + $0x40] sm:$0xff]   ;;  %v4598_v12 = vld [vmem:[%s4990_s13 + $0x48] sm:$0xff]  }
  0x1f   : > { %293 = vst.msk [vmem:[#allocation2 + $0xc0] sm:$0xf] %vm243_vm1, %v4816_v2  ;;  %294 = vst.msk [vmem:[#allocation2 + $0xc4] sm:$0xf] %vm243_vm1, %v4816_v2  ;;  %v4599_v13 = vld [vmem:[%s4990_s13 + $0x50] sm:$0xff]   ;;  %v4600_v14 = vld [vmem:[%s4990_s13 + $0x58] sm:$0xff]  }
  0x20   : > { %296 = vst.msk [vmem:[#allocation2 + $0xcc] sm:$0xf] %vm243_vm1, %v4816_v2  ;;  %297 = vst.msk [vmem:[#allocation2 + $0xd0] sm:$0xf] %vm243_vm1, %v4816_v2  ;;  %v4601_v15 = vld [vmem:[%s4990_s13 + $0x60] sm:$0xff]   ;;  %v4602_v16 = vld [vmem:[%s4990_s13 + $0x68] sm:$0xff]  }
  0x21   : > { %v4603_v17 = vld [vmem:[%s4990_s13 + $0x70] sm:$0xff]   ;;  %v4604_v18 = vld [vmem:[%s4990_s13 + $0x78] sm:$0xff]   ;;  %253 = vst.msk [vmem:[#allocation2 + $0x20] sm:$0x1] %vm246_vm3, %v4816_v2  ;;  %247 = vst.msk [vmem:[#allocation2 + $0x8] sm:$0x1] %vm246_vm3, %v4816_v2 }
  0x22   : > { %250 = vst.msk [vmem:[#allocation2 + $0x14] sm:$0x1] %vm246_vm3, %v4816_v2  ;;  %256 = vst.msk [vmem:[#allocation2 + $0x2c] sm:$0x1] %vm246_vm3, %v4816_v2  ;;  %v1356_v23 = vrot.slane %v1354_v21, 1  ;;  %s4241_s13 = sshll.u32 %s4806_s21, 11 }
  0x23   : > { %259 = vst.msk [vmem:[#allocation2 + $0x38] sm:$0x1] %vm246_vm3, %v4816_v2  ;;  %262 = vst.msk [vmem:[#allocation2 + $0x44] sm:$0x1] %vm246_vm3, %v4816_v2  ;;  %vm729_vm7 = vsmask.f32 256  ;;  %s6257_s25 = scalar_lea.hbm %s6320_s5, %s4241_s13 }
  0x24   : > { %4323 = vmatmul.mubr.msk.bf16.gmra.mrb[4].mxu0 %vm419_vm2, %v4592_v6  ;;  %265 = vst.msk [vmem:[#allocation2 + $0x50] sm:$0x1] %vm246_vm3, %v4816_v2  ;;  %268 = vst.msk [vmem:[#allocation2 + $0x5c] sm:$0x1] %vm246_vm3, %v4816_v2  ;;  %v1357_v25 = vor.u32 %v1356_v23, %v1352_v22  ;;  %vm730_vm8 = vsmask.f32 4368 }
  0x25   : > { %4326 = vmatprep.mubr.msk.bf16.mxu0 %vm419_vm2, %v4593_v7  ;;  %271 = vst.msk [vmem:[#allocation2 + $0x68] sm:$0x1] %vm246_vm3, %v4816_v2  ;;  %274 = vst.msk [vmem:[#allocation2 + $0x74] sm:$0x1] %vm246_vm3, %v4816_v2  ;;  %v1065_v48 = vld [vmem:[#allocation2 + $0x18] sm:$0xf] }
  0x26   : > { %277 = vst.msk [vmem:[#allocation2 + $0x80] sm:$0x1] %vm246_vm3, %v4816_v2  ;;  %280 = vst.msk [vmem:[#allocation2 + $0x8c] sm:$0x1] %vm246_vm3, %v4816_v2  ;;  %v1056_v59 = vld [vmem:[#allocation2 + $0xc] sm:$0xf] }
  0x27   : > { %283 = vst.msk [vmem:[#allocation2 + $0x98] sm:$0x1] %vm246_vm3, %v4816_v2  ;;  %286 = vst.msk [vmem:[#allocation2 + $0xa4] sm:$0x1] %vm246_vm3, %v4816_v2  ;;  %s4819_s29 = smov [#allocation3]  }
  0x28   : > { %289 = vst.msk [vmem:[#allocation2 + $0xb0] sm:$0x1] %vm246_vm3, %v4816_v2  ;;  %292 = vst.msk [vmem:[#allocation2 + $0xbc] sm:$0x1] %vm246_vm3, %v4816_v2  ;;  %v1069_v3 = vld [vmem:[#allocation2 + $0x20] sm:$0x1] }
  0x29   : > { %295 = vst.msk [vmem:[#allocation2 + $0xc8] sm:$0x1] %vm246_vm3, %v4816_v2  ;;  %298 = vst.msk [vmem:[#allocation2 + $0xd4] sm:$0x1] %vm246_vm3, %v4816_v2  ;;  %s4740_s7 = sshll.u32 %s4819_s29, 4  ;;  %s4741_s7 = int_to_ptr.vmem [resolvable:$false] %s4740_s7 }
  0x2a   : > { %v4606_v20 = vld [vmem:[#allocation2 + $0x8] ss:$0 sps:$4 sm:$0x11]   ;;  %vm5074_vm9 = vmand %vm243_vm1, %vm1054_vm6  ;;  %s4742_s8 = scalar_lea.vmem %s4741_s7, 4096 }
  0x2b   : > { %v1359_v24 = vshll.u32 %v4606_v20, 16  ;;  %v1577_v28 = vrot.slane %v4606_v20, 1  ;;  %vm5080_vm10 = vmor %vm729_vm7, %vm730_vm8 }
  0x2c   : > { %4327 = vmatmul.mubr.msk.bf16.gmra.mrb[8].mxu0 %vm419_vm2, %v4594_v8  ;;  %vm5087_vm11 = vmand %vm246_vm3, %vm729_vm7 }
  0x2d   : > { %4330 = vmatprep.mubr.msk.bf16.mxu0 %vm419_vm2, %v4595_v9  ;;  %v1361_v26 = vrot.slane %v1359_v24, 1  ;;  %v1578_v30 = vsel %vm1575_vm5, %v1576_v27, %v1577_v28  ;;  %v1079_v28 = vld [vmem:[#allocation2 + $0x30] sm:$0xf] }
  0x2e   : > { %1624 = vrot.lane.b32.xlu1 %v1578_v30, %s4818_s15 }
  0x2f   : > { %v1362_v29 = vsel %vm1350_vm4, %v1357_v25, %v1361_v26 }
  0x30   : > { %1543 = vrot.lane.b32.xlu0 %v1362_v29, %s4817_s14 }
  0x34   : > { %4331 = vmatmul.mubr.msk.bf16.gmra.mrb[12].mxu0 %vm419_vm2, %v4596_v10  ;;  %v1062_v10 = vld [vmem:[#allocation2 + $0x14] sm:$0x1] }
  0x35   : > { %4334 = vmatprep.mubr.msk.bf16.mxu0 %vm419_vm2, %v4597_v11 }
  0x3c   : > { %4335 = vmatmul.mubr.msk.bf16.gmra.mrb[16].mxu0 %vm419_vm2, %v4598_v12 }
  0x3d   : > { %4338 = vmatprep.mubr.msk.bf16.mxu0 %vm419_vm2, %v4599_v13 }
  0x44   : > { %4339 = vmatmul.mubr.msk.bf16.gmra.mrb[20].mxu0 %vm419_vm2, %v4600_v14 }
  0x45   : > { %4342 = vmatprep.mubr.msk.bf16.mxu0 %vm419_vm2, %v4601_v15 }
  0x4c   : > { %4343 = vmatmul.mubr.msk.bf16.gmra.mrb[24].mxu0 %vm419_vm2, %v4602_v16 }
  0x4d   : > { %4346 = vmatprep.mubr.msk.bf16.mxu0 %vm419_vm2, %v4603_v17 }
  0x54   : > { %4347 = vmatmul.mubr.msk.bf16.gmra.mrb[28].mxu0 %vm419_vm2, %v4604_v18 }
  0xef   : > { %v4320_v32 = vpop.f32.mrb[0].mxu0 }
  0xf0   : > { %v515_v33 = vadd.f32 %v4320_v32, %v5067_v31  ;;  %v506_v34 = vpop.f32.mrb[1].mxu0 }
  0xf1   : > { %v507_v35 = vadd.f32 %v5067_v31, %v506_v34  ;;  %v4321_v36 = vpop.f32.mrb[2].mxu0 }
  0xf2   : > { %v4179_v37 = vpack.c.bf16 %v515_v33, %v515_v33  ;;  %v518_v38 = vadd.f32 %v4321_v36, %v5067_v31  ;;  %v509_v39 = vpop.f32.mrb[3].mxu0  ;;  %v1072_v33 = vld [vmem:[#allocation2 + $0x24] sm:$0xf] }
  0xf3   : > { %v4177_v40 = vpack.c.bf16 %v507_v35, %v507_v35  ;;  %v510_v41 = vadd.f32 %v5067_v31, %v509_v39 }
  0xf4   : > { %v750_v42 = vshrl.u32 %v4179_v37, 16  ;;  %v4180_v43 = vpack.c.bf16 %v518_v38, %v518_v38  ;;  %v753_v47 = vshll.u32 %v4179_v37, 16 }
  0xf5   : > { %v733_v44 = vshrl.u32 %v4177_v40, 16  ;;  %v4178_v45 = vpack.c.bf16 %v510_v41, %v510_v41  ;;  %v736_v49 = vshll.u32 %v4177_v40, 16 }
  0xf6   : > { %v752_v46 = vrot.slane %v750_v42, 7  ;;  %v758_v50 = vshrl.u32 %v4180_v43, 16  ;;  %v761_v53 = vshll.u32 %v4180_v43, 16 }
  0xf7   : > { %v735_v52 = vrot.slane %v733_v44, 7  ;;  %v741_v54 = vshrl.u32 %v4178_v45, 16  ;;  %v744_v55 = vshll.u32 %v4178_v45, 16  ;;  %v4324_v56 = vpop.f32.mrb[4].mxu0 }
  0xf8   : > { %v755_v57 = vor.u32 %v753_v47, %v752_v46  ;;  %v756_v58 = vrot.slane %v752_v46, 4  ;;  %v760_v61 = vrot.slane %v758_v50, 7  ;;  %v531_v62 = vadd.f32 %v4324_v56, %v5067_v31  ;;  %v522_v63 = vpop.f32.mrb[5].mxu0  ;;  %v1076_v50 = vld [vmem:[#allocation2 + $0x2c] sm:$0x1] }
  0xf9   : > { %v738_v0 = vor.u32 %v736_v49, %v735_v52  ;;  %v739_v1 = vrot.slane %v735_v52, 4  ;;  %v743_v4 = vrot.slane %v741_v54, 7  ;;  %v523_v5 = vadd.f32 %v5067_v31, %v522_v63  ;;  %v4325_v6 = vpop.f32.mrb[6].mxu0 }
  0xfa   : > { %v1066_v7 = vsel %vm5074_vm9, %v755_v57, %v1065_v48  ;;  %v763_v8 = vor.u32 %v761_v53, %v760_v61  ;;  %v765_v9 = vrot.slane %v760_v61, 4  ;;  %v4183_v11 = vpack.c.bf16 %v531_v62, %v531_v62  ;;  %v525_v12 = vpop.f32.mrb[7].mxu0  ;;  %v1083_v48 = vld [vmem:[#allocation2 + $0x38] sm:$0x1] }
  0xfb   : > { %1067 = vst [vmem:[#allocation2 + $0x18] sm:$0xf] %v1066_v7  ;;  %v1057_v13 = vsel %vm5074_vm9, %v738_v0, %v1056_v59  ;;  %v746_v14 = vor.u32 %v744_v55, %v743_v4  ;;  %v748_v15 = vrot.slane %v743_v4, 4  ;;  %v4181_v16 = vpack.c.bf16 %v523_v5, %v523_v5 }
  0xfc   : > { %1058 = vst [vmem:[#allocation2 + $0xc] sm:$0xf] %v1057_v13  ;;  %v764_v17 = vsel %vm5080_vm10, %v756_v58, %v763_v8  ;;  %v1070_v18 = vsel %vm5087_vm11, %v765_v9, %v1069_v3  ;;  %v784_v19 = vshrl.u32 %v4183_v11, 16  ;;  %v787_v20 = vshll.u32 %v4183_v11, 16 }
  0xfd   : > { %1068 = vst.msk [vmem:[#allocation2 + $0x1c] sm:$0xf] %vm243_vm1, %v764_v17  ;;  %1071 = vst [vmem:[#allocation2 + $0x20] sm:$0x1] %v1070_v18  ;;  %v747_v21 = vsel %vm5080_vm10, %v739_v1, %v746_v14  ;;  %v1063_v22 = vsel %vm5087_vm11, %v748_v15, %v1062_v10  ;;  %v767_v23 = vshrl.u32 %v4181_v16, 16  ;;  %v770_v24 = vshll.u32 %v4181_v16, 16 }
  0xfe   : > { %1059 = vst.msk [vmem:[#allocation2 + $0x10] sm:$0xf] %vm243_vm1, %v747_v21  ;;  %1064 = vst [vmem:[#allocation2 + $0x14] sm:$0x1] %v1063_v22  ;;  %v786_v25 = vrot.slane %v784_v19, 7  ;;  %v534_v26 = vadd.f32 %v4325_v6, %v5067_v31  ;;  %v526_v27 = vadd.f32 %v5067_v31, %v525_v12 }
  0xff   : > { %v769_v29 = vrot.slane %v767_v23, 7  ;;  %v4328_v30 = vpop.f32.mrb[8].mxu0 }
 0x100   : > { %v789_v32 = vor.u32 %v787_v20, %v786_v25  ;;  %v4184_v34 = vpack.c.bf16 %v534_v26, %v534_v26  ;;  %v4182_v35 = vpack.c.bf16 %v526_v27, %v526_v27  ;;  %v538_v36 = vpop.f32.mrb[9].mxu0  ;;  %v790_v37 = vrot.slane %v786_v25, 4  ;;  %v1093_v26 = vld [vmem:[#allocation2 + $0x48] sm:$0xf] }
 0x101   : > { %v772_v38 = vor.u32 %v770_v24, %v769_v29  ;;  %v547_v39 = vadd.f32 %v4328_v30, %v5067_v31  ;;  %v4329_v40 = vpop.f32.mrb[10].mxu0  ;;  %v773_v46 = vrot.slane %v769_v29, 4  ;;  %v539_v52 = vadd.f32 %v5067_v31, %v538_v36  ;;  %v1086_v30 = vld [vmem:[#allocation2 + $0x3c] sm:$0xf] }
 0x102   : > { %v1080_v41 = vsel %vm5074_vm9, %v789_v32, %v1079_v28  ;;  %v792_v42 = vshrl.u32 %v4184_v34, 16  ;;  %v795_v43 = vshll.u32 %v4184_v34, 16  ;;  %v775_v44 = vshrl.u32 %v4182_v35, 16  ;;  %v541_v45 = vpop.f32.mrb[11].mxu0 }
 0x103   : > { %1081 = vst [vmem:[#allocation2 + $0x30] sm:$0xf] %v1080_v41  ;;  %v1073_v47 = vsel %vm5074_vm9, %v772_v38, %v1072_v33  ;;  %v778_v49 = vshll.u32 %v4182_v35, 16  ;;  %v4187_v57 = vpack.c.bf16 %v547_v39, %v547_v39  ;;  %v550_v58 = vadd.f32 %v4329_v40, %v5067_v31 }
 0x104   : > { %1074 = vst [vmem:[#allocation2 + $0x24] sm:$0xf] %v1073_v47  ;;  %v794_v53 = vrot.slane %v792_v42, 7  ;;  %v777_v54 = vrot.slane %v775_v44, 7  ;;  %v5114_v55 = vld [vmem:[#allocation2 + $0x18] sm:$0xff]   ;;  %v542_v59 = vadd.f32 %v5067_v31, %v541_v45  ;;  %v4185_v8 = vpack.c.bf16 %v539_v52, %v539_v52 }
 0x105   : > { %v5116_v56 = vld [vmem:[#allocation2 + $0x20] ss:$0 sps:$4 sm:$0x11]   ;;  %v4609_v1 = vld [vmem:[#allocation2 + $0x18] sm:$0xff]   ;;  %v3110_v4 = vrot.slane %v5114_v55, 1  ;;  %v5124_v7 = vld [vmem:[#allocation2 + $0xc] sm:$0xff]   ;;  %v4188_v20 = vpack.c.bf16 %v550_v58, %v550_v58 }
 0x106   : > { %v797_v61 = vor.u32 %v795_v43, %v794_v53  ;;  %v799_v62 = vrot.slane %v794_v53, 4  ;;  %v780_v63 = vor.u32 %v778_v49, %v777_v54  ;;  %v782_v0 = vrot.slane %v777_v54, 4  ;;  %v5120_v3 = vld [vmem:[#allocation2 + $0x18] sm:$0xff]   ;;  %v4610_v6 = vld [vmem:[#allocation2 + $0x20] ss:$0 sps:$4 sm:$0x11]  }
 0x107   : > { %v3111_v5 = vrot.slane %v5116_v56, 1  ;;  %v1582_v14 = vrot.slane %v4609_v1, 1  ;;  %v1583_v15 = vrot.slane %v4610_v6, 1  ;;  %v5137_v16 = vld [vmem:[#allocation2 + $0x20] ss:$0 sps:$4 sm:$0x11]   ;;  %v4186_v21 = vpack.c.bf16 %v542_v59, %v542_v59 }
 0x108   : > { %v798_v9 = vsel %vm5080_vm10, %v790_v37, %v797_v61  ;;  %v1084_v10 = vsel %vm5087_vm11, %v799_v62, %v1083_v48  ;;  %v781_v11 = vsel %vm5080_vm10, %v773_v46, %v780_v63  ;;  %v1077_v12 = vsel %vm5087_vm11, %v782_v0, %v1076_v50  ;;  %v5144_v24 = vld [vmem:[#allocation2 + $0x14] ss:$0 sps:$4 sm:$0x11]   ;;  %v5149_v38 = vld [vmem:[#allocation2 + $0xc] sm:$0xff]   ;;  %v5151_v43 = vpop.f32.mrb[12].mxu0 }
 0x109   : > { %1082 = vst.msk [vmem:[#allocation2 + $0x34] sm:$0xf] %vm243_vm1, %v798_v9  ;;  %1085 = vst [vmem:[#allocation2 + $0x38] sm:$0x1] %v1084_v10  ;;  %v3112_v13 = vsel %vm1575_vm5, %v3110_v4, %v3111_v5  ;;  %v2135_v17 = vrot.slane %v5120_v3, 1  ;;  %v1579_v18 = vrot.slane %v5124_v7, 1  ;;  %v1584_v22 = vsel %vm1575_vm5, %v1582_v14, %v1583_v15 }
 0x10a   : > { %1075 = vst.msk [vmem:[#allocation2 + $0x28] sm:$0xf] %vm243_vm1, %v781_v11  ;;  %1078 = vst [vmem:[#allocation2 + $0x2c] sm:$0x1] %v1077_v12  ;;  %3158 = vrot.lane.b32.xlu1 %v3112_v13, %s4818_s15  ;;  %v818_v19 = vshrl.u32 %v4187_v57, 16  ;;  %v2136_v23 = vrot.slane %v5137_v16, 1  ;;  %1628 = vrot.lane.b32.xlu0 %v1584_v22, %s4818_s15 }
 0x10b   : > { %v821_v25 = vshll.u32 %v4187_v57, 16  ;;  %v801_v27 = vshrl.u32 %v4185_v8, 16  ;;  %v804_v29 = vshll.u32 %v4185_v8, 16  ;;  %v1376_v32 = vshrl.u32 %v4609_v1, 16  ;;  %v1097_v48 = vld [vmem:[#allocation2 + $0x50] sm:$0x1] }
 0x10c   : > { %v820_v28 = vrot.slane %v818_v19, 7  ;;  %v1378_v33 = vshll.u32 %v4609_v1, 16  ;;  %v2137_v34 = vsel %vm1575_vm5, %v2135_v17, %v2136_v23  ;;  %v1580_v35 = vrot.slane %v5144_v24, 1  ;;  %v5154_v49 = vld [vmem:[#allocation2 + $0x14] ss:$0 sps:$4 sm:$0x11]  }
 0x10d   : > { %v803_v36 = vrot.slane %v801_v27, 7  ;;  %v1383_v37 = vshll.u32 %v4610_v6, 16  ;;  %v826_v42 = vshrl.u32 %v4188_v20, 16  ;;  %v5156_v50 = vpop.f32.mrb[13].mxu0  ;;  %v829_v57 = vshll.u32 %v4188_v20, 16 }
 0x10e   : > { %v823_v39 = vor.u32 %v821_v25, %v820_v28  ;;  %v824_v40 = vrot.slane %v820_v28, 4  ;;  %v1380_v41 = vrot.slane %v1378_v33, 1  ;;  %v1581_v44 = vsel %vm1575_vm5, %v1579_v18, %v1580_v35  ;;  %2182 = vrot.lane.b32.xlu0 %v2137_v34, %s4818_s15  ;;  %v1090_v5 = vld [vmem:[#allocation2 + $0x44] sm:$0x1] }
 0x10f   : > { %v806_v45 = vor.u32 %v804_v29, %v803_v36  ;;  %v807_v46 = vrot.slane %v803_v36, 4  ;;  %v1385_v47 = vrot.slane %v1383_v37, 1  ;;  %1626 = vrot.lane.b32.xlu1 %v1581_v44, %s4818_s15  ;;  %v828_v54 = vrot.slane %v826_v42, 7 }
 0x110   : > { %v1094_v52 = vsel %vm5074_vm9, %v823_v39, %v1093_v26  ;;  %v1381_v53 = vor.u32 %v1380_v41, %v1376_v32  ;;  %v2132_v59 = vrot.slane %v5149_v38, 1  ;;  %v2133_v61 = vrot.slane %v5154_v49, 1  ;;  %v5167_v6 = vld [vmem:[#allocation2 + $0x38] ss:$0 sps:$4 sm:$0x11]   ;;  %v5172_v12 = vld [vmem:[#allocation2 + $0x30] sm:$0xff]  }
 0x111   : > { %1095 = vst [vmem:[#allocation2 + $0x48] sm:$0xf] %v1094_v52  ;;  %v1087_v58 = vsel %vm5074_vm9, %v806_v45, %v1086_v30  ;;  %v809_v62 = vshrl.u32 %v4186_v21, 16  ;;  %v831_v0 = vor.u32 %v829_v57, %v828_v54  ;;  %v833_v1 = vrot.slane %v828_v54, 4 }
 0x112   : > { %1088 = vst [vmem:[#allocation2 + $0x3c] sm:$0xf] %v1087_v58  ;;  %v1386_v63 = vsel %vm1350_vm4, %v1381_v53, %v1385_v47  ;;  %v812_v4 = vshll.u32 %v4186_v21, 16  ;;  %v2134_v8 = vsel %vm1575_vm5, %v2132_v59, %v2133_v61  ;;  %v1921_v10 = vshrl.u32 %v5120_v3, 16  ;;  %v5184_v21 = vld [vmem:[#allocation2 + $0x24] sm:$0xff]  }
 0x113   : > { %v811_v9 = vrot.slane %v809_v62, 7  ;;  %v1923_v11 = vshll.u32 %v5120_v3, 16  ;;  %1547 = vrot.lane.b32.xlu0 %v1386_v63, %s4817_s14  ;;  %v832_v13 = vsel %vm5080_vm10, %v824_v40, %v831_v0  ;;  %v1098_v14 = vsel %vm5087_vm11, %v833_v1, %v1097_v48  ;;  %2180 = vrot.lane.b32.xlu1 %v2134_v8, %s4818_s15  ;;  %v5186_v22 = vld [vmem:[#allocation2 + $0x2c] ss:$0 sps:$4 sm:$0x11]   ;;  %v5205_v40 = vld [vmem:[#allocation2 + $0x30] sm:$0xff]  }
 0x114   : > { %v1928_v15 = vshll.u32 %v5137_v16, 16  ;;  %v2887_v17 = vshrl.u32 %v5114_v55, 16  ;;  %1096 = vst.msk [vmem:[#allocation2 + $0x4c] sm:$0xf] %vm243_vm1, %v832_v13  ;;  %1099 = vst [vmem:[#allocation2 + $0x50] sm:$0x1] %v1098_v14 }
 0x115   : > { %v814_v3 = vor.u32 %v812_v4, %v811_v9  ;;  %v816_v18 = vrot.slane %v811_v9, 4  ;;  %v1925_v19 = vrot.slane %v1923_v11, 1  ;;  %v2889_v20 = vshll.u32 %v5114_v55, 16  ;;  %v5195_v55 = vld [vmem:[#allocation2 + $0x24] sm:$0xff]   ;;  %v5229_v4 = vld [vmem:[#allocation2 + $0x30] sm:$0xff]   ;;  %v4333_v11 = vpop.f32.mrb[14].mxu0 }
 0x116   : > { %v1930_v23 = vrot.slane %v1928_v15, 1  ;;  %v2894_v25 = vshll.u32 %v5116_v56, 16  ;;  %v3116_v26 = vrot.slane %v5172_v12, 1  ;;  %v3117_v16 = vrot.slane %v5167_v6, 1  ;;  %v5221_v61 = vld [vmem:[#allocation2 + $0x24] sm:$0xff]  }
 0x117   : > { %v815_v27 = vsel %vm5080_vm10, %v807_v46, %v814_v3  ;;  %v1091_v28 = vsel %vm5087_vm11, %v816_v18, %v1090_v5  ;;  %v1926_v29 = vor.u32 %v1925_v19, %v1921_v10  ;;  %v2891_v30 = vrot.slane %v2889_v20, 1  ;;  %v5200_v34 = vld [vmem:[#allocation2 + $0x2c] ss:$0 sps:$4 sm:$0x11]   ;;  %v557_v3 = vpop.f32.mrb[15].mxu0 }
 0x118   : > { %1089 = vst.msk [vmem:[#allocation2 + $0x40] sm:$0xf] %vm243_vm1, %v815_v27  ;;  %1092 = vst [vmem:[#allocation2 + $0x44] sm:$0x1] %v1091_v28  ;;  %v2896_v32 = vrot.slane %v2894_v25, 1  ;;  %v1364_v56 = vshrl.u32 %v5124_v7, 16  ;;  %v3118_v52 = vsel %vm1575_vm5, %v3116_v26, %v3117_v16  ;;  %v555_v5 = vadd.f32 %v5067_v31, %v5156_v50 }
 0x119   : > { %v1366_v33 = vshll.u32 %v5124_v7, 16  ;;  %v1931_v35 = vsel %vm1350_vm4, %v1926_v29, %v1930_v23  ;;  %v2892_v36 = vor.u32 %v2891_v30, %v2887_v17  ;;  %v1371_v37 = vshll.u32 %v5144_v24, 16  ;;  %v5214_v48 = vld [vmem:[#allocation2 + $0x38] ss:$0 sps:$4 sm:$0x11]  }
 0x11a   : > { %v1585_v39 = vrot.slane %v5184_v21, 1  ;;  %2102 = vrot.lane.b32.xlu0 %v1931_v35, %s4817_s14  ;;  %v1586_v42 = vrot.slane %v5186_v22, 1  ;;  %v1909_v44 = vshrl.u32 %v5149_v38, 16  ;;  %v1911_v7 = vshll.u32 %v5149_v38, 16  ;;  %v1107_v16 = vld [vmem:[#allocation2 + $0x60] sm:$0xf] }
 0x11b   : > { %v1368_v41 = vrot.slane %v1366_v33, 1  ;;  %v2897_v45 = vsel %vm1350_vm4, %v2892_v36, %v2896_v32  ;;  %v1373_v46 = vrot.slane %v1371_v37, 1  ;;  %v1916_v47 = vshll.u32 %v5154_v49, 16  ;;  %v5227_v1 = vld [vmem:[#allocation2 + $0x2c] ss:$0 sps:$4 sm:$0x11]  }
 0x11c   : > { %v3113_v24 = vrot.slane %v5195_v55, 1  ;;  %3078 = vrot.lane.b32.xlu1 %v2897_v45, %s4817_s14  ;;  %v1913_v54 = vrot.slane %v1911_v7, 1  ;;  %v3114_v57 = vrot.slane %v5200_v34, 1  ;;  %v1588_v38 = vrot.slane %v5205_v40, 1  ;;  %v1100_v36 = vld [vmem:[#allocation2 + $0x54] sm:$0xf] }
 0x11d   : > { %v1369_v53 = vor.u32 %v1368_v41, %v1364_v56  ;;  %v1918_v58 = vrot.slane %v1916_v47, 1  ;;  %v1589_v59 = vrot.slane %v5214_v48, 1  ;;  %v563_v49 = vadd.f32 %v5151_v43, %v5067_v31  ;;  %v5240_v15 = vld [vmem:[#allocation2 + $0x38] ss:$0 sps:$4 sm:$0x11]  }
 0x11e   : > { %v1587_v63 = vsel %vm1575_vm5, %v1585_v39, %v1586_v42  ;;  %v1914_v0 = vor.u32 %v1913_v54, %v1909_v44  ;;  %v3115_v8 = vsel %vm1575_vm5, %v3113_v24, %v3114_v57  ;;  %v2138_v43 = vrot.slane %v5221_v61, 1 }
 0x11f   : > { %v1374_v62 = vsel %vm1350_vm4, %v1369_v53, %v1373_v46  ;;  %v1590_v9 = vsel %vm1575_vm5, %v1588_v38, %v1589_v59  ;;  %v4191_v10 = vpack.c.bf16 %v563_v49, %v563_v49  ;;  %v2139_v14 = vrot.slane %v5227_v1, 1  ;;  %v5267_v59 = vld [vmem:[#allocation2 + $0x50] ss:$0 sps:$4 sm:$0x11]  }
 0x120   : > { %1545 = vrot.lane.b32.xlu0 %v1374_v62, %s4817_s14  ;;  %3162 = vrot.lane.b32.xlu1 %v3118_v52, %s4818_s15  ;;  %v1919_v13 = vsel %vm1350_vm4, %v1914_v0, %v1918_v58  ;;  %v2141_v50 = vrot.slane %v5229_v4, 1  ;;  %v4189_v17 = vpack.c.bf16 %v555_v5, %v555_v5  ;;  %v566_v20 = vadd.f32 %v4333_v11, %v5067_v31 }
 0x121   : > { %v852_v18 = vshrl.u32 %v4191_v10, 16  ;;  %v855_v19 = vshll.u32 %v4191_v10, 16  ;;  %v2911_v23 = vshrl.u32 %v5172_v12, 16  ;;  %v2140_v25 = vsel %vm1575_vm5, %v2138_v43, %v2139_v14  ;;  %v5272_v43 = vld [vmem:[#allocation2 + $0x48] sm:$0xff]   ;;  %v5274_v10 = vpop.f32.mrb[16].mxu0 }
 0x122   : > { %v2142_v26 = vrot.slane %v5240_v15, 1  ;;  %v835_v27 = vshrl.u32 %v4189_v17, 16  ;;  %v838_v28 = vshll.u32 %v4189_v17, 16  ;;  %v4192_v30 = vpack.c.bf16 %v566_v20, %v566_v20  ;;  %v5283_v17 = vld [vmem:[#allocation2 + $0x44] ss:$0 sps:$4 sm:$0x11]  }
 0x123   : > { %v854_v29 = vrot.slane %v852_v18, 7  ;;  %v2913_v32 = vshll.u32 %v5172_v12, 16  ;;  %v2918_v56 = vshll.u32 %v5167_v6, 16  ;;  %v1400_v37 = vshrl.u32 %v5205_v40, 16  ;;  %v1111_v6 = vld [vmem:[#allocation2 + $0x68] sm:$0x1] }
 0x124   : > { %2100 = vrot.lane.b32.xlu0 %v1919_v13, %s4817_s14  ;;  %1630 = vrot.lane.b32.xlu1 %v1587_v63, %s4818_s15  ;;  %v2143_v33 = vsel %vm1575_vm5, %v2141_v50, %v2142_v26  ;;  %v5252_v35 = vrot.slane %v835_v27, 7  ;;  %v1402_v39 = vshll.u32 %v5205_v40, 16  ;;  %v860_v44 = vshrl.u32 %v4192_v30, 16  ;;  %v1104_v20 = vld [vmem:[#allocation2 + $0x5c] sm:$0x1] }
 0x125   : > { %v857_v41 = vor.u32 %v855_v19, %v854_v29  ;;  %v858_v42 = vrot.slane %v854_v29, 4  ;;  %v863_v7 = vshll.u32 %v4192_v30, 16  ;;  %v2915_v46 = vrot.slane %v2913_v32, 1 }
 0x126   : > { %v840_v45 = vor.u32 %v838_v28, %v5252_v35  ;;  %v841_v12 = vrot.slane %v5252_v35, 4  ;;  %v2920_v47 = vrot.slane %v2918_v56, 1  ;;  %v862_v52 = vrot.slane %v860_v44, 7  ;;  %v5293_v28 = vld [vmem:[#allocation2 + $0x3c] sm:$0xff]  }
 0x127   : > { %v1108_v24 = vsel %vm5074_vm9, %v857_v41, %v1107_v16  ;;  %v1404_v53 = vrot.slane %v1402_v39, 1  ;;  %v1407_v40 = vshll.u32 %v5214_v48, 16  ;;  %v2916_v57 = vor.u32 %v2915_v46, %v2911_v23  ;;  %v5297_v56 = vld [vmem:[#allocation2 + $0x44] ss:$0 sps:$4 sm:$0x11]  }
 0x128   : > { %1632 = vrot.lane.b32.xlu0 %v1590_v9, %s4818_s15  ;;  %3160 = vrot.lane.b32.xlu1 %v3115_v8, %s4818_s15  ;;  %1109 = vst [vmem:[#allocation2 + $0x60] sm:$0xf] %v1108_v24  ;;  %v1101_v54 = vsel %vm5074_vm9, %v840_v45, %v1100_v36  ;;  %v558_v58 = vadd.f32 %v5067_v31, %v557_v3  ;;  %v1388_v38 = vshrl.u32 %v5184_v21, 16  ;;  %v867_v62 = vrot.slane %v862_v52, 4  ;;  %v5308_v45 = vld [vmem:[#allocation2 + $0x48] sm:$0xff]   ;;  %v5312_v24 = vld [vmem:[#allocation2 + $0x3c] sm:$0xff]  }
 0x129   : > { %1102 = vst [vmem:[#allocation2 + $0x54] sm:$0xf] %v1101_v54  ;;  %v865_v49 = vor.u32 %v863_v7, %v862_v52  ;;  %v1405_v63 = vor.u32 %v1404_v53, %v1400_v37  ;;  %v1409_v0 = vrot.slane %v1407_v40, 1  ;;  %v2921_v48 = vsel %vm1350_vm4, %v2916_v57, %v2920_v47  ;;  %v5302_v37 = vld [vmem:[#allocation2 + $0x50] ss:$0 sps:$4 sm:$0x11]  }
 0x12a   : > { %v4190_v5 = vpack.c.bf16 %v558_v58, %v558_v58  ;;  %v1390_v8 = vshll.u32 %v5184_v21, 16  ;;  %v1395_v9 = vshll.u32 %v5186_v22, 16  ;;  %v1112_v13 = vsel %vm5087_vm11, %v867_v62, %v1111_v6  ;;  %v5285_v21 = vpop.f32.mrb[17].mxu0  ;;  %v5306_v7 = vld [vmem:[#allocation2 + $0x3c] sm:$0xff]   ;;  %v5323_v58 = vld [vmem:[#allocation2 + $0x48] sm:$0xff]  }
 0x12b   : > { %v866_v11 = vsel %vm5080_vm10, %v858_v42, %v865_v49  ;;  %v1410_v14 = vsel %vm1350_vm4, %v1405_v63, %v1409_v0  ;;  %v1945_v50 = vshrl.u32 %v5229_v4, 16  ;;  %1113 = vst [vmem:[#allocation2 + $0x68] sm:$0x1] %v1112_v13  ;;  %v1947_v23 = vshll.u32 %v5229_v4, 16  ;;  %v4337_v39 = vpop.f32.mrb[18].mxu0 }
 0x12c   : > { %2186 = vrot.lane.b32.xlu0 %v2143_v33, %s4818_s15  ;;  %2184 = vrot.lane.b32.xlu1 %v2140_v25, %s4818_s15  ;;  %1110 = vst.msk [vmem:[#allocation2 + $0x64] sm:$0xf] %vm243_vm1, %v866_v11  ;;  %v843_v22 = vshrl.u32 %v4190_v5, 16  ;;  %v846_v3 = vshll.u32 %v4190_v5, 16  ;;  %v1392_v18 = vrot.slane %v1390_v8, 1  ;;  %v1397_v19 = vrot.slane %v1395_v9, 1 }
 0x12d   : > { %v1952_v26 = vshll.u32 %v5240_v15, 16  ;;  %v3122_v16 = vrot.slane %v5272_v43, 1  ;;  %v3123_v27 = vrot.slane %v5267_v59, 1  ;;  %v2899_v30 = vshrl.u32 %v5195_v55, 16 }
 0x12e   : > { %v845_v29 = vrot.slane %v843_v22, 7  ;;  %v1393_v25 = vor.u32 %v1392_v18, %v1388_v38  ;;  %v2901_v32 = vshll.u32 %v5195_v55, 16  ;;  %v1949_v33 = vrot.slane %v1947_v23, 1  ;;  %v5314_v52 = vld [vmem:[#allocation2 + $0x44] ss:$0 sps:$4 sm:$0x11]  }
 0x12f   : > { %v1954_v4 = vrot.slane %v1952_v26, 1  ;;  %v3124_v15 = vsel %vm1575_vm5, %v3122_v16, %v3123_v27  ;;  %v2906_v36 = vshll.u32 %v5200_v34, 16  ;;  %v1591_v47 = vrot.slane %v5293_v28, 1  ;;  %v573_v38 = vpop.f32.mrb[19].mxu0 }
 0x130   : > { %1551 = vrot.lane.b32.xlu0 %v1410_v14, %s4817_s14  ;;  %3082 = vrot.lane.b32.xlu1 %v2921_v48, %s4817_s14  ;;  %v848_v41 = vor.u32 %v846_v3, %v845_v29  ;;  %v850_v42 = vrot.slane %v845_v29, 4  ;;  %v1398_v44 = vsel %vm1350_vm4, %v1393_v25, %v1397_v19  ;;  %v2903_v55 = vrot.slane %v2901_v32, 1  ;;  %v5330_v63 = vld [vmem:[#allocation2 + $0x50] ss:$0 sps:$4 sm:$0x11]   ;;  %v5332_v0 = vpop.f32.mrb[20].mxu0 }
 0x131   : > { %v1950_v6 = vor.u32 %v1949_v33, %v1945_v50  ;;  %v2908_v46 = vrot.slane %v2906_v36, 1  ;;  %v1592_v34 = vrot.slane %v5283_v17, 1  ;;  %v1933_v57 = vshrl.u32 %v5221_v61, 16  ;;  %v5340_v11 = vpop.f32.mrb[21].mxu0 }
 0x132   : > { %v849_v53 = vsel %vm5080_vm10, %v841_v12, %v848_v41  ;;  %v1105_v40 = vsel %vm5087_vm11, %v850_v42, %v1104_v20  ;;  %v2904_v54 = vor.u32 %v2903_v55, %v2899_v30  ;;  %v1935_v35 = vshll.u32 %v5221_v61, 16  ;;  %v5344_v50 = vpop.f32.mrb[22].mxu0 }
 0x133   : > { %1103 = vst.msk [vmem:[#allocation2 + $0x58] sm:$0xf] %vm243_vm1, %v849_v53  ;;  %1106 = vst [vmem:[#allocation2 + $0x5c] sm:$0x1] %v1105_v40  ;;  %v1955_v49 = vsel %vm1350_vm4, %v1950_v6, %v1954_v4  ;;  %v1593_v62 = vsel %vm1575_vm5, %v1591_v47, %v1592_v34  ;;  %v1940_v12 = vshll.u32 %v5227_v1, 16  ;;  %v3119_v5 = vrot.slane %v5306_v7, 1 }
 0x134   : > { %1549 = vrot.lane.b32.xlu1 %v1398_v44, %s4817_s14  ;;  %2106 = vrot.lane.b32.xlu0 %v1955_v49, %s4817_s14  ;;  %v2909_v48 = vsel %vm1350_vm4, %v2904_v54, %v2908_v46  ;;  %v3120_v8 = vrot.slane %v5297_v56, 1  ;;  %v1594_v9 = vrot.slane %v5308_v45, 1  ;;  %v1937_v61 = vrot.slane %v1935_v35, 1  ;;  %v5350_v20 = vpop.f32.mrb[23].mxu0  ;;  %v1121_v53 = vld [vmem:[#allocation2 + $0x78] sm:$0xf] }
 0x135   : > { %v1942_v1 = vrot.slane %v1940_v12, 1  ;;  %v1595_v13 = vrot.slane %v5302_v37, 1  ;;  %v2144_v14 = vrot.slane %v5312_v24, 1  ;;  %v2145_v3 = vrot.slane %v5314_v52, 1  ;;  %v5357_v29 = vpop.f32.mrb[24].mxu0 }
 0x136   : > { %v3121_v22 = vsel %vm1575_vm5, %v3119_v5, %v3120_v8  ;;  %v2147_v18 = vrot.slane %v5323_v58, 1  ;;  %v2148_v19 = vrot.slane %v5330_v63, 1  ;;  %v1938_v23 = vor.u32 %v1937_v61, %v1933_v57  ;;  %v1114_v40 = vld [vmem:[#allocation2 + $0x6c] sm:$0xf]  ;;  %v1125_v35 = vld [vmem:[#allocation2 + $0x80] sm:$0x1] }
 0x137   : > { %v1596_v26 = vsel %vm1575_vm5, %v1594_v9, %v1595_v13  ;;  %v579_v16 = vadd.f32 %v5274_v10, %v5067_v31  ;;  %v571_v27 = vadd.f32 %v5067_v31, %v5285_v21  ;;  %v5362_v25 = vsel %vm1575_vm5, %v2144_v14, %v2145_v3  ;;  %v5369_v10 = vpop.f32.mrb[25].mxu0 }
 0x138   : > { %3166 = vrot.lane.b32.xlu1 %v3124_v15, %s4818_s15  ;;  %3080 = vrot.lane.b32.xlu0 %v2909_v48, %s4817_s14  ;;  %v5365_v30 = vsel %vm1575_vm5, %v2147_v18, %v2148_v19  ;;  %v582_v32 = vadd.f32 %v4337_v39, %v5067_v31  ;;  %v2935_v33 = vshrl.u32 %v5272_v43, 16  ;;  %v1943_v21 = vsel %vm1350_vm4, %v1938_v23, %v1942_v1  ;;  %v5373_v41 = vpop.f32.mrb[26].mxu0 }
 0x139   : > { %v4195_v4 = vpack.c.bf16 %v579_v16, %v579_v16  ;;  %v4193_v36 = vpack.c.bf16 %v571_v27, %v571_v27  ;;  %v574_v15 = vadd.f32 %v5067_v31, %v573_v38  ;;  %v2937_v44 = vshll.u32 %v5272_v43, 16  ;;  %v5381_v48 = vpop.f32.mrb[27].mxu0 }
 0x13a   : > { %v4196_v42 = vpack.c.bf16 %v582_v32, %v582_v32  ;;  %v2942_v55 = vshll.u32 %v5267_v59, 16  ;;  %v1424_v6 = vshrl.u32 %v5308_v45, 16  ;;  %v1426_v12 = vshll.u32 %v5308_v45, 16  ;;  %v5386_v45 = vpop.f32.mrb[28].mxu0  ;;  %v1118_v32 = vld [vmem:[#allocation2 + $0x74] sm:$0x1] }
 0x13b   : > { %v886_v39 = vshrl.u32 %v4195_v4, 16  ;;  %v889_v46 = vshll.u32 %v4195_v4, 16  ;;  %v869_v47 = vshrl.u32 %v4193_v36, 16  ;;  %v872_v34 = vshll.u32 %v4193_v36, 16 }
 0x13c   : > { %1634 = vrot.lane.b32.xlu1 %v1593_v62, %s4818_s15  ;;  %2104 = vrot.lane.b32.xlu0 %v1943_v21, %s4817_s14  ;;  %v894_v31 = vshrl.u32 %v4196_v42, 16  ;;  %v897_v54 = vshll.u32 %v4196_v42, 16  ;;  %v4194_v57 = vpack.c.bf16 %v574_v15, %v574_v15  ;;  %v2939_v38 = vrot.slane %v2937_v44, 1 }
 0x13d   : > { %v888_v49 = vrot.slane %v886_v39, 7  ;;  %v871_v43 = vrot.slane %v869_v47, 7  ;;  %v2944_v59 = vrot.slane %v2942_v55, 1  ;;  %v1431_v21 = vshll.u32 %v5302_v37, 16 }
 0x13e   : > { %v896_v5 = vrot.slane %v894_v31, 7  ;;  %v877_v8 = vshrl.u32 %v4194_v57, 16  ;;  %v880_v9 = vshll.u32 %v4194_v57, 16  ;;  %v2940_v62 = vor.u32 %v2939_v38, %v2935_v33  ;;  %v5430_v38 = vld [vmem:[%s6317_s2] ss:$0 sm:$0xff] }
 0x13f   : > { %v891_v61 = vor.u32 %v889_v46, %v888_v49  ;;  %v892_v1 = vrot.slane %v888_v49, 4  ;;  %v874_v13 = vor.u32 %v872_v34, %v871_v43  ;;  %v875_v14 = vrot.slane %v871_v43, 4 }
 0x140   : > { %3164 = vrot.lane.b32.xlu1 %v3121_v22, %s4818_s15  ;;  %1636 = vrot.lane.b32.xlu0 %v1596_v26, %s4818_s15  ;;  %v899_v3 = vor.u32 %v897_v54, %v896_v5  ;;  %v901_v18 = vrot.slane %v896_v5, 4  ;;  %v879_v19 = vrot.slane %v877_v8, 7  ;;  %v2945_v23 = vsel %vm1350_vm4, %v2940_v62, %v2944_v59  ;;  %v5393_v22 = vpop.f32.mrb[29].mxu0  ;;  %v4679_v62 = vld [vmem:[%s6318_s3 + $0x20] sm:$0xff]  }
 0x141   : > { %v1122_v16 = vsel %vm5074_vm9, %v891_v61, %v1121_v53  ;;  %v1115_v27 = vsel %vm5074_vm9, %v874_v13, %v1114_v40  ;;  %v1428_v33 = vrot.slane %v1426_v12, 1  ;;  %v5399_v42 = vpop.f32.mrb[30].mxu0  ;;  %v1433_v55 = vrot.slane %v1431_v21, 1  ;;  %v5416_v40 = vld [vmem:[#allocation2 + $0x60] sm:$0xff]  }
 0x142   : > { %1123 = vst [vmem:[#allocation2 + $0x78] sm:$0xf] %v1122_v16  ;;  %1116 = vst [vmem:[#allocation2 + $0x6c] sm:$0xf] %v1115_v27  ;;  %v900_v26 = vsel %vm5080_vm10, %v892_v1, %v899_v3  ;;  %v1126_v4 = vsel %vm5087_vm11, %v901_v18, %v1125_v35  ;;  %v882_v36 = vor.u32 %v880_v9, %v879_v19  ;;  %v884_v15 = vrot.slane %v879_v19, 4  ;;  %v5404_v46 = vpop.f32.mrb[31].mxu0 }
 0x143   : > { %1124 = vst.msk [vmem:[#allocation2 + $0x7c] sm:$0xf] %vm243_vm1, %v900_v26  ;;  %1127 = vst [vmem:[#allocation2 + $0x80] sm:$0x1] %v1126_v4  ;;  %v1429_v44 = vor.u32 %v1428_v33, %v1424_v6  ;;  %v1412_v37 = vshrl.u32 %v5293_v28, 16  ;;  %v1414_v39 = vshll.u32 %v5293_v28, 16  ;;  %v595_v49 = vadd.f32 %v5430_v38, %v5332_v0 }
 0x144   : > { %2188 = vrot.lane.b32.xlu1 %v5362_v25, %s4818_s15  ;;  %2190 = vrot.lane.b32.xlu0 %v5365_v30, %s4818_s15  ;;  %v883_v47 = vsel %vm5080_vm10, %v875_v14, %v882_v36  ;;  %v1119_v34 = vsel %vm5087_vm11, %v884_v15, %v1118_v32  ;;  %v1419_v6 = vshll.u32 %v5283_v17, 16  ;;  %v1969_v53 = vshrl.u32 %v5323_v58, 16  ;;  %v5418_v28 = vld [vmem:[#allocation2 + $0x68] ss:$0 sps:$4 sm:$0x11]   ;;  %v4669_v17 = vld [vmem:[%s6318_s3] sm:$0xff]  }
 0x145   : > { %1117 = vst.msk [vmem:[#allocation2 + $0x70] sm:$0xf] %vm243_vm1, %v883_v47  ;;  %1120 = vst [vmem:[#allocation2 + $0x74] sm:$0x1] %v1119_v34  ;;  %v1434_v25 = vsel %vm1350_vm4, %v1429_v44, %v1433_v55  ;;  %v1416_v30 = vrot.slane %v1414_v39, 1  ;;  %v1971_v31 = vshll.u32 %v5323_v58, 16  ;;  %v587_v43 = vadd.f32 %v5430_v38, %v5340_v11  ;;  %4388 = vmatprep.subr.bf16.mxu1 %v4669_v17 }
 0x146   : > { %v1976_v54 = vshll.u32 %v5330_v63, 16  ;;  %v1421_v57 = vrot.slane %v1419_v6, 1  ;;  %v598_v58 = vadd.f32 %v5430_v38, %v5344_v50  ;;  %v4674_v63 = vld [vmem:[%s6318_s3 + $0x8] sm:$0xff]   ;;  %v590_v5 = vadd.f32 %v5430_v38, %v5350_v20  ;;  %v4675_v0 = vld [vmem:[%s6318_s3 + $0x18] sm:$0xff]   ;;  %4389 = vmatpush3.bf16.msra.mxu1 %v4669_v17  ;;  %v4678_v14 = vld [vmem:[%s6318_s3 + $0x10] sm:$0xff]  }
 0x147   : > { %v1417_v35 = vor.u32 %v1416_v30, %v1412_v37  ;;  %v1973_v59 = vrot.slane %v1971_v31, 1  ;;  %v4199_v11 = vpack.c.bf16 %v595_v49, %v595_v49  ;;  %v4197_v50 = vpack.c.bf16 %v587_v43, %v587_v43  ;;  %4350 = vmatprep.subr.bf16.mxu0 %v4675_v0  ;;  %4390 = vmatprep.subr.bf16.mxu1 %v4674_v63  ;;  %v1135_v27 = vld [vmem:[#allocation2 + $0x90] sm:$0xf]  ;;  %v1128_v32 = vld [vmem:[#allocation2 + $0x84] sm:$0xf]  ;;  %v4682_v4 = vld [vmem:[%s6318_s3 + $0x28] sm:$0xff]  }
 0x148   : > { %v1978_v12 = vrot.slane %v1976_v54, 1  ;;  %3086 = vrot.lane.b32.xlu1 %v2945_v23, %s4817_s14  ;;  %1555 = vrot.lane.b32.xlu0 %v1434_v25, %s4817_s14  ;;  %v4200_v8 = vpack.c.bf16 %v598_v58, %v598_v58  ;;  %v3128_v9 = vrot.slane %v5416_v40, 1  ;;  %v4198_v1 = vpack.c.bf16 %v590_v5, %v590_v5  ;;  %v1139_v44 = vld [vmem:[#allocation2 + $0x98] sm:$0x1]  ;;  %v1132_v37 = vld [vmem:[#allocation2 + $0x8c] sm:$0x1] }
 0x149   : > { %v1422_v20 = vsel %vm1350_vm4, %v1417_v35, %v1421_v57  ;;  %v1974_v61 = vor.u32 %v1973_v59, %v1969_v53  ;;  %v3129_v13 = vrot.slane %v5418_v28, 1  ;;  %v920_v3 = vshrl.u32 %v4199_v11, 16  ;;  %4351 = vmatpush3.bf16.msra.mxu0 %v4675_v0  ;;  %v5466_v17 = vld [vmem:[#allocation2 + $0x5c] ss:$0 sps:$4 sm:$0x11]   ;;  %v5468_v35 = vld [vmem:[#allocation2 + $0x54] sm:$0xff]  }
 0x14a   : > { %v923_v18 = vshll.u32 %v4199_v11, 16  ;;  %v903_v19 = vshrl.u32 %v4197_v50, 16  ;;  %v906_v23 = vshll.u32 %v4197_v50, 16  ;;  %v928_v33 = vshrl.u32 %v4200_v8, 16  ;;  %4352 = vmatprep.subr.bf16.mxu0 %v4679_v62  ;;  %4391 = vmatpush3.bf16.msra.mxu1 %v4674_v63 }
 0x14b   : > { %v1979_v16 = vsel %vm1350_vm4, %v1974_v61, %v1978_v12  ;;  %v931_v21 = vshll.u32 %v4200_v8, 16  ;;  %v911_v26 = vshrl.u32 %v4198_v1, 16  ;;  %v922_v36 = vrot.slane %v920_v3, 7  ;;  %4392 = vmatprep.subr.bf16.mxu1 %v4678_v14  ;;  %v5484_v8 = vld [vmem:[#allocation2 + $0x5c] ss:$0 sps:$4 sm:$0x11]  }
 0x14c   : > { %1553 = vrot.lane.b32.xlu1 %v1422_v20, %s4817_s14  ;;  %2110 = vrot.lane.b32.xlu0 %v1979_v16, %s4817_s14  ;;  %v905_v15 = vrot.slane %v903_v19, 7  ;;  %v914_v55 = vshll.u32 %v4198_v1, 16  ;;  %v3130_v39 = vsel %vm1575_vm5, %v3128_v9, %v3129_v13  ;;  %v930_v47 = vrot.slane %v928_v33, 7  ;;  %v5501_v16 = vld [vmem:[#allocation2 + $0x54] sm:$0xff]  }
 0x14d   : > { %v913_v34 = vrot.slane %v911_v26, 7  ;;  %v2923_v6 = vshrl.u32 %v5306_v7, 16  ;;  %v2925_v53 = vshll.u32 %v5306_v7, 16  ;;  %v925_v25 = vor.u32 %v923_v18, %v922_v36  ;;  %4353 = vmatpush3.bf16.msra.mxu0 %v4679_v62 }
 0x14e   : > { %v926_v30 = vrot.slane %v922_v36, 4  ;;  %v908_v31 = vor.u32 %v906_v23, %v905_v15  ;;  %v909_v54 = vrot.slane %v905_v15, 4  ;;  %v933_v57 = vor.u32 %v931_v21, %v930_v47  ;;  %4354 = vmatprep.subr.bf16.mxu0 %v4682_v4  ;;  %4393 = vmatpush3.bf16.msra.mxu1 %v4678_v14 }
 0x14f   : > { %v935_v49 = vrot.slane %v930_v47, 4  ;;  %v916_v43 = vor.u32 %v914_v55, %v913_v34  ;;  %v918_v58 = vrot.slane %v913_v34, 4  ;;  %v1136_v59 = vsel %vm5074_vm9, %v925_v25, %v1135_v27  ;;  %v4648_v55 = vld [vmem:[#allocation2 + $0x68] ss:$0 sps:$4 sm:$0x11]  }
 0x150   : > { %v1129_v7 = vsel %vm5074_vm9, %v908_v31, %v1128_v32  ;;  %3170 = vrot.lane.b32.xlu1 %v3130_v39, %s4818_s15  ;;  %v2927_v63 = vrot.slane %v2925_v53, 1  ;;  %v2930_v12 = vshll.u32 %v5297_v56, 16  ;;  %1137 = vst [vmem:[#allocation2 + $0x90] sm:$0xf] %v1136_v59  ;;  %v934_v5 = vsel %vm5080_vm10, %v926_v30, %v933_v57  ;;  %v1142_v25 = vld [vmem:[#allocation2 + $0x9c] sm:$0xf] }
 0x151   : > { %1130 = vst [vmem:[#allocation2 + $0x84] sm:$0xf] %v1129_v7  ;;  %v1140_v0 = vsel %vm5087_vm11, %v935_v49, %v1139_v44  ;;  %v917_v11 = vsel %vm5080_vm10, %v909_v54, %v916_v43  ;;  %v1133_v50 = vsel %vm5087_vm11, %v918_v58, %v1132_v37  ;;  %1138 = vst.msk [vmem:[#allocation2 + $0x94] sm:$0xf] %vm243_vm1, %v934_v5  ;;  %v1597_v62 = vrot.slane %v5468_v35, 1  ;;  %v5515_v44 = vld [vmem:[#allocation2 + $0x60] sm:$0xff]  }
 0x152   : > { %1141 = vst [vmem:[#allocation2 + $0x98] sm:$0x1] %v1140_v0  ;;  %1131 = vst.msk [vmem:[#allocation2 + $0x88] sm:$0xf] %vm243_vm1, %v917_v11  ;;  %v2928_v56 = vor.u32 %v2927_v63, %v2923_v6  ;;  %v2932_v9 = vrot.slane %v2930_v12, 1  ;;  %v1598_v20 = vrot.slane %v5466_v17, 1  ;;  %4355 = vmatpush3.bf16.msra.mxu0 %v4682_v4  ;;  %v611_v14 = vadd.f32 %v5430_v38, %v5357_v29 }
 0x153   : > { %1134 = vst [vmem:[#allocation2 + $0x8c] sm:$0x1] %v1133_v50  ;;  %v1957_v61 = vshrl.u32 %v5312_v24, 16  ;;  %v1959_v1 = vshll.u32 %v5312_v24, 16  ;;  %v1964_v13 = vshll.u32 %v5314_v52, 16  ;;  %v603_v19 = vadd.f32 %v5430_v38, %v5369_v10  ;;  %v5506_v24 = vld [vmem:[%s6318_s3 + $0x30] sm:$0xff]  }
 0x154   : > { %v2933_v3 = vsel %vm1350_vm4, %v2928_v56, %v2932_v9  ;;  %v1599_v18 = vsel %vm1575_vm5, %v1597_v62, %v1598_v20  ;;  %v614_v23 = vadd.f32 %v5430_v38, %v5373_v41  ;;  %v4203_v27 = vpack.c.bf16 %v611_v14, %v611_v14  ;;  %4426 = vmatprep.subr.bf16.mxu1 %v5506_v24  ;;  %v1149_v37 = vld [vmem:[#allocation2 + $0xa8] sm:$0xf]  ;;  %v1153_v30 = vld [vmem:[#allocation2 + $0xb0] sm:$0x1]  ;;  %v1146_v43 = vld [vmem:[#allocation2 + $0xa4] sm:$0x1] }
 0x155   : > { %3084 = vrot.lane.b32.xlu0 %v2933_v3, %s4817_s14  ;;  %1638 = vrot.lane.b32.xlu1 %v1599_v18, %s4818_s15  ;;  %v1961_v52 = vrot.slane %v1959_v1, 1  ;;  %v1966_v29 = vrot.slane %v1964_v13, 1  ;;  %v606_v10 = vadd.f32 %v5430_v38, %v5381_v48  ;;  %v4201_v32 = vpack.c.bf16 %v603_v19, %v603_v19  ;;  %v5521_v7 = vld [vmem:[#allocation2 + $0x54] sm:$0xff]   ;;  %v5524_v11 = vld [vmem:[#allocation2 + $0x5c] ss:$0 sps:$4 sm:$0x11]  }
 0x156   : > { %v4204_v33 = vpack.c.bf16 %v614_v23, %v614_v23  ;;  %v3125_v41 = vrot.slane %v5501_v16, 1  ;;  %v3126_v21 = vrot.slane %v5484_v8, 1  ;;  %v954_v4 = vshrl.u32 %v4203_v27, 16 }
 0x157   : > { %v1962_v26 = vor.u32 %v1961_v52, %v1957_v61  ;;  %v957_v36 = vshll.u32 %v4203_v27, 16  ;;  %v4202_v15 = vpack.c.bf16 %v606_v10, %v606_v10  ;;  %v937_v39 = vshrl.u32 %v4201_v32, 16 }
 0x158   : > { %v940_v47 = vshll.u32 %v4201_v32, 16  ;;  %v962_v34 = vshrl.u32 %v4204_v33, 16  ;;  %v965_v48 = vshll.u32 %v4204_v33, 16  ;;  %v956_v53 = vrot.slane %v954_v4, 7 }
 0x159   : > { %v1967_v6 = vsel %vm1350_vm4, %v1962_v26, %v1966_v29  ;;  %v945_v31 = vshrl.u32 %v4202_v15, 16  ;;  %v948_v54 = vshll.u32 %v4202_v15, 16  ;;  %v939_v57 = vrot.slane %v937_v39, 7 }
 0x15a   : > { %2108 = vrot.lane.b32.xlu0 %v1967_v6, %s4817_s14  ;;  %v964_v49 = vrot.slane %v962_v34, 7  ;;  %v3127_v58 = vsel %vm1575_vm5, %v3125_v41, %v3126_v21  ;;  %v1600_v59 = vrot.slane %v5515_v44, 1  ;;  %v959_v63 = vor.u32 %v957_v36, %v956_v53 }
 0x15b   : > { %v960_v12 = vrot.slane %v956_v53, 4  ;;  %v947_v5 = vrot.slane %v945_v31, 7  ;;  %3168 = vrot.lane.b32.xlu1 %v3127_v58, %s4818_s15  ;;  %v1601_v0 = vrot.slane %v4648_v55, 1  ;;  %v942_v50 = vor.u32 %v940_v47, %v939_v57  ;;  %v1163_v53 = vld [vmem:[#allocation2 + $0xc0] sm:$0xf] }
 0x15c   : > { %v943_v56 = vrot.slane %v939_v57, 4  ;;  %v967_v9 = vor.u32 %v965_v48, %v964_v49  ;;  %v969_v62 = vrot.slane %v964_v49, 4  ;;  %v1150_v20 = vsel %vm5074_vm9, %v959_v63, %v1149_v37 }
 0x15d   : > { %v950_v61 = vor.u32 %v948_v54, %v947_v5  ;;  %v952_v1 = vrot.slane %v947_v5, 4  ;;  %v1602_v13 = vsel %vm1575_vm5, %v1600_v59, %v1601_v0  ;;  %1151 = vst [vmem:[#allocation2 + $0xa8] sm:$0xf] %v1150_v20  ;;  %v1143_v14 = vsel %vm5074_vm9, %v942_v50, %v1142_v25  ;;  %v1160_v59 = vld [vmem:[#allocation2 + $0xbc] sm:$0x1] }
 0x15e   : > { %v968_v3 = vsel %vm5080_vm10, %v960_v12, %v967_v9  ;;  %v1154_v18 = vsel %vm5087_vm11, %v969_v62, %v1153_v30  ;;  %1640 = vrot.lane.b32.xlu0 %v1602_v13, %s4818_s15  ;;  %v2150_v19 = vrot.slane %v5521_v7, 1  ;;  %1144 = vst [vmem:[#allocation2 + $0x9c] sm:$0xf] %v1143_v14  ;;  %v2151_v29 = vrot.slane %v5524_v11, 1  ;;  %v5563_v62 = vld [vmem:[#allocation2 + $0x60] sm:$0xff]  }
 0x15f   : > { %1152 = vst.msk [vmem:[#allocation2 + $0xac] sm:$0xf] %vm243_vm1, %v968_v3  ;;  %1155 = vst [vmem:[#allocation2 + $0xb0] sm:$0x1] %v1154_v18  ;;  %v951_v23 = vsel %vm5080_vm10, %v943_v56, %v950_v61  ;;  %v1147_v52 = vsel %vm5087_vm11, %v952_v1, %v1146_v43  ;;  %v1448_v27 = vshrl.u32 %v5515_v44, 16  ;;  %v1450_v10 = vshll.u32 %v5515_v44, 16 }
 0x160   : > { %1145 = vst.msk [vmem:[#allocation2 + $0xa0] sm:$0xf] %vm243_vm1, %v951_v23  ;;  %1148 = vst [vmem:[#allocation2 + $0xa4] sm:$0x1] %v1147_v52  ;;  %v1455_v32 = vshll.u32 %v4648_v55, 16  ;;  %v627_v33 = vadd.f32 %v5430_v38, %v5386_v45  ;;  %v619_v41 = vadd.f32 %v5430_v38, %v5393_v22  ;;  %v2152_v21 = vsel %vm1575_vm5, %v2150_v19, %v2151_v29 }
 0x161   : > { %v630_v26 = vadd.f32 %v5430_v38, %v5399_v42  ;;  %v622_v4 = vadd.f32 %v5430_v38, %v5404_v46  ;;  %v2959_v36 = vshrl.u32 %v5416_v40, 16  ;;  %2192 = vrot.lane.b32.xlu1 %v2152_v21, %s4818_s15  ;;  %v1452_v15 = vrot.slane %v1450_v10, 1  ;;  %v1156_v38 = vld [vmem:[#allocation2 + $0xb4] sm:$0xf]  ;;  %v1167_v43 = vld [vmem:[#allocation2 + $0xc8] sm:$0x1] }
 0x162   : > { %v1457_v44 = vrot.slane %v1455_v32, 1  ;;  %v4207_v55 = vpack.c.bf16 %v627_v33, %v627_v33  ;;  %v4205_v37 = vpack.c.bf16 %v619_v41, %v619_v41  ;;  %v2961_v22 = vshll.u32 %v5416_v40, 16  ;;  %v5560_v40 = vld [vmem:[#allocation2 + $0x68] ss:$0 sps:$4 sm:$0x11]  }
 0x163   : > { %v4208_v45 = vpack.c.bf16 %v630_v26, %v630_v26  ;;  %v4206_v39 = vpack.c.bf16 %v622_v4, %v622_v4  ;;  %v2966_v47 = vshll.u32 %v5418_v28, 16  ;;  %v1453_v34 = vor.u32 %v1452_v15, %v1448_v27  ;;  %v4654_v10 = vld [vmem:[#allocation2 + $0x74] ss:$0 sps:$4 sm:$0x11]  }
 0x164   : > { %v988_v48 = vshrl.u32 %v4207_v55, 16  ;;  %v991_v42 = vshll.u32 %v4207_v55, 16  ;;  %v971_v6 = vshrl.u32 %v4205_v37, 16  ;;  %v974_v46 = vshll.u32 %v4205_v37, 16 }
 0x165   : > { %v996_v25 = vshrl.u32 %v4208_v45, 16  ;;  %v999_v30 = vshll.u32 %v4208_v45, 16  ;;  %v979_v31 = vshrl.u32 %v4206_v39, 16  ;;  %v1458_v54 = vsel %vm1350_vm4, %v1453_v34, %v1457_v44  ;;  %v5590_v44 = vld [vmem:[#allocation2 + $0x6c] sm:$0xff]  }
 0x166   : > { %v990_v57 = vrot.slane %v988_v48, 7  ;;  %v973_v49 = vrot.slane %v971_v6, 7  ;;  %v982_v58 = vshll.u32 %v4206_v39, 16  ;;  %1559 = vrot.lane.b32.xlu0 %v1458_v54, %s4817_s14  ;;  %v2963_v12 = vrot.slane %v2961_v22, 1 }
 0x167   : > { %v998_v28 = vrot.slane %v996_v25, 7  ;;  %v981_v63 = vrot.slane %v979_v31, 7  ;;  %v2968_v5 = vrot.slane %v2966_v47, 1  ;;  %v1993_v19 = vshrl.u32 %v5563_v62, 16 }
 0x168   : > { %v993_v0 = vor.u32 %v991_v42, %v990_v57  ;;  %v994_v50 = vrot.slane %v990_v57, 4  ;;  %v976_v56 = vor.u32 %v974_v46, %v973_v49  ;;  %v977_v9 = vrot.slane %v973_v49, 4  ;;  %v5595_v42 = vld [vmem:[#allocation2 + $0x78] sm:$0xff]   ;;  %v4656_v54 = vld [vmem:[#allocation2 + $0x80] ss:$0 sps:$4 sm:$0x11]  }
 0x169   : > { %v1001_v20 = vor.u32 %v999_v30, %v998_v28  ;;  %v1003_v61 = vrot.slane %v998_v28, 4  ;;  %v984_v1 = vor.u32 %v982_v58, %v981_v63  ;;  %v986_v13 = vrot.slane %v981_v63, 4  ;;  %v4658_v57 = vld [vmem:[#allocation2 + $0x8c] ss:$0 sps:$4 sm:$0x11]   ;;  %v1625_v28 = vpop.permute.xlu1 %1624 }
 0x16a   : > { %v1164_v14 = vsel %vm5074_vm9, %v993_v0, %v1163_v53  ;;  %v1157_v3 = vsel %vm5074_vm9, %v976_v56, %v1156_v38  ;;  %v2964_v18 = vor.u32 %v2963_v12, %v2959_v36  ;;  %v1995_v32 = vshll.u32 %v5563_v62, 16  ;;  %v5600_v38 = vld [vmem:[#allocation2 + $0x84] sm:$0xff]   ;;  %v1544_v56 = vpop.permute.xlu0 %1543 }
 0x16b   : > { %1165 = vst [vmem:[#allocation2 + $0xc0] sm:$0xf] %v1164_v14  ;;  %1158 = vst [vmem:[#allocation2 + $0xb4] sm:$0xf] %v1157_v3  ;;  %v1002_v23 = vsel %vm5080_vm10, %v994_v50, %v1001_v20  ;;  %v1168_v52 = vsel %vm5087_vm11, %v1003_v61, %v1167_v43  ;;  %v985_v29 = vsel %vm5080_vm10, %v977_v9, %v984_v1  ;;  %v2000_v33 = vshll.u32 %v5560_v40, 16 }
 0x16c   : > { %v1161_v27 = vsel %vm5087_vm11, %v986_v13, %v1160_v59  ;;  %1166 = vst.msk [vmem:[#allocation2 + $0xc4] sm:$0xf] %vm243_vm1, %v1002_v23  ;;  %1169 = vst [vmem:[#allocation2 + $0xc8] sm:$0x1] %v1168_v52  ;;  %v2969_v51 = vsel %vm1350_vm4, %v2964_v18, %v2968_v5  ;;  %v1436_v41 = vshrl.u32 %v5468_v35, 16  ;;  %v1438_v60 = vshll.u32 %v5468_v35, 16 }
 0x16d   : > { %1159 = vst.msk [vmem:[#allocation2 + $0xb8] sm:$0xf] %vm243_vm1, %v985_v29  ;;  %1162 = vst [vmem:[#allocation2 + $0xbc] sm:$0x1] %v1161_v27  ;;  %3090 = vrot.lane.b32.xlu1 %v2969_v51, %s4817_s14  ;;  %v1443_v2 = vshll.u32 %v5466_v17, 16  ;;  %v2947_v21 = vshrl.u32 %v5501_v16, 16 }
 0x16e   : > { %v2949_v26 = vshll.u32 %v5501_v16, 16  ;;  %v1997_v4 = vrot.slane %v1995_v32, 1  ;;  %v2002_v36 = vrot.slane %v2000_v33, 1  ;;  %v2954_v15 = vshll.u32 %v5484_v8, 16  ;;  %v5608_v59 = vld [vmem:[#allocation2 + $0x6c] sm:$0xff]  }
 0x16f   : > { %v1440_v55 = vrot.slane %v1438_v60, 1  ;;  %v1445_v37 = vrot.slane %v1443_v2, 1  ;;  %v1603_v22 = vrot.slane %v5590_v44, 1  ;;  %v1604_v47 = vrot.slane %v4654_v10, 1 }
 0x170   : > { %v2951_v45 = vrot.slane %v2949_v26, 1  ;;  %v1998_v39 = vor.u32 %v1997_v4, %v1993_v19  ;;  %v1983_v35 = vshll.u32 %v5521_v7, 16  ;;  %v2956_v48 = vrot.slane %v2954_v15, 1  ;;  %v5618_v18 = vld [vmem:[#allocation2 + $0x74] ss:$0 sps:$4 sm:$0x11]  }
 0x171   : > { %v1441_v17 = vor.u32 %v1440_v55, %v1436_v41  ;;  %v1981_v16 = vshrl.u32 %v5521_v7, 16  ;;  %v1988_v53 = vshll.u32 %v5524_v11, 16  ;;  %v1462_v46 = vshll.u32 %v5590_v44, 16  ;;  %v4662_v60 = vld [vmem:[#allocation2 + $0xa4] ss:$0 sps:$4 sm:$0x11]  }
 0x172   : > { %v2952_v34 = vor.u32 %v2951_v45, %v2947_v21  ;;  %v2003_v8 = vsel %vm1350_vm4, %v1998_v39, %v2002_v36  ;;  %v1985_v6 = vrot.slane %v1983_v35, 1  ;;  %v1460_v30 = vshrl.u32 %v5590_v44, 16  ;;  %v5633_v36 = vld [vmem:[#allocation2 + $0x90] sm:$0xff]   ;;  %v4711_v39 = vld [vmem:[#allocation2] sm:$0xff]  }
 0x173   : > { %2114 = vrot.lane.b32.xlu0 %v2003_v8, %s4817_s14  ;;  %v1446_v25 = vsel %vm1350_vm4, %v1441_v17, %v1445_v37  ;;  %v1467_v31 = vshll.u32 %v4654_v10, 16  ;;  %v1464_v7 = vrot.slane %v1462_v46, 1  ;;  %v1990_v11 = vrot.slane %v1988_v53, 1  ;;  %v5624_v10 = vld [vmem:[#allocation2 + $0x9c] sm:$0xff]  }
 0x174   : > { %1557 = vrot.lane.b32.xlu1 %v1446_v25, %s4817_s14  ;;  %v2957_v49 = vsel %vm1350_vm4, %v2952_v34, %v2956_v48  ;;  %v1986_v43 = vor.u32 %v1985_v6, %v1981_v16  ;;  %v1474_v58 = vshll.u32 %v5595_v42, 16  ;;  %v1605_v63 = vsel %vm1575_vm5, %v1603_v22, %v1604_v47  ;;  %v4664_v17 = vld [vmem:[#allocation2 + $0x98] ss:$0 sps:$4 sm:$0x11]  }
 0x175   : > { %v1465_v12 = vor.u32 %v1464_v7, %v1460_v30  ;;  %v1469_v5 = vrot.slane %v1467_v31, 1  ;;  %v1486_v0 = vshll.u32 %v5600_v38, 16  ;;  %v1606_v50 = vrot.slane %v5595_v42, 1 }
 0x176   : > { %v1607_v9 = vrot.slane %v4656_v54, 1  ;;  %v1609_v20 = vrot.slane %v5600_v38, 1  ;;  %v1610_v61 = vrot.slane %v4658_v57, 1  ;;  %v1472_v1 = vshrl.u32 %v5595_v42, 16 }
 0x177   : > { %3088 = vrot.lane.b32.xlu0 %v2957_v49, %s4817_s14  ;;  %v1991_v13 = vsel %vm1350_vm4, %v1986_v43, %v1990_v11  ;;  %v1476_v14 = vrot.slane %v1474_v58, 1  ;;  %v1479_v3 = vshll.u32 %v4656_v54, 16  ;;  %v2973_v19 = vshll.u32 %v5608_v59, 16  ;;  %v5653_v54 = vld [vmem:[#allocation2 + $0xb4] sm:$0xff]  }
 0x178   : > { %1642 = vrot.lane.b32.xlu1 %v1605_v63, %s4818_s15  ;;  %v1470_v23 = vsel %vm1350_vm4, %v1465_v12, %v1469_v5  ;;  %v1484_v52 = vshrl.u32 %v5600_v38, 16  ;;  %v1488_v29 = vrot.slane %v1486_v0, 1  ;;  %v1491_v27 = vshll.u32 %v4658_v57, 16  ;;  %v4666_v57 = vld [vmem:[#allocation2 + $0xbc] ss:$0 sps:$4 sm:$0x11]  }
 0x179   : > { %v1608_v32 = vsel %vm1575_vm5, %v1606_v50, %v1607_v9  ;;  %v1611_v33 = vsel %vm1575_vm5, %v1609_v20, %v1610_v61  ;;  %v2971_v41 = vshrl.u32 %v5608_v59, 16  ;;  %v1477_v2 = vor.u32 %v1476_v14, %v1472_v1  ;;  %v5659_v12 = vld [vmem:[#allocation2 + $0xa8] sm:$0xff]   ;;  %v4668_v20 = vld [vmem:[#allocation2 + $0xb0] ss:$0 sps:$4 sm:$0x11]  }
 0x17a   : > { %v1481_v21 = vrot.slane %v1479_v3, 1  ;;  %v2975_v26 = vrot.slane %v2973_v19, 1  ;;  %v2978_v4 = vshll.u32 %v5618_v18, 16  ;;  %v1489_v55 = vor.u32 %v1488_v29, %v1484_v52 }
 0x17b   : > { %2112 = vrot.lane.b32.xlu0 %v1991_v13, %s4817_s14  ;;  %v1493_v37 = vrot.slane %v1491_v27, 1  ;;  %v1510_v45 = vshll.u32 %v5624_v10, 16  ;;  %v1658_v22 = vsel %vm1656_vm12, %v4711_v39, %v1544_v56  ;;  %v1615_v47 = vrot.slane %v5624_v10, 1 }
 0x17c   : > { %1561 = vrot.lane.b32.xlu1 %v1470_v23, %s4817_s14  ;;  %v5627_v51 = vpop.permute.xlu1 %3158  ;;  %v5635_v15 = vpop.permute.xlu0 %1628  ;;  %v1616_v35 = vrot.slane %v4662_v60, 1  ;;  %v1691_v34 = vsel %vm1689_vm13, %v1658_v22, %v1625_v28  ;;  %v1482_v48 = vsel %vm1350_vm4, %v1477_v2, %v1481_v21  ;;  %v2976_v16 = vor.u32 %v2975_v26, %v2971_v41 }
 0x17d   : > { %v2980_v8 = vrot.slane %v2978_v4, 1  ;;  %v1498_v6 = vshll.u32 %v5633_v36, 16  ;;  %4394 = vmatprep.mubr.msk.bf16.mxu1 %vm2301_vm14, %v1691_v34  ;;  %v1494_v25 = vsel %vm1350_vm4, %v1489_v55, %v1493_v37  ;;  %v1508_v30 = vshrl.u32 %v5624_v10, 16  ;;  %v5679_v37 = vld [vmem:[#allocation2 + $0x6c] sm:$0xff]  }
 0x17e   : > { %v1512_v31 = vrot.slane %v1510_v45, 1  ;;  %v1515_v7 = vshll.u32 %v4662_v60, 16  ;;  %v1612_v49 = vrot.slane %v5633_v36, 1  ;;  %v1613_v43 = vrot.slane %v4664_v17, 1 }
 0x17f   : > { %1644 = vrot.lane.b32.xlu0 %v1608_v32, %s4818_s15  ;;  %v1503_v11 = vshll.u32 %v4664_v17, 16  ;;  %v2981_v58 = vsel %vm1350_vm4, %v2976_v16, %v2980_v8  ;;  %v1496_v28 = vshrl.u32 %v5633_v36, 16  ;;  %v1500_v63 = vrot.slane %v1498_v6, 1  ;;  %v4712_v6 = vld [vmem:[#allocation2 + $0x18] sm:$0xff]  }
 0x180   : > { %1646 = vrot.lane.b32.xlu1 %v1611_v33, %s4818_s15  ;;  %v5646_v53 = vpop.permute.xlu0 %2182  ;;  %v1617_v0 = vsel %vm1575_vm5, %v1615_v47, %v1616_v35  ;;  %v1513_v50 = vor.u32 %v1512_v31, %v1508_v30  ;;  %v1517_v56 = vrot.slane %v1515_v7, 1  ;;  %v1534_v9 = vshll.u32 %v5653_v54, 16  ;;  %v5673_v33 = vld [vmem:[#allocation2 + $0x78] sm:$0xff]   ;;  %v5685_v35 = vld [vmem:[#allocation2 + $0x80] ss:$0 sps:$4 sm:$0x11]  }
 0x181   : > { %v5648_v46 = vpop.permute.xlu1 %1626  ;;  %v1614_v1 = vsel %vm1575_vm5, %v1612_v49, %v1613_v43  ;;  %v1505_v13 = vrot.slane %v1503_v11, 1  ;;  %v1501_v14 = vor.u32 %v1500_v63, %v1496_v28  ;;  %v1621_v3 = vrot.slane %v5653_v54, 1  ;;  %v5693_v30 = vld [vmem:[#allocation2 + $0x74] ss:$0 sps:$4 sm:$0x11]   ;;  %v5697_v43 = vld [vmem:[#allocation2 + $0x78] sm:$0xff]  }
 0x182   : > { %v1622_v19 = vrot.slane %v4666_v57, 1  ;;  %v1522_v23 = vshll.u32 %v5659_v12, 16  ;;  %v1518_v52 = vsel %vm1350_vm4, %v1513_v50, %v1517_v56  ;;  %v1532_v29 = vshrl.u32 %v5653_v54, 16 }
 0x183   : > { %1563 = vrot.lane.b32.xlu0 %v1482_v48, %s4817_s14  ;;  %v1536_v27 = vrot.slane %v1534_v9, 1  ;;  %v1539_v32 = vshll.u32 %v4666_v57, 16  ;;  %v1618_v41 = vrot.slane %v5659_v12, 1  ;;  %v1619_v60 = vrot.slane %v4668_v20, 1 }
 0x184   : > { %1565 = vrot.lane.b32.xlu1 %v1494_v25, %s4817_s14  ;;  %v1527_v21 = vshll.u32 %v4668_v20, 16  ;;  %v1506_v26 = vsel %vm1350_vm4, %v1501_v14, %v1505_v13  ;;  %v1520_v4 = vshrl.u32 %v5659_v12, 16  ;;  %v1524_v55 = vrot.slane %v1522_v23, 1  ;;  %v4714_v13 = vld [vmem:[#allocation2 + $0x18] sm:$0xff]  }
 0x185   : > { %v1548_v5 = vpop.permute.xlu0 %1547  ;;  %v5665_v61 = vpop.permute.xlu1 %2180  ;;  %v1623_v39 = vsel %vm1575_vm5, %v1621_v3, %v1622_v19  ;;  %v1537_v22 = vor.u32 %v1536_v27, %v1532_v29  ;;  %v1541_v47 = vrot.slane %v1539_v32, 1  ;;  %v2985_v17 = vshll.u32 %v5673_v33, 16  ;;  %v5719_v3 = vld [vmem:[#allocation2 + $0x80] ss:$0 sps:$4 sm:$0x11]  }
 0x186   : > { %v1620_v34 = vsel %vm1575_vm5, %v1618_v41, %v1619_v60  ;;  %v1529_v48 = vrot.slane %v1527_v21, 1  ;;  %v3131_v16 = vrot.slane %v5608_v59, 1  ;;  %v3132_v8 = vrot.slane %v5618_v18, 1  ;;  %v4708_v18 = vld [vmem:[%s6318_s3 + $0x38] sm:$0xff]   ;;  %v4709_v27 = vld [vmem:[%s6318_s3 + $0x40] sm:$0xff]  }
 0x187   : > { %3092 = vrot.lane.b32.xlu0 %v2981_v58, %s4817_s14  ;;  %v1662_v25 = vsel %vm1656_vm12, %v4712_v6, %v1548_v5  ;;  %v1525_v7 = vor.u32 %v1524_v55, %v1520_v4  ;;  %v2983_v57 = vshrl.u32 %v5673_v33, 16  ;;  %v2007_v49 = vshll.u32 %v5679_v37, 16  ;;  %v4713_v58 = vld [vmem:[#allocation2 + $0xc] sm:$0xff]  }
 0x188   : > { %1650 = vrot.lane.b32.xlu1 %v1617_v0, %s4818_s15  ;;  %v1542_v28 = vsel %vm1350_vm4, %v1537_v22, %v1541_v47  ;;  %v2987_v63 = vrot.slane %v2985_v17, 1  ;;  %v2990_v5 = vshll.u32 %v5685_v35, 16  ;;  %v2153_v50 = vrot.slane %v5563_v62, 1  ;;  %v4681_v47 = vld [vmem:[#allocation2 + $0x8c] ss:$0 sps:$4 sm:$0x11]  }
 0x189   : > { %v1695_v56 = vsel %vm1689_vm13, %v1662_v25, %v5635_v15  ;;  %v2154_v9 = vrot.slane %v5560_v40, 1  ;;  %v2005_v20 = vshrl.u32 %v5679_v37, 16  ;;  %v1530_v62 = vsel %vm1350_vm4, %v1525_v7, %v1529_v48  ;;  %v5725_v40 = vld [vmem:[#allocation2 + $0x84] sm:$0xff]  }
 0x18a   : > { %v2009_v19 = vrot.slane %v2007_v49, 1  ;;  %v2019_v15 = vshll.u32 %v5697_v43, 16  ;;  %v2988_v32 = vor.u32 %v2987_v63, %v2983_v57  ;;  %v2992_v41 = vrot.slane %v2990_v5, 1  ;;  %v5760_v57 = vld [vmem:[#allocation2 + $0x84] sm:$0xff]  }
 0x18b   : > { %1648 = vrot.lane.b32.xlu0 %v1614_v1, %s4818_s15  ;;  %v2012_v1 = vshll.u32 %v5693_v30, 16  ;;  %v2155_v21 = vsel %vm1575_vm5, %v2153_v50, %v2154_v9  ;;  %v2024_v4 = vshll.u32 %v5719_v3, 16  ;;  %v2997_v17 = vshll.u32 %v5725_v40, 16  ;;  %v5769_v5 = vld [vmem:[#allocation2 + $0x98] ss:$0 sps:$4 sm:$0x11]  }
 0x18c   : > { %1569 = vrot.lane.b32.xlu1 %v1518_v52, %s4817_s14  ;;  %v2103_v2 = vpop.permute.xlu0 %2102  ;;  %v4715_v52 = vld [vmem:[#allocation2 + $0xc] sm:$0xff]   ;;  %v2021_v22 = vrot.slane %v2019_v15, 1  ;;  %v2156_v48 = vrot.slane %v5679_v37, 1  ;;  %v3134_v25 = vrot.slane %v5673_v33, 1  ;;  %v2995_v7 = vshrl.u32 %v5725_v40, 16 }
 0x18d   : > { %v2215_v14 = vsel %vm1656_vm12, %v4714_v13, %v2103_v2  ;;  %v2026_v6 = vrot.slane %v2024_v4, 1  ;;  %v5774_v50 = vld [vmem:[#allocation2 + $0x8c] ss:$0 sps:$4 sm:$0x11]   ;;  %v4716_v4 = vld [vmem:[#allocation2 + $0x30] sm:$0xff]  }
 0x18e   : > { %v5681_v45 = vpop.permute.xlu1 %3078  ;;  %v2247_v2 = vsel %vm1689_vm13, %v2215_v14, %v5646_v53  ;;  %v3137_v14 = vrot.slane %v5725_v40, 1 }
 0x18f   : > { %1567 = vrot.lane.b32.xlu0 %v1506_v26, %s4817_s14  ;;  %v2017_v26 = vshrl.u32 %v5697_v43, 16 }
 0x190   : > { %1654 = vrot.lane.b32.xlu1 %v1623_v39, %s4818_s15  ;;  %v2010_v39 = vor.u32 %v2009_v19, %v2005_v20  ;;  %v3138_v19 = vrot.slane %v4681_v47, 1 }
 0x192   : > { %v1546_v31 = vpop.permute.xlu0 %1545  ;;  %v5699_v11 = vpop.permute.xlu1 %3162 }
 0x193   : > { %v1660_v59 = vsel %vm1656_vm12, %v4713_v58, %v1546_v31  ;;  %1652 = vrot.lane.b32.xlu0 %v1620_v34, %s4818_s15  ;;  %v2993_v34 = vsel %vm1350_vm4, %v2988_v32, %v2992_v41  ;;  %v3135_v31 = vrot.slane %v5685_v35, 1  ;;  %v2029_v32 = vshrl.u32 %v5760_v57, 16 }
 0x194   : > { %v1693_v0 = vsel %vm1689_vm13, %v1660_v59, %v5648_v46  ;;  %1573 = vrot.lane.b32.xlu1 %v1542_v28, %s4817_s14  ;;  %v2022_v59 = vor.u32 %v2021_v22, %v2017_v26 }
 0x195   : > { %4395 = vmatmul.mubr.msk.bf16.vlgmr.msra.gmra.mrb[0].mxu1 %vm2301_vm14, %v1693_v0  ;;  %v3136_v0 = vsel %vm1575_vm5, %v3134_v25, %v3135_v31 }
 0x196   : > { %4398 = vmatprep.mubr.msk.bf16.mxu1 %vm2301_vm14, %v1695_v56  ;;  %v2101_v46 = vpop.permute.xlu0 %2100  ;;  %4427 = vmatpush3.bf16.msra.mxu1 %v5506_v24  ;;  %v5727_v23 = vpop.permute.xlu1 %1630  ;;  %v3133_v24 = vsel %vm1575_vm5, %v3131_v16, %v3132_v8  ;;  %v2157_v16 = vrot.slane %v5693_v30, 1  ;;  %v5754_v8 = vld [vmem:[#allocation2 + $0x90] sm:$0xff]   ;;  %v2999_v30 = vrot.slane %v2997_v17, 1  ;;  %v2031_v56 = vshll.u32 %v5760_v57, 16 }
 0x197   : > { %v2213_v29 = vsel %vm1656_vm12, %v4715_v52, %v2101_v46  ;;  %4428 = vmatprep.subr.bf16.mxu1 %v4708_v18  ;;  %1571 = vrot.lane.b32.xlu0 %v1530_v62, %s4817_s14  ;;  %v3009_v35 = vshll.u32 %v5754_v8, 16  ;;  %v2027_v20 = vsel %vm1350_vm4, %v2022_v59, %v2026_v6  ;;  %v5779_v46 = vld [vmem:[#allocation2 + $0x90] sm:$0xff]   ;;  %v3007_v15 = vshrl.u32 %v5754_v8, 16 }
 0x198   : > { %v2245_v60 = vsel %vm1689_vm13, %v2213_v29, %v5665_v61  ;;  %3172 = vrot.lane.b32.xlu1 %v3133_v24, %s4818_s15  ;;  %v2014_v61 = vrot.slane %v2012_v1, 1  ;;  %v2158_v63 = vsel %vm1575_vm5, %v2156_v48, %v2157_v16  ;;  %v3000_v1 = vor.u32 %v2999_v30, %v2995_v7  ;;  %v4717_v16 = vld [vmem:[#allocation2 + $0x24] sm:$0xff]  }
 0x199   : > { %4356 = vmatprep.mubr.msk.bf16.mxu0 %vm2301_vm14, %v2245_v60  ;;  %v3011_v52 = vrot.slane %v3009_v35, 1  ;;  %v3014_v29 = vshll.u32 %v5769_v5, 16  ;;  %v2159_v24 = vrot.slane %v5697_v43, 1  ;;  %v2033_v41 = vrot.slane %v2031_v56, 1 }
 0x19a   : > { %4357 = vmatmul.mubr.msk.bf16.vlgmr.msra.gmra.mrb[32].mxu0 %vm2301_vm14, %v2247_v2  ;;  %v5745_v55 = vpop.permute.xlu0 %1632  ;;  %4429 = vmatpush3.bf16.msra.mxu1 %v4708_v18  ;;  %v5748_v53 = vpop.permute.xlu1 %3160  ;;  %v2015_v58 = vsel %vm1350_vm4, %v2010_v39, %v2014_v61  ;;  %v3002_v18 = vshll.u32 %v4681_v47, 16  ;;  %v2036_v60 = vshll.u32 %v5774_v50, 16  ;;  %v2043_v26 = vshll.u32 %v5779_v46, 16  ;;  %v5796_v61 = vld [vmem:[#allocation2 + $0x9c] sm:$0xff]  }
 0x19b   : > { %4430 = vmatprep.subr.bf16.mxu1 %v4709_v27  ;;  %2194 = vrot.lane.b32.xlu0 %v2155_v21, %s4818_s15  ;;  %v2160_v21 = vrot.slane %v5719_v3, 1  ;;  %v3139_v17 = vsel %vm1575_vm5, %v3137_v14, %v3138_v19  ;;  %v3016_v48 = vrot.slane %v3014_v29, 1  ;;  %v2034_v25 = vor.u32 %v2033_v41, %v2029_v32 }
 0x19c   : > { %3094 = vrot.lane.b32.xlu1 %v2993_v34, %s4817_s14  ;;  %v3004_v13 = vrot.slane %v3002_v18, 1  ;;  %v3012_v34 = vor.u32 %v3011_v52, %v3007_v15  ;;  %v2038_v31 = vrot.slane %v2036_v60, 1  ;;  %v2041_v30 = vshrl.u32 %v5779_v46, 16 }
 0x19d   : > { %v2161_v59 = vsel %vm1575_vm5, %v2159_v24, %v2160_v21  ;;  %v2045_v18 = vrot.slane %v2043_v26, 1  ;;  %v3021_v35 = vshll.u32 %v5796_v61, 16  ;;  %v3140_v14 = vrot.slane %v5754_v8, 1  ;;  %v5832_v24 = vld [vmem:[#allocation2 + $0x9c] sm:$0xff]  }
 0x19e   : > { %v5762_v49 = vpop.permute.xlu0 %2186  ;;  %4431 = vmatpush3.bf16.msra.mxu1 %v4709_v27  ;;  %v5765_v28 = vpop.permute.xlu1 %2184  ;;  %v5787_v27 = vld [vmem:[#allocation2 + $0x98] ss:$0 sps:$4 sm:$0x11]   ;;  %v3005_v2 = vsel %vm1350_vm4, %v3000_v1, %v3004_v13  ;;  %v3017_v56 = vsel %vm1350_vm4, %v3012_v34, %v3016_v48  ;;  %v5821_v13 = vld [vmem:[#allocation2 + $0xa8] sm:$0xff]   ;;  %v2039_v15 = vsel %vm1350_vm4, %v2034_v25, %v2038_v31  ;;  %v3141_v29 = vrot.slane %v5769_v5, 1 }
 0x19f   : > { %2116 = vrot.lane.b32.xlu0 %v2015_v58, %s4817_s14  ;;  %v2048_v7 = vshll.u32 %v5787_v27, 16  ;;  %v2046_v32 = vor.u32 %v2045_v18, %v2041_v30  ;;  %v3023_v41 = vrot.slane %v3021_v35, 1  ;;  %v3033_v5 = vshll.u32 %v5821_v13, 16  ;;  %v4721_v34 = vld [vmem:[#allocation2 + $0x18] sm:$0xff]   ;;  %v5858_v30 = vld [vmem:[#allocation2 + $0xa8] sm:$0xff]  }
 0x1a0   : > { %2196 = vrot.lane.b32.xlu1 %v2158_v63, %s4818_s15  ;;  %v5810_v63 = vld [vmem:[#allocation2 + $0xa4] ss:$0 sps:$4 sm:$0x11]   ;;  %v3191_v48 = vsel %vm1656_vm12, %v4721_v34, %v5681_v45  ;;  %v2055_v25 = vshll.u32 %v5832_v24, 16  ;;  %v4722_v45 = vld [vmem:[#allocation2 + $0x30] sm:$0xff]  }
 0x1a1   : > { %v2050_v52 = vrot.slane %v2048_v7, 1  ;;  %v3026_v60 = vshll.u32 %v5810_v63, 16  ;;  %v5896_v34 = vld [vmem:[#allocation2 + $0xc0] sm:$0xff]  }
 0x1a2   : > { %v1552_v9 = vpop.permute.xlu0 %1551  ;;  %v5781_v62 = vpop.permute.xlu1 %3082 }
 0x1a3   : > { %2118 = vrot.lane.b32.xlu0 %v2027_v20, %s4817_s14  ;;  %v1666_v39 = vsel %vm1656_vm12, %v4716_v4, %v1552_v9  ;;  %v2163_v9 = vrot.slane %v5774_v50, 1  ;;  %v4718_v20 = vld [vmem:[#allocation2 + $0x24] sm:$0xff]   ;;  %v3019_v50 = vshrl.u32 %v5796_v61, 16  ;;  %v2051_v7 = vsel %vm1350_vm4, %v2046_v32, %v2050_v52 }
 0x1a4   : > { %3174 = vrot.lane.b32.xlu1 %v3136_v0, %s4818_s15  ;;  %v1699_v58 = vsel %vm1689_vm13, %v1666_v39, %v5745_v55  ;;  %v2162_v55 = vrot.slane %v5760_v57, 1  ;;  %v5840_v39 = vld [vmem:[#allocation2 + $0xb0] ss:$0 sps:$4 sm:$0x11]   ;;  %v2166_v52 = vrot.slane %v5787_v27, 1  ;;  %v2168_v27 = vrot.slane %v5832_v24, 1 }
 0x1a6   : > { %v1550_v22 = vpop.permute.xlu1 %1549  ;;  %v2107_v47 = vpop.permute.xlu0 %2106  ;;  %v2164_v4 = vsel %vm1575_vm5, %v2162_v55, %v2163_v9  ;;  %v3038_v55 = vshll.u32 %v5840_v39, 16  ;;  %v2057_v9 = vrot.slane %v2055_v25, 1 }
 0x1a7   : > { %3096 = vrot.lane.b32.xlu0 %v3005_v2, %s4817_s14  ;;  %v1664_v6 = vsel %vm1656_vm12, %v4717_v16, %v1550_v22  ;;  %v4719_v2 = vld [vmem:[#allocation2 + $0x30] sm:$0xff]   ;;  %v4720_v22 = vld [vmem:[#allocation2 + $0x24] sm:$0xff]   ;;  %v3142_v16 = vsel %vm1575_vm5, %v3140_v14, %v3141_v29 }
 0x1a8   : > { %3176 = vrot.lane.b32.xlu1 %v3139_v17, %s4818_s15  ;;  %v1697_v3 = vsel %vm1689_vm13, %v1664_v6, %v5727_v23  ;;  %v2219_v21 = vsel %vm1656_vm12, %v4719_v2, %v2107_v47  ;;  %v3143_v6 = vrot.slane %v5796_v61, 1  ;;  %v5882_v29 = vld [vmem:[#allocation2 + $0xb0] ss:$0 sps:$4 sm:$0x11]  }
 0x1a9   : > { %4399 = vmatmul.mubr.msk.bf16.gmra.mrb[4].mxu1 %vm2301_vm14, %v1697_v3  ;;  %v4694_v3 = vld [vmem:[#allocation2 + $0xa4] ss:$0 sps:$4 sm:$0x11]   ;;  %v2251_v31 = vsel %vm1689_vm13, %v2219_v21, %v5762_v49  ;;  %v3144_v49 = vrot.slane %v5810_v63, 1 }
 0x1aa   : > { %v5813_v0 = vpop.permute.xlu1 %3166  ;;  %4402 = vmatprep.mubr.msk.bf16.mxu1 %vm2301_vm14, %v1699_v58  ;;  %v3081_v23 = vpop.permute.xlu0 %3080  ;;  %v3195_v58 = vsel %vm1656_vm12, %v4722_v45, %v5781_v62  ;;  %v2053_v62 = vshrl.u32 %v5832_v24, 16 }
 0x1ab   : > { %2198 = vrot.lane.b32.xlu0 %v2161_v59, %s4818_s15  ;;  %v3193_v1 = vsel %vm1656_vm12, %v4718_v20, %v3081_v23  ;;  %v3024_v59 = vor.u32 %v3023_v41, %v3019_v50  ;;  %v3031_v23 = vshrl.u32 %v5821_v13, 16  ;;  %v2060_v20 = vshll.u32 %v4694_v3, 16 }
 0x1ac   : > { %3098 = vrot.lane.b32.xlu1 %v3017_v56, %s4817_s14  ;;  %v5827_v19 = vsel %vm1689_vm13, %v3193_v1, %v5748_v53  ;;  %v3035_v56 = vrot.slane %v3033_v5, 1  ;;  %v5873_v1 = vsel %vm1689_vm13, %v3191_v48, %v5627_v51  ;;  %v5877_v14 = vsel %vm1689_vm13, %v3195_v58, %v5699_v11  ;;  %v5910_v58 = vld [vmem:[#allocation2 + $0xb4] sm:$0xff]  }
 0x1ad   : > { %v2067_v50 = vshll.u32 %v5858_v30, 16  ;;  %v3145_v51 = vsel %vm1575_vm5, %v3143_v6, %v3144_v49  ;;  %v2058_v2 = vor.u32 %v2057_v9, %v2053_v62  ;;  %v2062_v21 = vrot.slane %v2060_v20, 1 }
 0x1ae   : > { %v5836_v26 = vpop.permute.xlu1 %1634  ;;  %v2105_v53 = vpop.permute.xlu0 %2104  ;;  %v3036_v11 = vor.u32 %v3035_v56, %v3031_v23  ;;  %v2065_v5 = vshrl.u32 %v5858_v30, 16  ;;  %v5912_v23 = vld [vmem:[#allocation2 + $0xc8] ss:$0 sps:$4 sm:$0x11]   ;;  %v2091_v56 = vshll.u32 %v5896_v34, 16  ;;  %v3147_v20 = vrot.slane %v5840_v39, 1 }
 0x1af   : > { %2120 = vrot.lane.b32.xlu0 %v2039_v15, %s4817_s14  ;;  %v2217_v17 = vsel %vm1656_vm12, %v4720_v22, %v2105_v53  ;;  %v2165_v15 = vrot.slane %v5779_v46, 1  ;;  %v2169_v53 = vrot.slane %v4694_v3, 1  ;;  %v2069_v22 = vrot.slane %v2067_v50, 1 }
 0x1b0   : > { %2200 = vrot.lane.b32.xlu1 %v2164_v4, %s4818_s15  ;;  %v2249_v47 = vsel %vm1689_vm13, %v2217_v17, %v5765_v28  ;;  %v3028_v28 = vrot.slane %v3026_v60, 1  ;;  %v3040_v60 = vrot.slane %v3038_v55, 1  ;;  %v2072_v17 = vshll.u32 %v5882_v29, 16  ;;  %v4724_v55 = vld [vmem:[#allocation2 + $0x48] sm:$0xff]  }
 0x1b1   : > { %4360 = vmatprep.mubr.msk.bf16.mxu0 %vm2301_vm14, %v2249_v47  ;;  %v2167_v4 = vsel %vm1575_vm5, %v2165_v15, %v2166_v52  ;;  %v2170_v45 = vsel %vm1575_vm5, %v2168_v27, %v2169_v53  ;;  %v4725_v52 = vld [vmem:[#allocation2 + $0x3c] sm:$0xff]   ;;  %v3149_v39 = vrot.slane %v5910_v58, 1  ;;  %v3045_v27 = vshll.u32 %v5910_v58, 16 }
 0x1b2   : > { %v5860_v18 = vpop.permute.xlu1 %3164  ;;  %4361 = vmatmul.mubr.msk.bf16.gmra.mrb[36].mxu0 %vm2301_vm14, %v2251_v31  ;;  %v5863_v35 = vpop.permute.xlu0 %1636  ;;  %v3029_v63 = vsel %vm1350_vm4, %v3024_v59, %v3028_v28  ;;  %v3041_v47 = vsel %vm1350_vm4, %v3036_v11, %v3040_v60  ;;  %v5901_v31 = vld [vmem:[#allocation2 + $0xc0] sm:$0xff]   ;;  %v4698_v59 = vld [vmem:[#allocation2 + $0xbc] ss:$0 sps:$4 sm:$0x11]   ;;  %v2070_v28 = vor.u32 %v2069_v22, %v2065_v5  ;;  %v2074_v49 = vrot.slane %v2072_v17, 1  ;;  %v5926_v60 = vld [vmem:[#allocation2 + $0xcc] sm:$0xff]  }
 0x1b3   : > { %2122 = vrot.lane.b32.xlu0 %v2051_v7, %s4817_s14  ;;  %v2063_v7 = vsel %vm1350_vm4, %v2058_v2, %v2062_v21  ;;  %v3057_v15 = vshll.u32 %v5901_v31, 16  ;;  %v2172_v11 = vrot.slane %v5882_v29, 1  ;;  %v3150_v21 = vrot.slane %v4698_v59, 1 }
 0x1b4   : > { %3178 = vrot.lane.b32.xlu1 %v3142_v16, %s4818_s15  ;;  %v4723_v16 = vld [vmem:[#allocation2 + $0x48] sm:$0xff]   ;;  %v2075_v5 = vsel %vm1350_vm4, %v2070_v28, %v2074_v49  ;;  %v2089_v29 = vshrl.u32 %v5896_v34, 16  ;;  %v2093_v22 = vrot.slane %v2091_v56, 1  ;;  %v2096_v17 = vshll.u32 %v5912_v23, 16 }
 0x1b6   : > { %v5885_v32 = vpop.permute.xlu1 %2188  ;;  %v5887_v41 = vpop.permute.xlu0 %2190  ;;  %v2094_v49 = vor.u32 %v2093_v22, %v2089_v29  ;;  %v2098_v56 = vrot.slane %v2096_v17, 1 }
 0x1b7   : > { %3100 = vrot.lane.b32.xlu0 %v3029_v63, %s4817_s14  ;;  %v5919_v63 = vld [vmem:[#allocation2 + $0xc8] ss:$0 sps:$4 sm:$0x11]  }
 0x1b8   : > { %3180 = vrot.lane.b32.xlu1 %v3145_v51, %s4818_s15  ;;  %v2171_v51 = vrot.slane %v5858_v30, 1 }
 0x1ba   : > { %v3087_v48 = vpop.permute.xlu1 %3086  ;;  %v1556_v25 = vpop.permute.xlu0 %1555  ;;  %v2173_v28 = vsel %vm1575_vm5, %v2171_v51, %v2172_v11  ;;  %v4726_v11 = vld [vmem:[#allocation2 + $0x3c] sm:$0xff]  }
 0x1bb   : > { %2202 = vrot.lane.b32.xlu0 %v2167_v4, %s4818_s15  ;;  %v3199_v6 = vsel %vm1656_vm12, %v4723_v16, %v3087_v48  ;;  %v1670_v62 = vsel %vm1656_vm12, %v4724_v55, %v1556_v25  ;;  %v3055_v48 = vshrl.u32 %v5901_v31, 16  ;;  %v3062_v16 = vshll.u32 %v5919_v63, 16  ;;  %v5949_v55 = vld [vmem:[#allocation2 + $0xb4] sm:$0xff]  }
 0x1bc   : > { %3102 = vrot.lane.b32.xlu1 %v3041_v47, %s4817_s14  ;;  %v5906_v3 = vsel %vm1689_vm13, %v3199_v6, %v5813_v0  ;;  %v3146_v0 = vrot.slane %v5821_v13, 1  ;;  %v1703_v4 = vsel %vm1689_vm13, %v1670_v62, %v5863_v35  ;;  %v3059_v47 = vrot.slane %v3057_v15, 1  ;;  %v5944_v35 = vld [vmem:[#allocation2 + $0xd4] ss:$0 sps:$4 sm:$0x11]  }
 0x1bd   : > { %v3069_v6 = vshll.u32 %v5926_v60, 16  ;;  %v3043_v25 = vshrl.u32 %v5910_v58, 16  ;;  %v3151_v62 = vsel %vm1575_vm5, %v3149_v39, %v3150_v21  ;;  %v3074_v51 = vshll.u32 %v5944_v35, 16 }
 0x1be   : > { %v1554_v9 = vpop.permute.xlu1 %1553  ;;  %v2111_v53 = vpop.permute.xlu0 %2110  ;;  %v2099_v21 = vsel %vm1350_vm4, %v2094_v49, %v2098_v56  ;;  %v2174_v22 = vrot.slane %v5949_v55, 1 }
 0x1bf   : > { %2124 = vrot.lane.b32.xlu0 %v2063_v7, %s4817_s14  ;;  %v1668_v50 = vsel %vm1656_vm12, %v4725_v52, %v1554_v9  ;;  %v3047_v7 = vrot.slane %v3045_v27, 1  ;;  %v3060_v9 = vor.u32 %v3059_v47, %v3055_v48 }
 0x1c0   : > { %2204 = vrot.lane.b32.xlu1 %v2170_v45, %s4818_s15  ;;  %v1701_v2 = vsel %vm1689_vm13, %v1668_v50, %v5836_v26  ;;  %v3148_v26 = vsel %vm1575_vm5, %v3146_v0, %v3147_v20  ;;  %v3050_v45 = vshll.u32 %v4698_v59, 16  ;;  %v3064_v0 = vrot.slane %v3062_v16, 1  ;;  %v4704_v20 = vld [vmem:[#allocation2 + $0xbc] ss:$0 sps:$4 sm:$0x11]  }
 0x1c1   : > { %4403 = vmatmul.mubr.msk.bf16.gmra.mrb[8].mxu1 %vm2301_vm14, %v1701_v2  ;;  %v3067_v59 = vshrl.u32 %v5926_v60, 16  ;;  %v3071_v50 = vrot.slane %v3069_v6, 1  ;;  %v3048_v27 = vor.u32 %v3047_v7, %v3043_v25  ;;  %v2175_v17 = vrot.slane %v4704_v20, 1  ;;  %v4728_v7 = vld [vmem:[#allocation2 + $0x3c] sm:$0xff]  }
 0x1c2   : > { %4406 = vmatprep.mubr.msk.bf16.mxu1 %vm2301_vm14, %v1703_v4  ;;  %v5953_v15 = vpop.permute.xlu1 %3170  ;;  %v3052_v4 = vrot.slane %v3050_v45, 1  ;;  %v3065_v29 = vsel %vm1350_vm4, %v3060_v9, %v3064_v0  ;;  %v3076_v16 = vrot.slane %v3074_v51, 1  ;;  %v2084_v56 = vshll.u32 %v4704_v20, 16 }
 0x1c3   : > { %2126 = vrot.lane.b32.xlu0 %v2075_v5, %s4817_s14  ;;  %v2079_v5 = vshll.u32 %v5949_v55, 16  ;;  %v3072_v47 = vor.u32 %v3071_v50, %v3067_v59  ;;  %v3152_v9 = vrot.slane %v5901_v31, 1  ;;  %v3153_v0 = vrot.slane %v5919_v63, 1 }
 0x1c4   : > { %3182 = vrot.lane.b32.xlu1 %v3148_v26, %s4818_s15  ;;  %v4727_v26 = vld [vmem:[#allocation2 + $0x48] sm:$0xff]   ;;  %v3053_v6 = vsel %vm1350_vm4, %v3048_v27, %v3052_v4  ;;  %v3156_v59 = vrot.slane %v5944_v35, 1  ;;  %v2086_v51 = vrot.slane %v2084_v56, 1  ;;  %v2177_v27 = vrot.slane %v5896_v34, 1 }
 0x1c5   : > { %v2223_v48 = vsel %vm1656_vm12, %v4727_v26, %v2111_v53  ;;  %v2081_v49 = vrot.slane %v2079_v5, 1  ;;  %v2176_v53 = vsel %vm1575_vm5, %v2174_v22, %v2175_v17  ;;  %v3077_v20 = vsel %vm1350_vm4, %v3072_v47, %v3076_v16  ;;  %v4729_v17 = vld [vmem:[#allocation2 + $0x60] sm:$0xff]  }
 0x1c6   : > { %v3154_v63 = vsel %vm1575_vm5, %v3152_v9, %v3153_v0  ;;  %v2178_v4 = vrot.slane %v5912_v23, 1  ;;  %v4730_v47 = vld [vmem:[#allocation2 + $0x60] sm:$0xff]  }
 0x1c7   : > { %2206 = vrot.lane.b32.xlu0 %v2173_v28, %s4818_s15  ;;  %v3085_v52 = vpop.permute.xlu0 %3084  ;;  %v1639_v25 = vpop.permute.xlu1 %1638  ;;  %v2077_v28 = vshrl.u32 %v5949_v55, 16 }
 0x1c8   : > { %3184 = vrot.lane.b32.xlu1 %v3151_v62, %s4818_s15  ;;  %v3197_v2 = vsel %vm1656_vm12, %v4726_v11, %v3085_v52  ;;  %v2255_v52 = vsel %vm1689_vm13, %v2223_v48, %v5887_v41  ;;  %v2179_v5 = vsel %vm1575_vm5, %v2177_v27, %v2178_v4 }
 0x1c9   : > { %v5961_v39 = vsel %vm1689_vm13, %v3197_v2, %v5860_v18  ;;  %v2082_v50 = vor.u32 %v2081_v49, %v2077_v28 }
 0x1cb   : > { %2130 = vrot.lane.b32.xlu0 %v2099_v21, %s4817_s14  ;;  %v2087_v2 = vsel %vm1350_vm4, %v2082_v50, %v2086_v51 }
 0x1cc   : > { %3106 = vrot.lane.b32.xlu1 %v3065_v29, %s4817_s14  ;;  %v2109_v18 = vpop.permute.xlu0 %2108 }
 0x1cd   : > { %v2221_v45 = vsel %vm1656_vm12, %v4728_v7, %v2109_v18  ;;  %v5989_v11 = vpop.permute.xlu1 %3168 }
 0x1ce   : > { %v2253_v62 = vsel %vm1689_vm13, %v2221_v45, %v5885_v32  ;;  %v3155_v32 = vrot.slane %v5926_v60, 1 }
 0x1cf   : > { %3104 = vrot.lane.b32.xlu0 %v3053_v6, %s4817_s14  ;;  %4364 = vmatprep.mubr.msk.bf16.mxu0 %vm2301_vm14, %v2253_v62  ;;  %v4731_v6 = vld [vmem:[#allocation2 + $0x54] sm:$0xff]  }
 0x1d0   : > { %2208 = vrot.lane.b32.xlu1 %v2176_v53, %s4818_s15  ;;  %4365 = vmatmul.mubr.msk.bf16.gmra.mrb[40].mxu0 %vm2301_vm14, %v2255_v52  ;;  %v3157_v41 = vsel %vm1575_vm5, %v3155_v32, %v3156_v59  ;;  %v1641_v35 = vpop.permute.xlu0 %1640  ;;  %v4732_v62 = vld [vmem:[#allocation2 + $0x54] sm:$0xff]  }
 0x1d3   : > { %3108 = vrot.lane.b32.xlu0 %v3077_v20, %s4817_s14  ;;  %v2193_v21 = vpop.permute.xlu1 %2192 }
 0x1d4   : > { %3186 = vrot.lane.b32.xlu1 %v3154_v63, %s4818_s15 }
 0x1d7   : > { %2128 = vrot.lane.b32.xlu0 %v2087_v2, %s4817_s14  ;;  %s229_s14 = sand.u32 1, %s4798_s19  }
 0x1d8   : > { %3188 = vrot.lane.b32.xlu1 %v3157_v41, %s4818_s15  ;;  %v1560_v29 = vpop.permute.xlu0 %1559  ;;  %s3809_s11 = sshll.u32 %s229_s14, 7  ;;  %s6269_s21 = scalar_lea.sflag [#allocation4], %s229_s14 }
 0x1d9   : > { %v1674_v16 = vsel %vm1656_vm12, %v4730_v47, %v1560_v29  ;;  %s6154_s12 = scalar_lea.vmem [#allocation3], %s3809_s11 }
 0x1da   : > { %v1707_v49 = vsel %vm1689_vm13, %v1674_v16, %v1641_v35  ;;  %s3721_s16 = sshll.u32 %s6154_s12, 4  ;;  %s6259_s16 = int_to_ptr.vmem [resolvable:$true] %s3721_s16 }
 0x1db   : > { %2210 = vrot.lane.b32.xlu0 %v2179_v5, %s4818_s15  ;;  %s4736_s27 = scalar_lea.vmem %s6259_s16, 2048  ;;  %p4743_p1 = scmp.lt.s32.totalorder %s6259_s16, %s4741_s7 }
 0x1dc   : > { %p4737_p12 = scmp.ne.s32.totalorder %s6259_s16, %s4736_s27  ;;  %p4744_p2 = scmp.lt.s32.totalorder %s4742_s8, %s4736_s27 }
 0x1de   : > { %p4738_p13 = pnand %p4737_p12, %p4892_p4  ;;  %p4745_p3 = por %p4744_p2, %p4743_p1 }
 0x1df   : > { %v3091_v22 = vpop.permute.xlu1 %3090 }
 0x1e0   : > { %v3203_v26 = vsel %vm1656_vm12, %v4729_v17, %v3091_v22  ;;  %p4739_p0 = pneg %p4738_p13 }
 0x1e1   : > { %v6003_v48 = vsel %vm1689_vm13, %v3203_v26, %v5953_v15 }
 0x1e2   : > { %p4746_p5 = pnand %p4745_p3, %p4739_p0 }
 0x1e5   : > { %v2115_v23 = vpop.permute.xlu0 %2114 }
 0x1e6   : > { %v1558_v18 = vpop.permute.xlu1 %1557 }
 0x1e7   : > { %v1672_v7 = vsel %vm1656_vm12, %v4731_v6, %v1558_v18 }
 0x1e8   : > { %v1705_v45 = vsel %vm1689_vm13, %v1672_v7, %v1639_v25  ;;  %v4733_v7 = vld [vmem:[#allocation2 + $0x60] sm:$0xff]  }
 0x1e9   : > { %v6008_v28 = vpop.permute.xlu0 %3088  ;;  %4407 = vmatmul.mubr.msk.bf16.gmra.mrb[12].mxu1 %vm2301_vm14, %v1705_v45  ;;  %v2227_v45 = vsel %vm1656_vm12, %v4733_v7, %v2115_v23 }
 0x1ea   : > { %v1643_v56 = vpop.permute.xlu1 %1642  ;;  %4410 = vmatprep.mubr.msk.bf16.mxu1 %vm2301_vm14, %v1707_v49 }
 0x1ed   : > { %v2113_v15 = vpop.permute.xlu0 %2112 }
 0x1ee   : > { %v2225_v53 = vsel %vm1656_vm12, %v4732_v62, %v2113_v15  ;;  %v1562_v9 = vpop.permute.xlu1 %1561 }
 0x1ef   : > { %v2257_v0 = vsel %vm1689_vm13, %v2225_v53, %v2193_v21  ;;  %v1676_v52 = vsel %vm1656_vm12, %v5590_v44, %v1562_v9 }
 0x1f0   : > { %4368 = vmatprep.mubr.msk.bf16.mxu0 %vm2301_vm14, %v2257_v0  ;;  %v1709_v25 = vsel %vm1689_vm13, %v1676_v52, %v1643_v56 }
 0x1f1   : > { %v1645_v20 = vpop.permute.xlu0 %1644  ;;  %4411 = vmatmul.mubr.msk.bf16.gmra.mrb[16].mxu1 %vm2301_vm14, %v1709_v25 }
 0x1f2   : > { %v1647_v32 = vpop.permute.xlu1 %1646 }
 0x1f5   : > { %v1564_v59 = vpop.permute.xlu0 %1563 }
 0x1f6   : > { %v1678_v50 = vsel %vm1656_vm12, %v5595_v42, %v1564_v59  ;;  %v1566_v51 = vpop.permute.xlu1 %1565 }
 0x1f7   : > { %v1711_v63 = vsel %vm1689_vm13, %v1678_v50, %v1645_v20  ;;  %v1680_v41 = vsel %vm1656_vm12, %v5600_v38, %v1566_v51  ;;  %v4734_v20 = vld [vmem:[#allocation2 + $0x54] sm:$0xff]  }
 0x1f8   : > { %4414 = vmatprep.mubr.msk.bf16.mxu1 %vm2301_vm14, %v1711_v63  ;;  %v1713_v44 = vsel %vm1689_vm13, %v1680_v41, %v1647_v32  ;;  %v4735_v41 = vld [vmem:[#allocation2 + $0x6c] sm:$0xff]  }
 0x1f9   : > { %v6027_v2 = vpop.permute.xlu0 %3092  ;;  %4415 = vmatmul.mubr.msk.bf16.gmra.mrb[20].mxu1 %vm2301_vm14, %v1713_v44 }
 0x1fa   : > { %v1651_v27 = vpop.permute.xlu1 %1650 }
 0x1fd   : > { %v1649_v4 = vpop.permute.xlu0 %1648 }
 0x1fe   : > { %v1570_v35 = vpop.permute.xlu1 %1569 }
 0x1ff   : > { %v1684_v42 = vsel %vm1656_vm12, %v5624_v10, %v1570_v35 }
 0x200   : > { %v1717_v38 = vsel %vm1689_vm13, %v1684_v42, %v1651_v27 }
 0x201   : > { %v1568_v21 = vpop.permute.xlu0 %1567 }
 0x202   : > { %v1682_v5 = vsel %vm1656_vm12, %v5633_v36, %v1568_v21  ;;  %v1655_v29 = vpop.permute.xlu1 %1654 }
 0x203   : > { %v1715_v22 = vsel %vm1689_vm13, %v1682_v5, %v1649_v4 }
 0x204   : > { %4418 = vmatprep.mubr.msk.bf16.mxu1 %vm2301_vm14, %v1715_v22 }
 0x205   : > { %4419 = vmatmul.mubr.msk.bf16.gmra.mrb[24].mxu1 %vm2301_vm14, %v1717_v38  ;;  %v1653_v17 = vpop.permute.xlu0 %1652 }
 0x206   : > { %v1574_v26 = vpop.permute.xlu1 %1573 }
 0x207   : > { %v1688_v47 = vsel %vm1656_vm12, %v5653_v54, %v1574_v26 }
 0x208   : > { %v1721_v36 = vsel %vm1689_vm13, %v1688_v47, %v1655_v29 }
 0x209   : > { %v1572_v16 = vpop.permute.xlu0 %1571 }
 0x20a   : > { %v1686_v10 = vsel %vm1656_vm12, %v5659_v12, %v1572_v16  ;;  %v3173_v18 = vpop.permute.xlu1 %3172 }
 0x20b   : > { %v1719_v6 = vsel %vm1689_vm13, %v1686_v10, %v1653_v17 }
 0x20c   : > { %4422 = vmatprep.mubr.msk.bf16.mxu1 %vm2301_vm14, %v1719_v6 }
 0x20d   : > { %4423 = vmatmul.mubr.msk.bf16.gmra.mrb[28].mxu1 %vm2301_vm14, %v1721_v36  ;;  %v2195_v49 = vpop.permute.xlu0 %2194 }
 0x20e   : > { %v2259_v56 = vsel %vm1689_vm13, %v2227_v45, %v2195_v49  ;;  %4432 = vmatprep.mubr.msk.bf16.mxu1 %vm2301_vm14, %v5873_v1  ;;  %v3095_v54 = vpop.permute.xlu1 %3094 }
 0x20f   : > { %4369 = vmatmul.mubr.msk.bf16.gmra.mrb[44].mxu0 %vm2301_vm14, %v2259_v56 }
 0x211   : > { %v2117_v12 = vpop.permute.xlu0 %2116 }
 0x212   : > { %v2229_v15 = vsel %vm1656_vm12, %v5679_v37, %v2117_v12  ;;  %v2197_v62 = vpop.permute.xlu1 %2196 }
 0x213   : > { %v2261_v53 = vsel %vm1689_vm13, %v2229_v15, %v2197_v62 }
 0x214   : > { %4372 = vmatprep.mubr.msk.bf16.mxu0 %vm2301_vm14, %v2261_v53 }
 0x215   : > { %4433 = vmatmul.mubr.msk.bf16.vlgmr.msra.gmra.mrb[0].mxu1 %vm2301_vm14, %v5827_v19  ;;  %v2119_v23 = vpop.permute.xlu0 %2118 }
 0x216   : > { %4436 = vmatprep.mubr.msk.bf16.mxu1 %vm2301_vm14, %v5877_v14  ;;  %v3175_v1 = vpop.permute.xlu1 %3174  ;;  %v2231_v52 = vsel %vm1656_vm12, %v5697_v43, %v2119_v23  ;;  %v3201_v14 = vsel %vm1656_vm12, %v4734_v20, %v6008_v28 }
 0x217   : > { %v3233_v50 = vsel %vm1689_vm13, %v3201_v14, %v5989_v11  ;;  %v3207_v11 = vsel %vm1656_vm12, %v5673_v33, %v3095_v54 }
 0x218   : > { %v3239_v27 = vsel %vm1689_vm13, %v3207_v11, %v3175_v1 }
 0x219   : > { %v3097_v9 = vpop.permute.xlu0 %3096 }
 0x21a   : > { %v3177_v0 = vpop.permute.xlu1 %3176  ;;  %v3209_v5 = vsel %vm1656_vm12, %v5725_v40, %v3097_v9 }
 0x21b   : > { %v3241_v29 = vsel %vm1689_vm13, %v3209_v5, %v3177_v0 }
 0x21d   : > { %4437 = vmatmul.mubr.msk.bf16.gmra.mrb[4].mxu1 %vm2301_vm14, %v5961_v39  ;;  %v2199_v37 = vpop.permute.xlu0 %2198 }
 0x21e   : > { %v2263_v25 = vsel %vm1689_vm13, %v2231_v52, %v2199_v37  ;;  %4440 = vmatprep.mubr.msk.bf16.mxu1 %vm2301_vm14, %v5906_v3  ;;  %v3099_v19 = vpop.permute.xlu1 %3098 }
 0x21f   : > { %4373 = vmatmul.mubr.msk.bf16.gmra.mrb[48].mxu0 %vm2301_vm14, %v2263_v25  ;;  %v3211_v38 = vsel %vm1656_vm12, %v5754_v8, %v3099_v19 }
 0x221   : > { %v2121_v32 = vpop.permute.xlu0 %2120 }
 0x222   : > { %v2233_v43 = vsel %vm1656_vm12, %v5760_v57, %v2121_v32  ;;  %v2201_v59 = vpop.permute.xlu1 %2200  ;;  %v3205_v57 = vsel %vm1656_vm12, %v4735_v41, %v6027_v2 }
 0x223   : > { %v2265_v39 = vsel %vm1689_vm13, %v2233_v43, %v2201_v59  ;;  %v3237_v44 = vsel %vm1689_vm13, %v3205_v57, %v3173_v18 }
 0x224   : > { %4376 = vmatprep.mubr.msk.bf16.mxu0 %vm2301_vm14, %v2265_v39 }
 0x225   : > { %4441 = vmatmul.mubr.msk.bf16.gmra.mrb[8].mxu1 %vm2301_vm14, %v3233_v50  ;;  %v2123_v3 = vpop.permute.xlu0 %2122 }
 0x226   : > { %4444 = vmatprep.mubr.msk.bf16.mxu1 %vm2301_vm14, %v6003_v48  ;;  %v3179_v51 = vpop.permute.xlu1 %3178  ;;  %v2235_v4 = vsel %vm1656_vm12, %v5779_v46, %v2123_v3 }
 0x227   : > { %v3243_v22 = vsel %vm1689_vm13, %v3211_v38, %v3179_v51 }
 0x229   : > { %v3101_v28 = vpop.permute.xlu0 %3100 }
 0x22a   : > { %v3181_v63 = vpop.permute.xlu1 %3180  ;;  %v3213_v8 = vsel %vm1656_vm12, %v5796_v61, %v3101_v28 }
 0x22b   : > { %v3245_v10 = vsel %vm1689_vm13, %v3213_v8, %v3181_v63  ;;  %v6146_v63 = vld [vmem:[%s6319_s4] ss:$0 sm:$0xff] }
 0x22d   : > { %4445 = vmatmul.mubr.msk.bf16.gmra.mrb[12].mxu1 %vm2301_vm14, %v3237_v44  ;;  %v2203_v48 = vpop.permute.xlu0 %2202 }
 0x22e   : > { %v2267_v35 = vsel %vm1689_vm13, %v2235_v4, %v2203_v48  ;;  %4448 = vmatprep.mubr.msk.bf16.mxu1 %vm2301_vm14, %v3239_v27  ;;  %v3103_v42 = vpop.permute.xlu1 %3102 }
 0x22f   : > { %4377 = vmatmul.mubr.msk.bf16.gmra.mrb[52].mxu0 %vm2301_vm14, %v2267_v35  ;;  %v3215_v18 = vsel %vm1656_vm12, %v5821_v13, %v3103_v42 }
 0x231   : > { %v2125_v2 = vpop.permute.xlu0 %2124 }
 0x232   : > { %v2237_v21 = vsel %vm1656_vm12, %v5832_v24, %v2125_v2  ;;  %v2205_v33 = vpop.permute.xlu1 %2204 }
 0x233   : > { %v2269_v46 = vsel %vm1689_vm13, %v2237_v21, %v2205_v33 }
 0x234   : > { %4380 = vmatprep.mubr.msk.bf16.mxu0 %vm2301_vm14, %v2269_v46 }
 0x235   : > { %4449 = vmatmul.mubr.msk.bf16.gmra.mrb[16].mxu1 %vm2301_vm14, %v3241_v29  ;;  %v2127_v17 = vpop.permute.xlu0 %2126 }
 0x236   : > { %4452 = vmatprep.mubr.msk.bf16.mxu1 %vm2301_vm14, %v3243_v22  ;;  %v3183_v24 = vpop.permute.xlu1 %3182  ;;  %v2239_v40 = vsel %vm1656_vm12, %v5858_v30, %v2127_v17 }
 0x237   : > { %v3247_v36 = vsel %vm1689_vm13, %v3215_v18, %v3183_v24 }
 0x239   : > { %v2207_v26 = vpop.permute.xlu0 %2206 }
 0x23a   : > { %v2271_v47 = vsel %vm1689_vm13, %v2239_v40, %v2207_v26  ;;  %v3185_v16 = vpop.permute.xlu1 %3184 }
 0x23b   : > { %4381 = vmatmul.mubr.msk.bf16.gmra.mrb[56].mxu0 %vm2301_vm14, %v2271_v47 }
 0x23d   : > { %4453 = vmatmul.mubr.msk.bf16.gmra.mrb[20].mxu1 %vm2301_vm14, %v3245_v10  ;;  %v2131_v6 = vpop.permute.xlu0 %2130 }
 0x23e   : > { %4456 = vmatprep.mubr.msk.bf16.mxu1 %vm2301_vm14, %v3247_v36  ;;  %v3107_v30 = vpop.permute.xlu1 %3106 }
 0x23f   : > { %v3219_v13 = vsel %vm1656_vm12, %v5901_v31, %v3107_v30  ;;  %v2243_v31 = vsel %vm1656_vm12, %v5896_v34, %v2131_v6 }
 0x241   : > { %v3105_v7 = vpop.permute.xlu0 %3104 }
 0x242   : > { %v3217_v45 = vsel %vm1656_vm12, %v5910_v58, %v3105_v7  ;;  %v2209_v61 = vpop.permute.xlu1 %2208 }
 0x243   : > { %v3249_v49 = vsel %vm1689_vm13, %v3217_v45, %v3185_v16 }
 0x245   : > { %4457 = vmatmul.mubr.msk.bf16.gmra.mrb[24].mxu1 %vm2301_vm14, %v3249_v49  ;;  %v3109_v56 = vpop.permute.xlu0 %3108 }
 0x246   : > { %v3187_v54 = vpop.permute.xlu1 %3186  ;;  %v3221_v62 = vsel %vm1656_vm12, %v5926_v60, %v3109_v56 }
 0x247   : > { %v3251_v12 = vsel %vm1689_vm13, %v3219_v13, %v3187_v54 }
 0x248   : > { %4460 = vmatprep.mubr.msk.bf16.mxu1 %vm2301_vm14, %v3251_v12 }
 0x249   : > { %v2129_v15 = vpop.permute.xlu0 %2128 }
 0x24a   : > { %v2241_v58 = vsel %vm1656_vm12, %v5949_v55, %v2129_v15  ;;  %v3189_v53 = vpop.permute.xlu1 %3188 }
 0x24b   : > { %v2273_v23 = vsel %vm1689_vm13, %v2241_v58, %v2209_v61  ;;  %v3253_v1 = vsel %vm1689_vm13, %v3221_v62, %v3189_v53 }
 0x24c   : > { %4384 = vmatprep.mubr.msk.bf16.mxu0 %vm2301_vm14, %v2273_v23 }
 0x24d   : > { %v2211_v9 = vpop.permute.xlu0 %2210  ;;  %4461 = vmatmul.mubr.msk.bf16.gmra.mrb[28].mxu1 %vm2301_vm14, %v3253_v1 }
 0x24e   : > { %v2275_v0 = vsel %vm1689_vm13, %v2243_v31, %v2211_v9 }
 0x24f   : > { %4385 = vmatmul.mubr.msk.bf16.gmra.mrb[60].mxu0 %vm2301_vm14, %v2275_v0 }
 0x26d   : > { %v4358_v60 = vpop.f32.mrb[32].mxu0 }
 0x26e   : > { %v2368_v55 = vpop.f32.mrb[33].mxu0 }
 0x26f   : > { %v4359_v52 = vpop.f32.mrb[34].mxu0 }
 0x270   : > { %v2371_v37 = vpop.f32.mrb[35].mxu0 }
 0x285   : > { %v4362_v25 = vpop.f32.mrb[36].mxu0 }
 0x286   : > { %v2384_v19 = vpop.f32.mrb[37].mxu0 }
 0x287   : > { %v4363_v20 = vpop.f32.mrb[38].mxu0 }
 0x288   : > { %v2387_v14 = vpop.f32.mrb[39].mxu0 }
 0x2a3   : > { %v4366_v32 = vpop.f32.mrb[40].mxu0 }
 0x2a4   : > { %v2400_v43 = vpop.f32.mrb[41].mxu0 }
 0x2a5   : > { %v4367_v34 = vpop.f32.mrb[42].mxu0 }
 0x2a6   : > { %v2403_v59 = vpop.f32.mrb[43].mxu0 }
 0x2e2   : > { %v6134_v39 = vpop.f32.mrb[44].mxu0 }
 0x2e3   : > { %v6136_v50 = vpop.f32.mrb[45].mxu0 }
 0x2e4   : > { %v6138_v3 = vpop.f32.mrb[46].mxu0 }
 0x2e5   : > { %v6140_v51 = vpop.f32.mrb[47].mxu0 }
 0x2e8   : > { %v4434_v28 = vpop.f32.mrb[0].mxu1 }
 0x2e9   : > { %v4464_v41 = vadd.f32 %v4434_v28, %v4358_v60  ;;  %v3345_v57 = vpop.f32.mrb[1].mxu1 }
 0x2ea   : > { %v4465_v44 = vadd.f32 %v3345_v57, %v2368_v55  ;;  %v4435_v11 = vpop.f32.mrb[2].mxu1 }
 0x2eb   : > { %v3513_v27 = vadd.f32 %v4464_v41, %v6146_v63  ;;  %v4466_v4 = vadd.f32 %v4435_v11, %v4359_v52  ;;  %v3348_v48 = vpop.f32.mrb[3].mxu1 }
 0x2ec   : > { %v3511_v35 = vadd.f32 %v4465_v44, %v6146_v63  ;;  %v4467_v42 = vadd.f32 %v3348_v48, %v2371_v37 }
 0x2ed   : > { %v4211_v2 = vpack.c.bf16 %v3513_v27, %v3513_v27  ;;  %v3514_v21 = vadd.f32 %v4466_v4, %v6146_v63 }
 0x2ee   : > { %v4209_v33 = vpack.c.bf16 %v3511_v35, %v3511_v35  ;;  %v3512_v5 = vadd.f32 %v4467_v42, %v6146_v63 }
 0x2ef   : > { %3674 = vst.msk [vmem:[%s6154_s12 + $0x8] sm:$0xf] %vm243_vm1, %v4211_v2  ;;  %v4212_v46 = vpack.c.bf16 %v3514_v21, %v3514_v21 }
 0x2f0   : > { %3672 = vst.msk [vmem:[%s6154_s12] sm:$0xf] %vm243_vm1, %v4209_v33  ;;  %v4210_v29 = vpack.c.bf16 %v3512_v5, %v3512_v5  ;;  %v4438_v38 = vpop.f32.mrb[4].mxu1 }
 0x2f1   : > { %3675 = vst.msk [vmem:[%s6154_s12 + $0xc] sm:$0xf] %vm243_vm1, %v4212_v46  ;;  %v4468_v22 = vadd.f32 %v4438_v38, %v4362_v25  ;;  %v3361_v17 = vpop.f32.mrb[5].mxu1 }
 0x2f2   : > { %3673 = vst.msk [vmem:[%s6154_s12 + $0x4] sm:$0xf] %vm243_vm1, %v4210_v29  ;;  %v4469_v24 = vadd.f32 %v3361_v17, %v2384_v19  ;;  %v6164_v40 = vpop.f32.mrb[48].mxu0  ;;  %v4439_v26 = vpop.f32.mrb[6].mxu1 }
 0x2f3   : > { %v3517_v47 = vadd.f32 %v4468_v22, %v6146_v63  ;;  %v4470_v16 = vadd.f32 %v4439_v26, %v4363_v20  ;;  %v6167_v8 = vpop.f32.mrb[49].mxu0  ;;  %v3364_v10 = vpop.f32.mrb[7].mxu1 }
 0x2f4   : > { %v3515_v18 = vadd.f32 %v4469_v24, %v6146_v63  ;;  %v4471_v36 = vadd.f32 %v3364_v10, %v2387_v14  ;;  %v4375_v6 = vpop.f32.mrb[50].mxu0 }
 0x2f5   : > { %v4215_v30 = vpack.c.bf16 %v3517_v47, %v3517_v47  ;;  %v3518_v7 = vadd.f32 %v4470_v16, %v6146_v63  ;;  %v2435_v45 = vpop.f32.mrb[51].mxu0 }
 0x2f6   : > { %v4213_v61 = vpack.c.bf16 %v3515_v18, %v3515_v18  ;;  %v3516_v49 = vadd.f32 %v4471_v36, %v6146_v63 }
 0x2f7   : > { %3678 = vst.msk [vmem:[%s6154_s12 + $0x18] sm:$0xf] %vm243_vm1, %v4215_v30  ;;  %v4216_v56 = vpack.c.bf16 %v3518_v7, %v3518_v7 }
 0x2f8   : > { %3676 = vst.msk [vmem:[%s6154_s12 + $0x10] sm:$0xf] %vm243_vm1, %v4213_v61  ;;  %v4214_v13 = vpack.c.bf16 %v3516_v49, %v3516_v49  ;;  %v4442_v54 = vpop.f32.mrb[8].mxu1 }
 0x2f9   : > { %3679 = vst.msk [vmem:[%s6154_s12 + $0x1c] sm:$0xf] %vm243_vm1, %v4216_v56  ;;  %v4472_v12 = vadd.f32 %v4442_v54, %v4366_v32  ;;  %v3377_v15 = vpop.f32.mrb[9].mxu1 }
 0x2fa   : > { %3677 = vst.msk [vmem:[%s6154_s12 + $0x14] sm:$0xf] %vm243_vm1, %v4214_v13  ;;  %v4473_v62 = vadd.f32 %v3377_v15, %v2400_v43  ;;  %v4443_v58 = vpop.f32.mrb[10].mxu1 }
 0x2fb   : > { %v3521_v53 = vadd.f32 %v4472_v12, %v6146_v63  ;;  %v4474_v23 = vadd.f32 %v4443_v58, %v4367_v34  ;;  %v3380_v1 = vpop.f32.mrb[11].mxu1 }
 0x2fc   : > { %v3519_v31 = vadd.f32 %v4473_v62, %v6146_v63  ;;  %v4475_v9 = vadd.f32 %v3380_v1, %v2403_v59 }
 0x2fd   : > { %v4219_v0 = vpack.c.bf16 %v3521_v53, %v3521_v53  ;;  %v3522_v60 = vadd.f32 %v4474_v23, %v6146_v63 }
 0x2fe   : > { %v4217_v55 = vpack.c.bf16 %v3519_v31, %v3519_v31  ;;  %v3520_v52 = vadd.f32 %v4475_v9, %v6146_v63 }
 0x2ff   : > { %3682 = vst.msk [vmem:[%s6154_s12 + $0x28] sm:$0xf] %vm243_vm1, %v4219_v0  ;;  %v4220_v37 = vpack.c.bf16 %v3522_v60, %v3522_v60 }
 0x300   : > { %3680 = vst.msk [vmem:[%s6154_s12 + $0x20] sm:$0xf] %vm243_vm1, %v4217_v55  ;;  %v4218_v25 = vpack.c.bf16 %v3520_v52, %v3520_v52  ;;  %v4446_v19 = vpop.f32.mrb[12].mxu1 }
 0x301   : > { %3683 = vst.msk [vmem:[%s6154_s12 + $0x2c] sm:$0xf] %vm243_vm1, %v4220_v37  ;;  %v4476_v20 = vadd.f32 %v4446_v19, %v6134_v39  ;;  %v3393_v14 = vpop.f32.mrb[13].mxu1 }
 0x302   : > { %3681 = vst.msk [vmem:[%s6154_s12 + $0x24] sm:$0xf] %vm243_vm1, %v4218_v25  ;;  %v4477_v32 = vadd.f32 %v3393_v14, %v6136_v50  ;;  %v4378_v43 = vpop.f32.mrb[52].mxu0  ;;  %v4447_v34 = vpop.f32.mrb[14].mxu1 }
 0x303   : > { %v3525_v59 = vadd.f32 %v4476_v20, %v6146_v63  ;;  %v4478_v28 = vadd.f32 %v4447_v34, %v6138_v3  ;;  %v2448_v41 = vpop.f32.mrb[53].mxu0  ;;  %v3396_v57 = vpop.f32.mrb[15].mxu1 }
 0x304   : > { %v3523_v44 = vadd.f32 %v4477_v32, %v6146_v63  ;;  %v4479_v39 = vadd.f32 %v3396_v57, %v6140_v51  ;;  %v4379_v11 = vpop.f32.mrb[54].mxu0 }
 0x305   : > { %v4223_v27 = vpack.c.bf16 %v3525_v59, %v3525_v59  ;;  %v3526_v4 = vadd.f32 %v4478_v28, %v6146_v63  ;;  %v2451_v50 = vpop.f32.mrb[55].mxu0 }
 0x306   : > { %v4221_v48 = vpack.c.bf16 %v3523_v44, %v3523_v44  ;;  %v3524_v35 = vadd.f32 %v4479_v39, %v6146_v63 }
 0x307   : > { %3686 = vst.msk [vmem:[%s6154_s12 + $0x38] sm:$0xf] %vm243_vm1, %v4223_v27  ;;  %v4224_v42 = vpack.c.bf16 %v3526_v4, %v3526_v4 }
 0x308   : > { %3684 = vst.msk [vmem:[%s6154_s12 + $0x30] sm:$0xf] %vm243_vm1, %v4221_v48  ;;  %v4222_v3 = vpack.c.bf16 %v3524_v35, %v3524_v35  ;;  %v4450_v2 = vpop.f32.mrb[16].mxu1 }
 0x309   : > { %3687 = vst.msk [vmem:[%s6154_s12 + $0x3c] sm:$0xf] %vm243_vm1, %v4224_v42  ;;  %v4480_v51 = vadd.f32 %v4450_v2, %v6164_v40  ;;  %v3409_v21 = vpop.f32.mrb[17].mxu1 }
 0x30a   : > { %3685 = vst.msk [vmem:[%s6154_s12 + $0x34] sm:$0xf] %vm243_vm1, %v4222_v3  ;;  %v4481_v33 = vadd.f32 %v3409_v21, %v6167_v8  ;;  %v4451_v5 = vpop.f32.mrb[18].mxu1 }
 0x30b   : > { %v3529_v46 = vadd.f32 %v4480_v51, %v6146_v63  ;;  %v4482_v29 = vadd.f32 %v4451_v5, %v4375_v6  ;;  %v3412_v38 = vpop.f32.mrb[19].mxu1 }
 0x30c   : > { %v3527_v22 = vadd.f32 %v4481_v33, %v6146_v63  ;;  %v4483_v17 = vadd.f32 %v3412_v38, %v2435_v45 }
 0x30d   : > { %v4227_v24 = vpack.c.bf16 %v3529_v46, %v3529_v46  ;;  %v3530_v26 = vadd.f32 %v4482_v29, %v6146_v63 }
 0x30e   : > { %v4225_v40 = vpack.c.bf16 %v3527_v22, %v3527_v22  ;;  %v3528_v47 = vadd.f32 %v4483_v17, %v6146_v63  ;;  %v4382_v16 = vpop.f32.mrb[56].mxu0 }
 0x30f   : > { %3690 = vst.msk [vmem:[%s6154_s12 + $0x48] sm:$0xf] %vm243_vm1, %v4227_v24  ;;  %v4228_v8 = vpack.c.bf16 %v3530_v26, %v3530_v26  ;;  %v2464_v10 = vpop.f32.mrb[57].mxu0 }
 0x310   : > { %3688 = vst.msk [vmem:[%s6154_s12 + $0x40] sm:$0xf] %vm243_vm1, %v4225_v40  ;;  %v4226_v18 = vpack.c.bf16 %v3528_v47, %v3528_v47  ;;  %v4383_v36 = vpop.f32.mrb[58].mxu0  ;;  %v4454_v6 = vpop.f32.mrb[20].mxu1 }
 0x311   : > { %3691 = vst.msk [vmem:[%s6154_s12 + $0x4c] sm:$0xf] %vm243_vm1, %v4228_v8  ;;  %v4484_v30 = vadd.f32 %v4454_v6, %v4378_v43  ;;  %v2467_v7 = vpop.f32.mrb[59].mxu0  ;;  %v3425_v45 = vpop.f32.mrb[21].mxu1 }
 0x312   : > { %3689 = vst.msk [vmem:[%s6154_s12 + $0x44] sm:$0xf] %vm243_vm1, %v4226_v18  ;;  %v4485_v61 = vadd.f32 %v3425_v45, %v2448_v41  ;;  %v4455_v49 = vpop.f32.mrb[22].mxu1 }
 0x313   : > { %v3533_v56 = vadd.f32 %v4484_v30, %v6146_v63  ;;  %v4486_v13 = vadd.f32 %v4455_v49, %v4379_v11  ;;  %v3428_v54 = vpop.f32.mrb[23].mxu1 }
 0x314   : > { %v3531_v12 = vadd.f32 %v4485_v61, %v6146_v63  ;;  %v4487_v15 = vadd.f32 %v3428_v54, %v2451_v50 }
 0x315   : > { %v4231_v62 = vpack.c.bf16 %v3533_v56, %v3533_v56  ;;  %v3534_v58 = vadd.f32 %v4486_v13, %v6146_v63 }
 0x316   : > { %v4229_v53 = vpack.c.bf16 %v3531_v12, %v3531_v12  ;;  %v3532_v23 = vadd.f32 %v4487_v15, %v6146_v63 }
 0x317   : > { %3694 = vst.msk [vmem:[%s6154_s12 + $0x58] sm:$0xf] %vm243_vm1, %v4231_v62  ;;  %v4232_v1 = vpack.c.bf16 %v3534_v58, %v3534_v58 }
 0x318   : > { %3692 = vst.msk [vmem:[%s6154_s12 + $0x50] sm:$0xf] %vm243_vm1, %v4229_v53  ;;  %v4230_v31 = vpack.c.bf16 %v3532_v23, %v3532_v23  ;;  %v4458_v9 = vpop.f32.mrb[24].mxu1 }
 0x319   : > { %3695 = vst.msk [vmem:[%s6154_s12 + $0x5c] sm:$0xf] %vm243_vm1, %v4232_v1  ;;  %v4488_v0 = vadd.f32 %v4458_v9, %v4382_v16  ;;  %v3441_v60 = vpop.f32.mrb[25].mxu1 }
 0x31a   : > { %3693 = vst.msk [vmem:[%s6154_s12 + $0x54] sm:$0xf] %vm243_vm1, %v4230_v31  ;;  %v4489_v55 = vadd.f32 %v3441_v60, %v2464_v10  ;;  %v4459_v52 = vpop.f32.mrb[26].mxu1 }
 0x31b   : > { %v3537_v37 = vadd.f32 %v4488_v0, %v6146_v63  ;;  %v4490_v25 = vadd.f32 %v4459_v52, %v4383_v36  ;;  %v3444_v19 = vpop.f32.mrb[27].mxu1 }
 0x31c   : > { %v3535_v20 = vadd.f32 %v4489_v55, %v6146_v63  ;;  %v4491_v14 = vadd.f32 %v3444_v19, %v2467_v7 }
 0x31d   : > { %v4235_v32 = vpack.c.bf16 %v3537_v37, %v3537_v37  ;;  %v3538_v43 = vadd.f32 %v4490_v25, %v6146_v63 }
 0x31e   : > { %v4233_v34 = vpack.c.bf16 %v3535_v20, %v3535_v20  ;;  %v3536_v59 = vadd.f32 %v4491_v14, %v6146_v63 }
 0x31f   : > { %3698 = vst.msk [vmem:[%s6154_s12 + $0x68] sm:$0xf] %vm243_vm1, %v4235_v32  ;;  %v4236_v28 = vpack.c.bf16 %v3538_v43, %v3538_v43 }
 0x320   : > { %3696 = vst.msk [vmem:[%s6154_s12 + $0x60] sm:$0xf] %vm243_vm1, %v4233_v34  ;;  %v4234_v41 = vpack.c.bf16 %v3536_v59, %v3536_v59  ;;  %v4462_v57 = vpop.f32.mrb[28].mxu1 }
 0x321   : > { %3699 = vst.msk [vmem:[%s6154_s12 + $0x6c] sm:$0xf] %vm243_vm1, %v4236_v28  ;;  %v3457_v44 = vpop.f32.mrb[29].mxu1 }
 0x322   : > { %3697 = vst.msk [vmem:[%s6154_s12 + $0x64] sm:$0xf] %vm243_vm1, %v4234_v41  ;;  %v4386_v39 = vpop.f32.mrb[60].mxu0  ;;  %v4463_v11 = vpop.f32.mrb[30].mxu1 }
 0x323   : > { %v4492_v27 = vadd.f32 %v4462_v57, %v4386_v39  ;;  %v2480_v4 = vpop.f32.mrb[61].mxu0  ;;  %v3460_v50 = vpop.f32.mrb[31].mxu1 }
 0x324   : > { %v4493_v48 = vadd.f32 %v3457_v44, %v2480_v4  ;;  %v4387_v35 = vpop.f32.mrb[62].mxu0 }
 0x325   : > { %v3541_v42 = vadd.f32 %v4492_v27, %v6146_v63  ;;  %v4494_v3 = vadd.f32 %v4463_v11, %v4387_v35  ;;  %v2483_v2 = vpop.f32.mrb[63].mxu0 }
 0x326   : > { %v3539_v51 = vadd.f32 %v4493_v48, %v6146_v63  ;;  %v4495_v21 = vadd.f32 %v3460_v50, %v2483_v2 }
 0x327   : > { %v4239_v33 = vpack.c.bf16 %v3541_v42, %v3541_v42  ;;  %v3542_v5 = vadd.f32 %v4494_v3, %v6146_v63 }
 0x328   : > { %v4237_v46 = vpack.c.bf16 %v3539_v51, %v3539_v51  ;;  %v3540_v29 = vadd.f32 %v4495_v21, %v6146_v63 }
 0x329   : > { %3702 = vst.msk [vmem:[%s6154_s12 + $0x78] sm:$0xf] %vm243_vm1, %v4239_v33  ;;  %v4240_v38 = vpack.c.bf16 %v3542_v5, %v3542_v5 }
 0x32a   : > { %3700 = vst.msk [vmem:[%s6154_s12 + $0x70] sm:$0xf] %vm243_vm1, %v4237_v46  ;;  %v4238_v22 = vpack.c.bf16 %v3540_v29, %v3540_v29 }
 0x32b   : > { %3703 = vst.msk [vmem:[%s6154_s12 + $0x7c] sm:$0xf] %vm243_vm1, %v4240_v38 }
 0x32c   : > { %3701 = vst.msk [vmem:[%s6154_s12 + $0x74] sm:$0xf] %vm243_vm1, %v4238_v22 }
 0x32d   : > { %4749 = shalt.err (!%p4746_p5)
}
 0x32e   : > { %s4750_s9 = scalar_lea.hbm %s6257_s25, 2048  ;;  %s4754_s10 = scalar_lea.hbm %s6320_s5, 4096 }
 0x32f   : > { %p4751_p6 = scmp.ne.s32.totalorder %s6257_s25, %s4750_s9  ;;  %p4755_p10 = scmp.lt.u32.totalorder %s6257_s25, %s6320_s5 }
 0x330   : > { %p4756_p11 = scmp.lt.u32.totalorder %s4754_s10, %s4750_s9  ;;  %p4758_p13 = scmp.lt.u32.totalorder %s4750_s9, %s6257_s25 }
 0x331   : > { %p4752_p7 = pnand %p4751_p6, %p4892_p4 }
 0x332   : > { %p4757_p12 = por %p4756_p11, %p4755_p10 }
 0x333   : > { %p4753_p9 = pneg %p4752_p7 }
 0x334   : > { %p4759_p0 = por %p4758_p13, %p4757_p12 }
 0x336   : > { %p4760_p1 = pnand %p4759_p0, %p4753_p9 }
 0x338   : > { %4763 = shalt.err (!%p4760_p1)
}
 0x339   : > { %s4820_s13 = smov 64   ;;  %s4821_s17 = smov 4  }
 0x33a   : > { %4529 = dma.vmem_to_hbm [thread:$0]  (%p4892_p4), %s6259_s16, 2048, %s6257_s25, %s6269_s21, %s4820_s13, %s4820_s13, %s4821_s17  }
 0x33b PF: > { %p4535_p2 = scmp.ge.s32.totalorder %s4814_s23, 2  ;;  %s3736_s24 = sand.u32 1, %s4794_s18  }
 0x33c   : > { %s3737_s27 = scalar_lea.sflag [#allocation4], %s3736_s24 }
 0x33d   : > { %p4532_p3 = pnand %p4535_p2, %p4899_p8 }
 0x33f   : > { %4789 = dma.done.wait (!%p4532_p3), %s3737_s27, 2048  }
 0x340   : > { %4791 = vsyncadd (!%p4532_p3), %s3737_s27, 4294965248  ;;  %s18_s23 = sadd.s32 1, %s4814_s23   ;;  %s6329_s18 = smov %s4798_s19 }
 0x341   : > { %p15_p5 = scmp.ge.s32.totalorder %s18_s23, 4   ;;  %s6330_s19 = smov %s4802_s20 }
 0x342   : > { %s6331_s20 = smov %s4905_s6  ;;  %s6332_s21 = smov %s4810_s22 }
 0x343   : > { %s6333_s22 = smov %s6335_s26  ;;  %17 = sbr.rel (!%p15_p5) target bundleno = 4 (0x4), region = 85 }
 0x34a   :  { %3742 = vsyncpa [#allocation4], 1 }
 0x34b   :  { %3744 = vsyncpa [#allocation4 + $0x1], 1 }

</bundles_post_ra>
